<compile_context>
chip_gen: v5e
topology: v5e:2x2
jax: 0.10.0
libtpu: 0.0.40
codegen_flags: <defaults>
</compile_context>

<pallas_src>
import math

import jax
import jax.numpy as jnp
from jax.experimental import pallas as pl
from jax.experimental.pallas import tpu as pltpu

# ----------------------------- configuration -----------------------------
THETAS_DIM = 32          # cfg.MODEL.DENOISING_MODEL.POSE_DIM
BETAS_DIM = 10           # cfg.MODEL.DENOISING_MODEL.SHAPE_DIM
HIDDEN_DIM = 64          # cfg.MODEL.DENOISING_MODEL.HIDDEN_LAYER_DIM
NUM_BLOCKS_POSE = 2
NUM_BLOCKS_SHAPE = 2
NUM_BLOCKS = 2           # fused block count (asserted == POSE == SHAPE)
COND_EMB_DIM = 2048      # PREDICTORS['prohmr']['thetas_emb_dim'] (== betas_emb_dim)
BATCH = 8                # >= 8 fills the f32 sublane height

TIME_DIM_POSE = THETAS_DIM * 4     # 128
TIME_DIM_BETAS = BETAS_DIM * 4     # 40
P_DIM = THETAS_DIM + BETAS_DIM     # 42
OUT_PAD = 128                      # lane-dense output slab width
WCOL = 256                         # packed slab width (2 x 128)

# weight-slab row offsets (all multiples of 8 -> aligned (8,128) tiles, no copies)
ROW_T1 = 0       # time Linear1  (block-diag pose|betas)        [128, 256]
ROW_T2 = 128     # time Linear2                                 [256, 256]
ROW_TI = 384     # per-block time injections (block i -> cols i*128) [256, 256]
ROW_IF = 640     # init (cols 0:128) | final (cols 128:256)     [128, 256]
ROW_FC1 = 768    # fc1 block0 (cols 0:128) | fc1 block1         [128, 256]
ROW_FC2 = 896    # fc2 block0 (cols 0:128) | fc2 block1         [128, 256]
W_ROWS = 1024

# bias-slab rows
BR_T1, BR_T2, BR_TI, BR_IF, BR_FC1, BR_FC2, BR_BC, BR_SC = range(8)

_VMEM = pl.BlockSpec(memory_space=pltpu.MemorySpace.VMEM)


# ----------------------------- in-kernel math -----------------------------
def _gelu(x):
    # exact GELU (erf form), matches torch.nn.GELU() default
    return 0.5 * x * (1.0 + jax.lax.erf(x * 0.7071067811865475))


def _silu(x):
    return x * jax.nn.sigmoid(x)


# ----------------------------- fused Pallas kernel -----------------------------
def _fc_fused_kernel(act_ref, cond_ref, wq_ref, w_ref, b_ref, o_ref):
    f32 = jnp.float32
    b = b_ref[...]                                             # [8, 256]

    # ---- cond injection for ALL blocks: SiLU(cond) @ dequant(wq) + bc -> [B, 256]
    scale = b[BR_SC:BR_SC + 1, :]                              # [1, 256] per-column scales
    w_c = (wq_ref[...].astype(f32) * scale).astype(jnp.bfloat16)
    silu_c = _silu(cond_ref[...])
    cond_inj = jnp.dot(silu_c.astype(jnp.bfloat16), w_c,
                       preferred_element_type=f32) + b[BR_BC:BR_BC + 1, :]

    # ---- fused time MLPs (pose occupies cols 0:128, betas cols 128:168)
    t_in = act_ref[:, 128:256]                                 # [B, 128]
    tt = _gelu(jnp.dot(t_in, w_ref[ROW_T1:ROW_T1 + 128, :],
                       preferred_element_type=f32) + b[BR_T1:BR_T1 + 1, :])
    tt = jnp.dot(tt, w_ref[ROW_T2:ROW_T2 + 256, :],
                 preferred_element_type=f32) + b[BR_T2:BR_T2 + 1, :]
    t_inj = jnp.dot(_silu(tt), w_ref[ROW_TI:ROW_TI + 256, :],
                    preferred_element_type=f32) + b[BR_TI:BR_TI + 1, :]

    # ---- init (block-diagonal pose|betas; state cols 42:128 stay exactly zero)
    x_pad = act_ref[:, 0:128]                                  # [B, 128]
    s = jnp.dot(x_pad, w_ref[ROW_IF:ROW_IF + 128, 0:128],
                preferred_element_type=f32) + b[BR_IF:BR_IF + 1, 0:128]

    # ---- fused residual blocks
    for i in range(NUM_BLOCKS):
        c0, c1 = i * 128, (i + 1) * 128
        hid = _gelu(jnp.dot(s, w_ref[ROW_FC1:ROW_FC1 + 128, c0:c1],
                            preferred_element_type=f32) + b[BR_FC1:BR_FC1 + 1, c0:c1])
        hid = hid + t_inj[:, c0:c1] + cond_inj[:, c0:c1]
        s = s + jnp.dot(hid, w_ref[ROW_FC2:ROW_FC2 + 128, c0:c1],
                        preferred_element_type=f32) + b[BR_FC2:BR_FC2 + 1, c0:c1]

    # ---- final projection, pre-padded to 128 lanes -> single full lane-dense store
    o_ref[...] = (jnp.dot(s, w_ref[ROW_IF:ROW_IF + 128, 128:256],
                          preferred_element_type=f32)
                  + b[BR_IF:BR_IF + 1, 128:256]).astype(o_ref.dtype)


# ----------------------------- plain-JAX glue -----------------------------
def sinusoidal_pos_emb(t, dim):
    half = dim // 2
    freqs = jnp.exp(jnp.arange(half, dtype=jnp.float32) * (-math.log(10000.0) / (half - 1)))
    emb = t.astype(jnp.float32)[:, None] * freqs[None, :]
    return jnp.concatenate([jnp.sin(emb), jnp.cos(emb)], axis=-1)


def _linear_params(key, in_dim, out_dim):
    kw, kb = jax.random.split(key)
    return {
        "w": jax.random.normal(kw, (in_dim, out_dim), jnp.float32) * 0.02,
        "b": jax.random.normal(kb, (out_dim,), jnp.float32) * 0.01,
    }


def _block_params(key, input_dim, hidden_dim, time_dim, cond_dim):
    k1, k2, k3, k4 = jax.random.split(key, 4)
    return {
        "fc1": _linear_params(k1, input_dim, hidden_dim),
        "time": _linear_params(k2, time_dim, hidden_dim),
        "cond": _linear_params(k3, cond_dim, hidden_dim),
        "fc2": _linear_params(k4, hidden_dim, input_dim),
    }


def init_fc_params(key):
    keys = iter(jax.random.split(key, 64))
    p = {}
    p["time_mlp1"] = _linear_params(next(keys), THETAS_DIM, TIME_DIM_POSE)
    p["time_mlp2"] = _linear_params(next(keys), TIME_DIM_POSE, TIME_DIM_POSE)
    p["init_mlp"] = _linear_params(next(keys), THETAS_DIM, THETAS_DIM)
    p["blocks"] = [
        _block_params(next(keys), THETAS_DIM, HIDDEN_DIM, TIME_DIM_POSE, COND_EMB_DIM)
        for _ in range(NUM_BLOCKS_POSE)
    ]
    p["final_mlp"] = _linear_params(next(keys), THETAS_DIM, THETAS_DIM)
    p["time_mlp1_b"] = _linear_params(next(keys), BETAS_DIM, TIME_DIM_BETAS)
    p["time_mlp2_b"] = _linear_params(next(keys), TIME_DIM_BETAS, TIME_DIM_BETAS)
    p["init_mlp_b"] = _linear_params(next(keys), BETAS_DIM, BETAS_DIM)
    p["blocks_b"] = [
        _block_params(next(keys), BETAS_DIM, HIDDEN_DIM, TIME_DIM_BETAS, COND_EMB_DIM)
        for _ in range(NUM_BLOCKS_SHAPE)
    ]
    p["final_mlp_b"] = _linear_params(next(keys), BETAS_DIM, BETAS_DIM)
    return p


def pack_fc_params(p):
    """Pack all PyTorch-style per-layer params into 3 slabs (done once, offline)."""
    assert NUM_BLOCKS_POSE == NUM_BLOCKS_SHAPE == NUM_BLOCKS == 2
    H, TP, TB, TD = HIDDEN_DIM, TIME_DIM_POSE, TIME_DIM_BETAS, THETAS_DIM

    w = jnp.zeros((W_ROWS, WCOL), jnp.float32)
    b = jnp.zeros((8, WCOL), jnp.float32)

    def put(slab, arr, r, c):
        return slab.at[r:r + arr.shape[0], c:c + arr.shape[1]].set(arr)

    # fused time MLP (pose -> cols 0:128, betas -> cols 128:168)
    w = put(w, p["time_mlp1"]["w"], ROW_T1, 0)
    w = put(w, p["time_mlp1_b"]["w"], ROW_T1 + TD, 128)
    b = put(b, p["time_mlp1"]["b"][None, :], BR_T1, 0)
    b = put(b, p["time_mlp1_b"]["b"][None, :], BR_T1, 128)
    w = put(w, p["time_mlp2"]["w"], ROW_T2, 0)
    w = put(w, p["time_mlp2_b"]["w"], ROW_T2 + TP, 128)
    b = put(b, p["time_mlp2"]["b"][None, :], BR_T2, 0)
    b = put(b, p["time_mlp2_b"]["b"][None, :], BR_T2, 128)
    # per-block time injections (block i -> cols i*128:(i+1)*128 = [pose 64 | betas 64])
    for i in range(NUM_BLOCKS):
        w = put(w, p["blocks"][i]["time"]["w"], ROW_TI, i * 128)
        w = put(w, p["blocks_b"][i]["time"]["w"], ROW_TI + TP, i * 128 + H)
        b = put(b, p["blocks"][i]["time"]["b"][None, :], BR_TI, i * 128)
        b = put(b, p["blocks_b"][i]["time"]["b"][None, :], BR_TI, i * 128 + H)
    # init (cols 0:128) and final (cols 128:256), block-diagonal pose|betas
    w = put(w, p["init_mlp"]["w"], ROW_IF, 0)
    w = put(w, p["init_mlp_b"]["w"], ROW_IF + TD, TD)
    w = put(w, p["final_mlp"]["w"], ROW_IF, 128)
    w = put(w, p["final_mlp_b"]["w"], ROW_IF + TD, 128 + TD)
    b = put(b, p["init_mlp"]["b"][None, :], BR_IF, 0)
    b = put(b, p["init_mlp_b"]["b"][None, :], BR_IF, TD)
    b = put(b, p["final_mlp"]["b"][None, :], BR_IF, 128)
    b = put(b, p["final_mlp_b"]["b"][None, :], BR_IF, 128 + TD)
    # per-block fc1/fc2, block-diagonal pose|betas (block i -> column half i)
    for i in range(NUM_BLOCKS):
        w = put(w, p["blocks"][i]["fc1"]["w"], ROW_FC1, i * 128)
        w = put(w, p["blocks_b"][i]["fc1"]["w"], ROW_FC1 + TD, i * 128 + H)
        w = put(w, p["blocks"][i]["fc2"]["w"], ROW_FC2, i * 128)
        w = put(w, p["blocks_b"][i]["fc2"]["w"], ROW_FC2 + H, i * 128 + TD)
        b = put(b, p["blocks"][i]["fc1"]["b"][None, :], BR_FC1, i * 128)
        b = put(b, p["blocks_b"][i]["fc1"]["b"][None, :], BR_FC1, i * 128 + H)
        b = put(b, p["blocks"][i]["fc2"]["b"][None, :], BR_FC2, i * 128)
        b = put(b, p["blocks_b"][i]["fc2"]["b"][None, :], BR_FC2, i * 128 + TD)

    # cond projection: block-interleaved columns, weight-only int8 + per-column scales
    wc = jnp.zeros((COND_EMB_DIM, WCOL), jnp.float32)
    bc = jnp.zeros((WCOL,), jnp.float32)
    for i in range(NUM_BLOCKS):
        wc = wc.at[:, i * 128:i * 128 + H].set(p["blocks"][i]["cond"]["w"])
        wc = wc.at[:, i * 128 + H:(i + 1) * 128].set(p["blocks_b"][i]["cond"]["w"])
        bc = bc.at[i * 128:i * 128 + H].set(p["blocks"][i]["cond"]["b"])
        bc = bc.at[i * 128 + H:(i + 1) * 128].set(p["blocks_b"][i]["cond"]["b"])
    scale = jnp.maximum(jnp.max(jnp.abs(wc), axis=0), 1e-8) / 127.0
    wq = jnp.clip(jnp.round(wc / scale), -127.0, 127.0).astype(jnp.int8)
    b = put(b, bc[None, :], BR_BC, 0)
    b = put(b, scale[None, :], BR_SC, 0)

    return {"wq": wq, "w": w, "b": b}


def _cost_estimate(B, args_bytes):
    mm = B * COND_EMB_DIM * WCOL                 # cond projection
    mm += B * 128 * WCOL                         # time L1
    mm += 2 * B * 256 * WCOL                     # time L2 + time injections
    mm += B * 128 * 128 * (2 + 2 * NUM_BLOCKS)   # init + final + per-block fc1/fc2
    trans = B * (COND_EMB_DIM + 3 * WCOL + NUM_BLOCKS * 128)
    return pl.CostEstimate(flops=2 * mm, transcendentals=trans,
                           bytes_accessed=int(args_bytes + B * OUT_PAD * 4))


def fc_forward(packed, x, time, cond_emb):
    """x: [B, P] noised SMPL params, time: [B], cond_emb: [B, 2048]. Returns [B, P]."""
    B = x.shape[0]
    t_pose = sinusoidal_pos_emb(time, THETAS_DIM)      # [B, 32]
    t_betas = sinusoidal_pos_emb(time, BETAS_DIM)      # [B, 10]
    # activation slab: [thetas|betas|0...(128) , pose-emb|betas-emb|0...(128)]
    act = jnp.concatenate(
        [x.astype(jnp.float32), jnp.zeros((B, 128 - P_DIM), jnp.float32),
         t_pose, t_betas, jnp.zeros((B, 128 - P_DIM), jnp.float32)], axis=-1)

    args = (act, cond_emb.astype(jnp.float32), packed["wq"], packed["w"], packed["b"])
    args_bytes = sum(int(a.size) * a.dtype.itemsize for a in args)

    out_pad = pl.pallas_call(
        _fc_fused_kernel,
        out_shape=jax.ShapeDtypeStruct((B, OUT_PAD), jnp.float32),
        in_specs=[_VMEM] * len(args),
        out_specs=_VMEM,
        cost_estimate=_cost_estimate(B, args_bytes),
    )(*args)
    return out_pad[:, :P_DIM]


# ----------------------------- pure-JAX f32 reference (faithful to PyTorch) ------------
def fc_forward_ref(params, x, time, cond_emb):
    def linear(v, lin):
        return jnp.dot(v, lin["w"], preferred_element_type=jnp.float32) + lin["b"]

    def res_block(h, t, c, blk):
        hid = _gelu(linear(h, blk["fc1"]))
        hid = hid + linear(_silu(t), blk["time"])
        hid = hid + linear(_silu(c), blk["cond"])
        return h + linear(hid, blk["fc2"])

    thetas = x[:, :-BETAS_DIM]
    betas = x[:, -BETAS_DIM:]
    th = linear(thetas, params["init_mlp"])
    tt = linear(sinusoidal_pos_emb(time, THETAS_DIM), params["time_mlp1"])
    tt = linear(_gelu(tt), params["time_mlp2"])
    for blk in params["blocks"]:
        th = res_block(th, tt, cond_emb, blk)
    th = linear(th, params["final_mlp"])

    be = linear(betas, params["init_mlp_b"])
    ttb = linear(sinusoidal_pos_emb(time, BETAS_DIM), params["time_mlp1_b"])
    ttb = linear(_gelu(ttb), params["time_mlp2_b"])
    for blk in params["blocks_b"]:
        be = res_block(be, ttb, cond_emb, blk)
    be = linear(be, params["final_mlp_b"])
    return jnp.concatenate([th, be], axis=1)


if __name__ == "__main__":
    params = init_fc_params(jax.random.PRNGKey(1))
    packed = pack_fc_params(params)   # packed once, reused across diffusion steps

    key = jax.random.PRNGKey(0)
    kx, kt, kc = jax.random.split(key, 3)
    x = jax.random.normal(kx, (BATCH, P_DIM), jnp.float32)
    time = jax.random.uniform(kt, (BATCH,), jnp.float32, minval=0.0, maxval=1000.0)
    cond_emb = jax.random.normal(kc, (BATCH, COND_EMB_DIM), jnp.float32)

    out = jax.block_until_ready(jax.jit(fc_forward)(packed, x, time, cond_emb))
    assert out.shape == (BATCH, P_DIM) and out.dtype == jnp.float32

    ref = jax.block_until_ready(jax.jit(fc_forward_ref)(params, x, time, cond_emb))
    assert bool(jnp.all(jnp.isfinite(out)))
    max_err = float(jnp.max(jnp.abs(out - ref)))
    assert bool(jnp.allclose(out, ref, atol=1e-2, rtol=1e-2)), \
        f"kernel/ref mismatch (max abs err {max_err})"
    print("KERNEL_OK")
</pallas_src>

<mosaic_0001>
module attributes {stable_mosaic.version = 11 : i64} {
  func.func @_fc_fused_kernel(%arg0: memref<8x256xf32, #tpu.memory_space<vmem>>, %arg1: memref<8x2048xf32, #tpu.memory_space<vmem>>, %arg2: memref<2048x256xi8, #tpu.memory_space<vmem>>, %arg3: memref<1024x256xf32, #tpu.memory_space<vmem>>, %arg4: memref<8x256xf32, #tpu.memory_space<vmem>>, %arg5: memref<8x128xf32, #tpu.memory_space<vmem>>) attributes {dimension_semantics = [], scalar_prefetch = 0 : i64, scratch_operands = 0 : i64, tpu.core_type = #tpu.core_type<tc>} {
    %c0 = arith.constant 0 : index
    %c0_0 = arith.constant 0 : index
    %0 = vector.load %arg4[%c0, %c0_0] : memref<8x256xf32, #tpu.memory_space<vmem>>, vector<8x256xf32>
    %1 = vector.extract_strided_slice %0 {offsets = [7, 0], sizes = [1, 256], strides = [1, 1]} : vector<8x256xf32> to vector<1x256xf32>
    %c0_1 = arith.constant 0 : index
    %c0_2 = arith.constant 0 : index
    %2 = vector.load %arg2[%c0_1, %c0_2] : memref<2048x256xi8, #tpu.memory_space<vmem>>, vector<2048x256xi8>
    %3 = arith.sitofp %2 : vector<2048x256xi8> to vector<2048x256xf32>
    %4 = vector.broadcast %1 : vector<1x256xf32> to vector<2048x256xf32>
    %5 = arith.mulf %3, %4 : vector<2048x256xf32>
    %6 = arith.truncf %5 : vector<2048x256xf32> to vector<2048x256xbf16>
    %c0_3 = arith.constant 0 : index
    %c0_4 = arith.constant 0 : index
    %7 = vector.load %arg1[%c0_3, %c0_4] : memref<8x2048xf32, #tpu.memory_space<vmem>>, vector<8x2048xf32>
    %8 = arith.negf %7 : vector<8x2048xf32>
    %9 = math.exp %8 : vector<8x2048xf32>
    %cst = arith.constant 1.000000e+00 : f32
    %10 = vector.broadcast %cst : f32 to vector<8x2048xf32>
    %11 = arith.addf %10, %9 : vector<8x2048xf32>
    %12 = arith.divf %10, %11 : vector<8x2048xf32>
    %13 = arith.mulf %7, %12 : vector<8x2048xf32>
    %14 = arith.truncf %13 : vector<8x2048xf32> to vector<8x2048xbf16>
    %cst_5 = arith.constant dense<0.000000e+00> : vector<8x256xf32>
    %15 = tpu.matmul %14, %6, %cst_5 {dimension_numbers = #tpu.dot_dimension_numbers<[1], [0], [0], [1], [0, 0, 1, 1], [], []>} : vector<8x2048xbf16>, vector<2048x256xbf16>, vector<8x256xf32> -> vector<8x256xf32>
    %16 = vector.extract_strided_slice %0 {offsets = [6, 0], sizes = [1, 256], strides = [1, 1]} : vector<8x256xf32> to vector<1x256xf32>
    %17 = vector.broadcast %16 : vector<1x256xf32> to vector<8x256xf32>
    %18 = arith.addf %15, %17 : vector<8x256xf32>
    %c0_6 = arith.constant 0 : index
    %c128 = arith.constant 128 : index
    %19 = vector.load %arg0[%c0_6, %c128] : memref<8x256xf32, #tpu.memory_space<vmem>>, vector<8x128xf32>
    %c0_7 = arith.constant 0 : index
    %c0_8 = arith.constant 0 : index
    %20 = vector.load %arg3[%c0_7, %c0_8] : memref<1024x256xf32, #tpu.memory_space<vmem>>, vector<128x256xf32>
    %cst_9 = arith.constant dense<0.000000e+00> : vector<8x256xf32>
    %21 = tpu.matmul %19, %20, %cst_9 {dimension_numbers = #tpu.dot_dimension_numbers<[1], [0], [0], [1], [0, 0, 1, 1], [], []>} : vector<8x128xf32>, vector<128x256xf32>, vector<8x256xf32> -> vector<8x256xf32>
    %22 = vector.extract_strided_slice %0 {offsets = [0, 0], sizes = [1, 256], strides = [1, 1]} : vector<8x256xf32> to vector<1x256xf32>
    %23 = vector.broadcast %22 : vector<1x256xf32> to vector<8x256xf32>
    %24 = arith.addf %21, %23 : vector<8x256xf32>
    %cst_10 = arith.constant 5.000000e-01 : f32
    %25 = vector.broadcast %cst_10 : f32 to vector<8x256xf32>
    %26 = arith.mulf %25, %24 : vector<8x256xf32>
    %cst_11 = arith.constant 0.707106769 : f32
    %27 = vector.broadcast %cst_11 : f32 to vector<8x256xf32>
    %28 = arith.mulf %24, %27 : vector<8x256xf32>
    %29 = math.erf %28 : vector<8x256xf32>
    %cst_12 = arith.constant 1.000000e+00 : f32
    %30 = vector.broadcast %cst_12 : f32 to vector<8x256xf32>
    %31 = arith.addf %30, %29 : vector<8x256xf32>
    %32 = arith.mulf %26, %31 : vector<8x256xf32>
    %c128_13 = arith.constant 128 : index
    %c0_14 = arith.constant 0 : index
    %33 = vector.load %arg3[%c128_13, %c0_14] : memref<1024x256xf32, #tpu.memory_space<vmem>>, vector<256x256xf32>
    %cst_15 = arith.constant dense<0.000000e+00> : vector<8x256xf32>
    %34 = tpu.matmul %32, %33, %cst_15 {dimension_numbers = #tpu.dot_dimension_numbers<[1], [0], [0], [1], [0, 0, 1, 1], [], []>} : vector<8x256xf32>, vector<256x256xf32>, vector<8x256xf32> -> vector<8x256xf32>
    %35 = vector.extract_strided_slice %0 {offsets = [1, 0], sizes = [1, 256], strides = [1, 1]} : vector<8x256xf32> to vector<1x256xf32>
    %36 = vector.broadcast %35 : vector<1x256xf32> to vector<8x256xf32>
    %37 = arith.addf %34, %36 : vector<8x256xf32>
    %38 = arith.negf %37 : vector<8x256xf32>
    %39 = math.exp %38 : vector<8x256xf32>
    %cst_16 = arith.constant 1.000000e+00 : f32
    %40 = vector.broadcast %cst_16 : f32 to vector<8x256xf32>
    %41 = arith.addf %40, %39 : vector<8x256xf32>
    %42 = arith.divf %40, %41 : vector<8x256xf32>
    %43 = arith.mulf %37, %42 : vector<8x256xf32>
    %c384 = arith.constant 384 : index
    %c0_17 = arith.constant 0 : index
    %44 = vector.load %arg3[%c384, %c0_17] : memref<1024x256xf32, #tpu.memory_space<vmem>>, vector<256x256xf32>
    %cst_18 = arith.constant dense<0.000000e+00> : vector<8x256xf32>
    %45 = tpu.matmul %43, %44, %cst_18 {dimension_numbers = #tpu.dot_dimension_numbers<[1], [0], [0], [1], [0, 0, 1, 1], [], []>} : vector<8x256xf32>, vector<256x256xf32>, vector<8x256xf32> -> vector<8x256xf32>
    %46 = vector.extract_strided_slice %0 {offsets = [2, 0], sizes = [1, 256], strides = [1, 1]} : vector<8x256xf32> to vector<1x256xf32>
    %47 = vector.broadcast %46 : vector<1x256xf32> to vector<8x256xf32>
    %48 = arith.addf %45, %47 : vector<8x256xf32>
    %c0_19 = arith.constant 0 : index
    %c0_20 = arith.constant 0 : index
    %49 = vector.load %arg0[%c0_19, %c0_20] : memref<8x256xf32, #tpu.memory_space<vmem>>, vector<8x128xf32>
    %c640 = arith.constant 640 : index
    %c0_21 = arith.constant 0 : index
    %50 = vector.load %arg3[%c640, %c0_21] : memref<1024x256xf32, #tpu.memory_space<vmem>>, vector<128x128xf32>
    %cst_22 = arith.constant dense<0.000000e+00> : vector<8x128xf32>
    %51 = tpu.matmul %49, %50, %cst_22 {dimension_numbers = #tpu.dot_dimension_numbers<[1], [0], [0], [1], [0, 0, 1, 1], [], []>} : vector<8x128xf32>, vector<128x128xf32>, vector<8x128xf32> -> vector<8x128xf32>
    %52 = vector.extract_strided_slice %0 {offsets = [3, 0], sizes = [1, 128], strides = [1, 1]} : vector<8x256xf32> to vector<1x128xf32>
    %53 = vector.broadcast %52 : vector<1x128xf32> to vector<8x128xf32>
    %54 = arith.addf %51, %53 : vector<8x128xf32>
    %c768 = arith.constant 768 : index
    %c0_23 = arith.constant 0 : index
    %55 = vector.load %arg3[%c768, %c0_23] : memref<1024x256xf32, #tpu.memory_space<vmem>>, vector<128x128xf32>
    %cst_24 = arith.constant dense<0.000000e+00> : vector<8x128xf32>
    %56 = tpu.matmul %54, %55, %cst_24 {dimension_numbers = #tpu.dot_dimension_numbers<[1], [0], [0], [1], [0, 0, 1, 1], [], []>} : vector<8x128xf32>, vector<128x128xf32>, vector<8x128xf32> -> vector<8x128xf32>
    %57 = vector.extract_strided_slice %0 {offsets = [4, 0], sizes = [1, 128], strides = [1, 1]} : vector<8x256xf32> to vector<1x128xf32>
    %58 = vector.broadcast %57 : vector<1x128xf32> to vector<8x128xf32>
    %59 = arith.addf %56, %58 : vector<8x128xf32>
    %cst_25 = arith.constant 5.000000e-01 : f32
    %60 = vector.broadcast %cst_25 : f32 to vector<8x128xf32>
    %61 = arith.mulf %60, %59 : vector<8x128xf32>
    %cst_26 = arith.constant 0.707106769 : f32
    %62 = vector.broadcast %cst_26 : f32 to vector<8x128xf32>
    %63 = arith.mulf %59, %62 : vector<8x128xf32>
    %64 = math.erf %63 : vector<8x128xf32>
    %cst_27 = arith.constant 1.000000e+00 : f32
    %65 = vector.broadcast %cst_27 : f32 to vector<8x128xf32>
    %66 = arith.addf %65, %64 : vector<8x128xf32>
    %67 = arith.mulf %61, %66 : vector<8x128xf32>
    %68 = vector.extract_strided_slice %48 {offsets = [0, 0], sizes = [8, 128], strides = [1, 1]} : vector<8x256xf32> to vector<8x128xf32>
    %69 = arith.addf %67, %68 : vector<8x128xf32>
    %70 = vector.extract_strided_slice %18 {offsets = [0, 0], sizes = [8, 128], strides = [1, 1]} : vector<8x256xf32> to vector<8x128xf32>
    %71 = arith.addf %69, %70 : vector<8x128xf32>
    %c896 = arith.constant 896 : index
    %c0_28 = arith.constant 0 : index
    %72 = vector.load %arg3[%c896, %c0_28] : memref<1024x256xf32, #tpu.memory_space<vmem>>, vector<128x128xf32>
    %cst_29 = arith.constant dense<0.000000e+00> : vector<8x128xf32>
    %73 = tpu.matmul %71, %72, %cst_29 {dimension_numbers = #tpu.dot_dimension_numbers<[1], [0], [0], [1], [0, 0, 1, 1], [], []>} : vector<8x128xf32>, vector<128x128xf32>, vector<8x128xf32> -> vector<8x128xf32>
    %74 = arith.addf %54, %73 : vector<8x128xf32>
    %75 = vector.extract_strided_slice %0 {offsets = [5, 0], sizes = [1, 128], strides = [1, 1]} : vector<8x256xf32> to vector<1x128xf32>
    %76 = vector.broadcast %75 : vector<1x128xf32> to vector<8x128xf32>
    %77 = arith.addf %74, %76 : vector<8x128xf32>
    %c768_30 = arith.constant 768 : index
    %c128_31 = arith.constant 128 : index
    %78 = vector.load %arg3[%c768_30, %c128_31] : memref<1024x256xf32, #tpu.memory_space<vmem>>, vector<128x128xf32>
    %cst_32 = arith.constant dense<0.000000e+00> : vector<8x128xf32>
    %79 = tpu.matmul %77, %78, %cst_32 {dimension_numbers = #tpu.dot_dimension_numbers<[1], [0], [0], [1], [0, 0, 1, 1], [], []>} : vector<8x128xf32>, vector<128x128xf32>, vector<8x128xf32> -> vector<8x128xf32>
    %80 = vector.extract_strided_slice %0 {offsets = [4, 128], sizes = [1, 128], strides = [1, 1]} : vector<8x256xf32> to vector<1x128xf32>
    %81 = vector.broadcast %80 : vector<1x128xf32> to vector<8x128xf32>
    %82 = arith.addf %79, %81 : vector<8x128xf32>
    %cst_33 = arith.constant 5.000000e-01 : f32
    %83 = vector.broadcast %cst_33 : f32 to vector<8x128xf32>
    %84 = arith.mulf %83, %82 : vector<8x128xf32>
    %cst_34 = arith.constant 0.707106769 : f32
    %85 = vector.broadcast %cst_34 : f32 to vector<8x128xf32>
    %86 = arith.mulf %82, %85 : vector<8x128xf32>
    %87 = math.erf %86 : vector<8x128xf32>
    %cst_35 = arith.constant 1.000000e+00 : f32
    %88 = vector.broadcast %cst_35 : f32 to vector<8x128xf32>
    %89 = arith.addf %88, %87 : vector<8x128xf32>
    %90 = arith.mulf %84, %89 : vector<8x128xf32>
    %91 = vector.extract_strided_slice %48 {offsets = [0, 128], sizes = [8, 128], strides = [1, 1]} : vector<8x256xf32> to vector<8x128xf32>
    %92 = arith.addf %90, %91 : vector<8x128xf32>
    %93 = vector.extract_strided_slice %18 {offsets = [0, 128], sizes = [8, 128], strides = [1, 1]} : vector<8x256xf32> to vector<8x128xf32>
    %94 = arith.addf %92, %93 : vector<8x128xf32>
    %c896_36 = arith.constant 896 : index
    %c128_37 = arith.constant 128 : index
    %95 = vector.load %arg3[%c896_36, %c128_37] : memref<1024x256xf32, #tpu.memory_space<vmem>>, vector<128x128xf32>
    %cst_38 = arith.constant dense<0.000000e+00> : vector<8x128xf32>
    %96 = tpu.matmul %94, %95, %cst_38 {dimension_numbers = #tpu.dot_dimension_numbers<[1], [0], [0], [1], [0, 0, 1, 1], [], []>} : vector<8x128xf32>, vector<128x128xf32>, vector<8x128xf32> -> vector<8x128xf32>
    %97 = arith.addf %77, %96 : vector<8x128xf32>
    %98 = vector.extract_strided_slice %0 {offsets = [5, 128], sizes = [1, 128], strides = [1, 1]} : vector<8x256xf32> to vector<1x128xf32>
    %99 = vector.broadcast %98 : vector<1x128xf32> to vector<8x128xf32>
    %100 = arith.addf %97, %99 : vector<8x128xf32>
    %c640_39 = arith.constant 640 : index
    %c128_40 = arith.constant 128 : index
    %101 = vector.load %arg3[%c640_39, %c128_40] : memref<1024x256xf32, #tpu.memory_space<vmem>>, vector<128x128xf32>
    %cst_41 = arith.constant dense<0.000000e+00> : vector<8x128xf32>
    %102 = tpu.matmul %100, %101, %cst_41 {dimension_numbers = #tpu.dot_dimension_numbers<[1], [0], [0], [1], [0, 0, 1, 1], [], []>} : vector<8x128xf32>, vector<128x128xf32>, vector<8x128xf32> -> vector<8x128xf32>
    %103 = vector.extract_strided_slice %0 {offsets = [3, 128], sizes = [1, 128], strides = [1, 1]} : vector<8x256xf32> to vector<1x128xf32>
    %104 = vector.broadcast %103 : vector<1x128xf32> to vector<8x128xf32>
    %105 = arith.addf %102, %104 : vector<8x128xf32>
    %c0_42 = arith.constant 0 : index
    %c0_43 = arith.constant 0 : index
    %106 = vector.load %arg5[%c0_42, %c0_43] : memref<8x128xf32, #tpu.memory_space<vmem>>, vector<8x128xf32>
    tpu.vector_store %arg5[%c0_42, %c0_43], %105 {strides = array<i32>} : memref<8x128xf32, #tpu.memory_space<vmem>>, vector<8x128xf32>,
    return
  }
}

</mosaic_0001>

<bundles_post_ra>
// kernel: fc_forward.1
= control target key start
LH: loop header
LB: loop body
LE: loop exit
PB: predicated region body
PF: predicated region fallthrough
CT: control target
= control target key end

     0   :  { %10 = vsyncpa [#allocation3], 0  ;;  %s5514_s0 = inlined_call_operand.vmem [shape: f32[8,256], index: 0, kind: input, shape index: {}]   ;;  %s5515_s1 = inlined_call_operand.hbm [shape: f32[8,2048], index: 1, kind: input, shape index: {}]   ;;  %s5516_s2 = inlined_call_operand.hbm [shape: s8[2048,256], index: 2, kind: input, shape index: {}]   ;;  %s5517_s3 = inlined_call_operand.hbm [shape: f32[1024,256], index: 3, kind: input, shape index: {}]   ;;  %s5518_s4 = inlined_call_operand.vmem [shape: f32[8,256], index: 4, kind: input, shape index: {}]   ;;  %s5519_s5 = inlined_call_operand.hbm [shape: f32[8,128], index: 5, kind: output, shape index: {}]  }
   0x1   :  { %11 = vsyncpa [#allocation6], 0  ;;  %s30_s20 = sshll.u32 %s5516_s2, 4  ;;  %s31_s20 = int_to_ptr.hbm [resolvable:$true] %s30_s20 }
   0x2   :  { %12 = vsyncpa [#allocation4], 0  ;;  %s3808_s21 = smov [#allocation5]   ;;  %s20_s25 = sshll.u32 %s5515_s1, 4  ;;  %s21_s25 = int_to_ptr.hbm [resolvable:$true] %s20_s25 }
   0x3   :  { %s32_s22 = sshll.u32 %s3808_s21, 4  ;;  %s3809_s26 = smov 256   ;;  %s33_s22 = int_to_ptr.vmem [resolvable:$true] %s32_s22 }
   0x4   :  { %s3810_s27 = smov 16   ;;  %s3811_s28 = smov [#allocation2]  }
   0x5   :  { %38 = dma.hbm_to_vmem [thread:$0]  %s31_s20, 16384, %s33_s22, [#allocation6], %s3809_s26, %s3809_s26, %s3810_s27  }
   0x6   :  { %s22_s29 = sshll.u32 %s3811_s28, 4  ;;  %s43_s7 = sshll.u32 %s5517_s3, 4  ;;  %s23_s29 = int_to_ptr.vmem [resolvable:$true] %s22_s29  ;;  %s44_s7 = int_to_ptr.hbm [resolvable:$true] %s43_s7 }
   0x7   :  { %25 = dma.hbm_to_vmem [thread:$0]  %s21_s25, 2048, %s23_s29, [#allocation3]  }
   0x8   :  { %s3812_s2 = smov [#allocation7]  }
   0x9   :  { %s45_s8 = sshll.u32 %s3812_s2, 4  ;;  %s46_s8 = int_to_ptr.vmem [resolvable:$true] %s45_s8 }
   0xa   :  { %51 = dma.hbm_to_vmem [thread:$0]  %s44_s7, 32768, %s46_s8, [#allocation6], %s3809_s26, %s3809_s26, %s3810_s27  }
   0xb   :  { %3802 = dma.done.wait [#allocation3], 2048  }
   0xc   :  { %3803 = vsyncadd [#allocation3], 4294965248 }
   0xd   :  { %3804 = dma.done.wait [#allocation6], 49152  }
   0xe   :  { %3805 = vsyncadd [#allocation6], 4294918144  ;;  %v66_v0 = vld [vmem:[%s5518_s4] sm:$0xff]  ;;  %v74_v1 = vld [vmem:[#allocation5 + $0x30] sm:$0xff]  ;;  %s3582_s27 = sshll.u32 %s5519_s5, 4  ;;  %s3583_s27 = int_to_ptr.hbm [resolvable:$true] %s3582_s27 }
   0xf   :  { %v82_v2 = vld [vmem:[#allocation5 + $0x70] sm:$0xff]  ;;  %v224_v3 = vunpack.c.2.s8 %v74_v1  ;;  %v226_v4 = vunpack.c.3.s8 %v74_v1  ;;  %v3856_v5 = vperm.slane %v66_v0, 7  ;;  %v220_v31 = vunpack.c.0.s8 %v74_v1  ;;  %v72_v45 = vld [vmem:[#allocation5 + $0x20] sm:$0xff] }
  0x10   :  { %v256_v6 = vunpack.c.2.s8 %v82_v2  ;;  %v90_v7 = vld [vmem:[#allocation5 + $0xb0] sm:$0xff]  ;;  %v258_v9 = vunpack.c.3.s8 %v82_v2  ;;  %v222_v32 = vunpack.c.1.s8 %v74_v1  ;;  %v252_v35 = vunpack.c.0.s8 %v82_v2  ;;  %v80_v54 = vld [vmem:[#allocation5 + $0x60] sm:$0xff] }
  0x11   :  { %v98_v8 = vld [vmem:[#allocation5 + $0xf0] sm:$0xff]  ;;  %v288_v10 = vunpack.c.2.s8 %v90_v7  ;;  %v290_v11 = vunpack.c.3.s8 %v90_v7  ;;  %v736_v13 = vcvt.s32.f32 %v224_v3  ;;  %v738_v14 = vcvt.s32.f32 %v226_v4  ;;  %v88_v59 = vld [vmem:[#allocation5 + $0xa0] sm:$0xff] }
  0x12   :  { %v320_v12 = vunpack.c.2.s8 %v98_v8  ;;  %v768_v15 = vcvt.s32.f32 %v256_v6  ;;  %v322_v16 = vunpack.c.3.s8 %v98_v8  ;;  %v770_v17 = vcvt.s32.f32 %v258_v9  ;;  %v96_v4 = vld [vmem:[#allocation5 + $0xe0] sm:$0xff] }
  0x13   :  { %v800_v18 = vcvt.s32.f32 %v288_v10  ;;  %v802_v19 = vcvt.s32.f32 %v290_v11  ;;  %v1250_v21 = vmul.f32 %v3856_v5, %v736_v13  ;;  %v1252_v22 = vmul.f32 %v3856_v5, %v738_v14 }
  0x14   :  { %v832_v20 = vcvt.s32.f32 %v320_v12  ;;  %v1282_v23 = vmul.f32 %v3856_v5, %v768_v15  ;;  %v834_v24 = vcvt.s32.f32 %v322_v16  ;;  %v1284_v25 = vmul.f32 %v3856_v5, %v770_v17 }
  0x15   :  { %v1314_v26 = vmul.f32 %v3856_v5, %v800_v18  ;;  %v1316_v27 = vmul.f32 %v3856_v5, %v802_v19  ;;  %v1748_v29 = vpack.c.bf16 %v1252_v22, %v1250_v21  ;;  %v254_v36 = vunpack.c.1.s8 %v82_v2 }
  0x16   :  { %v1346_v28 = vmul.f32 %v3856_v5, %v832_v20  ;;  %v1348_v30 = vmul.f32 %v3856_v5, %v834_v24  ;;  %v1764_v33 = vpack.c.bf16 %v1284_v25, %v1282_v23  ;;  %v732_v38 = vcvt.s32.f32 %v220_v31 }
  0x17   :  { %v1780_v34 = vpack.c.bf16 %v1316_v27, %v1314_v26  ;;  %2344 = vmatpush.bf16.msra.mxu0 %v1748_v29  ;;  %v734_v39 = vcvt.s32.f32 %v222_v32  ;;  %v284_v40 = vunpack.c.0.s8 %v90_v7  ;;  %v764_v41 = vcvt.s32.f32 %v252_v35 }
  0x18   :  { %v1796_v37 = vpack.c.bf16 %v1348_v30, %v1346_v28  ;;  %2357 = vmatpush.bf16.msra.mxu1 %v1764_v33  ;;  %v766_v42 = vcvt.s32.f32 %v254_v36  ;;  %v286_v43 = vunpack.c.1.s8 %v90_v7  ;;  %v316_v44 = vunpack.c.0.s8 %v98_v8 }
  0x19   :  { %2370 = vmatpush.bf16.msra.mxu2 %v1780_v34  ;;  %v1246_v46 = vmul.f32 %v3856_v5, %v732_v38  ;;  %v1248_v47 = vmul.f32 %v3856_v5, %v734_v39  ;;  %v796_v48 = vcvt.s32.f32 %v284_v40  ;;  %v318_v49 = vunpack.c.1.s8 %v98_v8 }
  0x1a   :  { %2383 = vmatpush.bf16.msra.mxu3 %v1796_v37  ;;  %v1278_v50 = vmul.f32 %v3856_v5, %v764_v41  ;;  %v1280_v51 = vmul.f32 %v3856_v5, %v766_v42  ;;  %v798_v52 = vcvt.s32.f32 %v286_v43  ;;  %v828_v53 = vcvt.s32.f32 %v316_v44  ;;  %v70_v42 = vld [vmem:[#allocation5 + $0x10] sm:$0xff] }
  0x1b   :  { %v1746_v55 = vpack.c.bf16 %v1248_v47, %v1246_v46  ;;  %v1310_v56 = vmul.f32 %v3856_v5, %v796_v48  ;;  %v830_v57 = vcvt.s32.f32 %v318_v49  ;;  %v216_v58 = vunpack.c.2.s8 %v72_v45 }
  0x1c   :  { %v1762_v60 = vpack.c.bf16 %v1280_v51, %v1278_v50  ;;  %v1312_v61 = vmul.f32 %v3856_v5, %v798_v52  ;;  %v1342_v62 = vmul.f32 %v3856_v5, %v828_v53  ;;  %v218_v63 = vunpack.c.3.s8 %v72_v45  ;;  %v78_v51 = vld [vmem:[#allocation5 + $0x50] sm:$0xff] }
  0x1d   :  { %2345 = vmatpush.bf16.msra.mxu0 %v1746_v55  ;;  %v1344_v0 = vmul.f32 %v3856_v5, %v830_v57  ;;  %v728_v1 = vcvt.s32.f32 %v216_v58  ;;  %v248_v2 = vunpack.c.2.s8 %v80_v54  ;;  %v250_v3 = vunpack.c.3.s8 %v80_v54 }
  0x1e   :  { %2358 = vmatpush.bf16.msra.mxu1 %v1762_v60  ;;  %v1778_v6 = vpack.c.bf16 %v1312_v61, %v1310_v56  ;;  %v730_v7 = vcvt.s32.f32 %v218_v63  ;;  %v280_v8 = vunpack.c.2.s8 %v88_v59  ;;  %v282_v9 = vunpack.c.3.s8 %v88_v59  ;;  %v86_v56 = vld [vmem:[#allocation5 + $0x90] sm:$0xff] }
  0x1f   :  { %v1794_v10 = vpack.c.bf16 %v1344_v0, %v1342_v62  ;;  %v1242_v11 = vmul.f32 %v3856_v5, %v728_v1  ;;  %v760_v12 = vcvt.s32.f32 %v248_v2  ;;  %v762_v13 = vcvt.s32.f32 %v250_v3  ;;  %v94_v1 = vld [vmem:[#allocation5 + $0xd0] sm:$0xff] }
  0x20   :  { %2371 = vmatpush.bf16.msra.mxu2 %v1778_v6  ;;  %v1244_v14 = vmul.f32 %v3856_v5, %v730_v7  ;;  %v792_v15 = vcvt.s32.f32 %v280_v8  ;;  %v794_v16 = vcvt.s32.f32 %v282_v9  ;;  %v312_v17 = vunpack.c.2.s8 %v96_v4 }
  0x21   :  { %2384 = vmatpush.bf16.msra.mxu3 %v1794_v10  ;;  %v1274_v18 = vmul.f32 %v3856_v5, %v760_v12  ;;  %v1276_v19 = vmul.f32 %v3856_v5, %v762_v13  ;;  %v314_v20 = vunpack.c.3.s8 %v96_v4  ;;  %v212_v21 = vunpack.c.0.s8 %v72_v45 }
  0x22   :  { %v1744_v22 = vpack.c.bf16 %v1244_v14, %v1242_v11  ;;  %v1306_v23 = vmul.f32 %v3856_v5, %v792_v15  ;;  %v1308_v24 = vmul.f32 %v3856_v5, %v794_v16  ;;  %v824_v25 = vcvt.s32.f32 %v312_v17 }
  0x23   :  { %v1760_v26 = vpack.c.bf16 %v1276_v19, %v1274_v18  ;;  %v826_v27 = vcvt.s32.f32 %v314_v20  ;;  %v214_v28 = vunpack.c.1.s8 %v72_v45  ;;  %v724_v29 = vcvt.s32.f32 %v212_v21 }
  0x24   :  { %2346 = vmatpush.bf16.msra.mxu0 %v1744_v22  ;;  %v1776_v30 = vpack.c.bf16 %v1308_v24, %v1306_v23  ;;  %v1338_v31 = vmul.f32 %v3856_v5, %v824_v25  ;;  %v244_v32 = vunpack.c.0.s8 %v80_v54  ;;  %v246_v33 = vunpack.c.1.s8 %v80_v54 }
  0x25   :  { %2359 = vmatpush.bf16.msra.mxu1 %v1760_v26  ;;  %v1340_v34 = vmul.f32 %v3856_v5, %v826_v27  ;;  %v726_v35 = vcvt.s32.f32 %v214_v28  ;;  %v1238_v36 = vmul.f32 %v3856_v5, %v724_v29  ;;  %v276_v37 = vunpack.c.0.s8 %v88_v59 }
  0x26   :  { %2372 = vmatpush.bf16.msra.mxu2 %v1776_v30  ;;  %v756_v38 = vcvt.s32.f32 %v244_v32  ;;  %v758_v39 = vcvt.s32.f32 %v246_v33  ;;  %v278_v40 = vunpack.c.1.s8 %v88_v59  ;;  %v308_v41 = vunpack.c.0.s8 %v96_v4 }
  0x27   :  { %v1792_v43 = vpack.c.bf16 %v1340_v34, %v1338_v31  ;;  %v1240_v44 = vmul.f32 %v3856_v5, %v726_v35  ;;  %v788_v45 = vcvt.s32.f32 %v276_v37  ;;  %v310_v46 = vunpack.c.1.s8 %v96_v4 }
  0x28   :  { %v1270_v47 = vmul.f32 %v3856_v5, %v756_v38  ;;  %v1272_v48 = vmul.f32 %v3856_v5, %v758_v39  ;;  %v790_v49 = vcvt.s32.f32 %v278_v40  ;;  %v820_v50 = vcvt.s32.f32 %v308_v41  ;;  %v68_v39 = vld [vmem:[#allocation5] sm:$0xff] }
  0x29   :  { %2385 = vmatpush.bf16.msra.mxu3 %v1792_v43  ;;  %v1742_v52 = vpack.c.bf16 %v1240_v44, %v1238_v36  ;;  %v1302_v53 = vmul.f32 %v3856_v5, %v788_v45  ;;  %v822_v54 = vcvt.s32.f32 %v310_v46  ;;  %v208_v55 = vunpack.c.2.s8 %v70_v42 }
  0x2a   :  { %v1758_v57 = vpack.c.bf16 %v1272_v48, %v1270_v47  ;;  %v1304_v58 = vmul.f32 %v3856_v5, %v790_v49  ;;  %v1334_v59 = vmul.f32 %v3856_v5, %v820_v50  ;;  %v210_v60 = vunpack.c.3.s8 %v70_v42  ;;  %v76_v48 = vld [vmem:[#allocation5 + $0x40] sm:$0xff] }
  0x2b   :  { %2347 = vmatpush.bf16.msra.mxu0 %v1742_v52  ;;  %v1336_v61 = vmul.f32 %v3856_v5, %v822_v54  ;;  %v720_v62 = vcvt.s32.f32 %v208_v55  ;;  %v240_v63 = vunpack.c.2.s8 %v78_v51  ;;  %v242_v0 = vunpack.c.3.s8 %v78_v51 }
  0x2c   :  { %2360 = vmatpush.bf16.msra.mxu1 %v1758_v57  ;;  %v1774_v2 = vpack.c.bf16 %v1304_v58, %v1302_v53  ;;  %v722_v3 = vcvt.s32.f32 %v210_v60  ;;  %v272_v4 = vunpack.c.2.s8 %v86_v56  ;;  %v274_v6 = vunpack.c.3.s8 %v86_v56  ;;  %v84_v53 = vld [vmem:[#allocation5 + $0x80] sm:$0xff] }
  0x2d   :  { %v1790_v7 = vpack.c.bf16 %v1336_v61, %v1334_v59  ;;  %v1234_v8 = vmul.f32 %v3856_v5, %v720_v62  ;;  %v752_v9 = vcvt.s32.f32 %v240_v63  ;;  %v754_v10 = vcvt.s32.f32 %v242_v0  ;;  %v3906_v62 = vld [vmem:[#allocation5 + $0xc0] sm:$0xff] }
  0x2e   :  { %2373 = vmatpush.bf16.msra.mxu2 %v1774_v2  ;;  %v1236_v11 = vmul.f32 %v3856_v5, %v722_v3  ;;  %v784_v12 = vcvt.s32.f32 %v272_v4  ;;  %v786_v13 = vcvt.s32.f32 %v274_v6  ;;  %v304_v14 = vunpack.c.2.s8 %v94_v1 }
  0x2f   :  { %2386 = vmatpush.bf16.msra.mxu3 %v1790_v7  ;;  %v1266_v15 = vmul.f32 %v3856_v5, %v752_v9  ;;  %v1268_v16 = vmul.f32 %v3856_v5, %v754_v10  ;;  %v306_v17 = vunpack.c.3.s8 %v94_v1  ;;  %v204_v18 = vunpack.c.0.s8 %v70_v42 }
  0x30   :  { %v1740_v19 = vpack.c.bf16 %v1236_v11, %v1234_v8  ;;  %v1298_v20 = vmul.f32 %v3856_v5, %v784_v12  ;;  %v1300_v21 = vmul.f32 %v3856_v5, %v786_v13  ;;  %v816_v22 = vcvt.s32.f32 %v304_v14 }
  0x31   :  { %v1756_v23 = vpack.c.bf16 %v1268_v16, %v1266_v15  ;;  %v818_v24 = vcvt.s32.f32 %v306_v17  ;;  %v206_v25 = vunpack.c.1.s8 %v70_v42  ;;  %v716_v26 = vcvt.s32.f32 %v204_v18 }
  0x32   :  { %2348 = vmatpush.bf16.msra.mxu0 %v1740_v19  ;;  %v1772_v27 = vpack.c.bf16 %v1300_v21, %v1298_v20  ;;  %v1330_v28 = vmul.f32 %v3856_v5, %v816_v22  ;;  %v236_v29 = vunpack.c.0.s8 %v78_v51  ;;  %v238_v30 = vunpack.c.1.s8 %v78_v51 }
  0x33   :  { %2361 = vmatpush.bf16.msra.mxu1 %v1756_v23  ;;  %v1332_v31 = vmul.f32 %v3856_v5, %v818_v24  ;;  %v718_v32 = vcvt.s32.f32 %v206_v25  ;;  %v1230_v33 = vmul.f32 %v3856_v5, %v716_v26  ;;  %v268_v34 = vunpack.c.0.s8 %v86_v56  ;;  %v3916_v24 = vld [vmem:[#allocation5 + $0x130] sm:$0xff] }
  0x34   :  { %2374 = vmatpush.bf16.msra.mxu2 %v1772_v27  ;;  %v748_v35 = vcvt.s32.f32 %v236_v29  ;;  %v750_v36 = vcvt.s32.f32 %v238_v30  ;;  %v270_v37 = vunpack.c.1.s8 %v86_v56  ;;  %v300_v38 = vunpack.c.0.s8 %v94_v1 }
  0x35   :  { %v1788_v40 = vpack.c.bf16 %v1332_v31, %v1330_v28  ;;  %v1232_v41 = vmul.f32 %v3856_v5, %v718_v32  ;;  %v780_v42 = vcvt.s32.f32 %v268_v34  ;;  %v302_v43 = vunpack.c.1.s8 %v94_v1 }
  0x36   :  { %v1262_v44 = vmul.f32 %v3856_v5, %v748_v35  ;;  %v1264_v45 = vmul.f32 %v3856_v5, %v750_v36  ;;  %v782_v46 = vcvt.s32.f32 %v270_v37  ;;  %v812_v47 = vcvt.s32.f32 %v300_v38  ;;  %v3922_v37 = vld [vmem:[#allocation5 + $0x170] sm:$0xff] }
  0x37   :  { %2387 = vmatpush.bf16.msra.mxu3 %v1788_v40  ;;  %v1738_v49 = vpack.c.bf16 %v1232_v41, %v1230_v33  ;;  %v1294_v50 = vmul.f32 %v3856_v5, %v780_v42  ;;  %v814_v51 = vcvt.s32.f32 %v302_v43  ;;  %v200_v52 = vunpack.c.2.s8 %v68_v39 }
  0x38   :  { %v1754_v54 = vpack.c.bf16 %v1264_v45, %v1262_v44  ;;  %v1296_v55 = vmul.f32 %v3856_v5, %v782_v46  ;;  %v1326_v56 = vmul.f32 %v3856_v5, %v812_v47  ;;  %v202_v57 = vunpack.c.3.s8 %v68_v39  ;;  %v3928_v46 = vld [vmem:[#allocation5 + $0x1b0] sm:$0xff] }
  0x39   :  { %2349 = vmatpush.bf16.msra.mxu0 %v1738_v49  ;;  %v1328_v58 = vmul.f32 %v3856_v5, %v814_v51  ;;  %v712_v59 = vcvt.s32.f32 %v200_v52  ;;  %v232_v60 = vunpack.c.2.s8 %v76_v48  ;;  %v234_v61 = vunpack.c.3.s8 %v76_v48 }
  0x3a   :  { %2362 = vmatpush.bf16.msra.mxu1 %v1754_v54  ;;  %v1770_v63 = vpack.c.bf16 %v1296_v55, %v1294_v50  ;;  %v714_v0 = vcvt.s32.f32 %v202_v57  ;;  %v264_v1 = vunpack.c.2.s8 %v84_v53  ;;  %v266_v2 = vunpack.c.3.s8 %v84_v53 }
  0x3b   :  { %v1786_v3 = vpack.c.bf16 %v1328_v58, %v1326_v56  ;;  %v1226_v4 = vmul.f32 %v3856_v5, %v712_v59  ;;  %v744_v6 = vcvt.s32.f32 %v232_v60  ;;  %v746_v7 = vcvt.s32.f32 %v234_v61  ;;  %v130_v59 = vld [vmem:[#allocation5 + $0x1f0] sm:$0xff] }
  0x3c   :  { %2375 = vmatpush.bf16.msra.mxu2 %v1770_v63  ;;  %v1228_v8 = vmul.f32 %v3856_v5, %v714_v0  ;;  %v776_v9 = vcvt.s32.f32 %v264_v1  ;;  %v778_v10 = vcvt.s32.f32 %v266_v2  ;;  %v296_v11 = vunpack.c.2.s8 %v3906_v62 }
  0x3d   :  { %2388 = vmatpush.bf16.msra.mxu3 %v1786_v3  ;;  %v1258_v12 = vmul.f32 %v3856_v5, %v744_v6  ;;  %v1260_v13 = vmul.f32 %v3856_v5, %v746_v7  ;;  %v298_v14 = vunpack.c.3.s8 %v3906_v62  ;;  %v196_v15 = vunpack.c.0.s8 %v68_v39 }
  0x3e   :  { %v1736_v16 = vpack.c.bf16 %v1228_v8, %v1226_v4  ;;  %v1290_v17 = vmul.f32 %v3856_v5, %v776_v9  ;;  %v1292_v18 = vmul.f32 %v3856_v5, %v778_v10  ;;  %v808_v19 = vcvt.s32.f32 %v296_v11 }
  0x3f   :  { %v1752_v20 = vpack.c.bf16 %v1260_v13, %v1258_v12  ;;  %v810_v21 = vcvt.s32.f32 %v298_v14  ;;  %v198_v22 = vunpack.c.1.s8 %v68_v39  ;;  %v708_v23 = vcvt.s32.f32 %v196_v15 }
  0x40   :  { %2350 = vmatpush.bf16.msra.mxu0 %v1736_v16  ;;  %v1768_v25 = vpack.c.bf16 %v1292_v18, %v1290_v17  ;;  %v1322_v26 = vmul.f32 %v3856_v5, %v808_v19  ;;  %v228_v27 = vunpack.c.0.s8 %v76_v48  ;;  %v230_v28 = vunpack.c.1.s8 %v76_v48 }
  0x41   :  { %2363 = vmatpush.bf16.msra.mxu1 %v1752_v20  ;;  %v1324_v29 = vmul.f32 %v3856_v5, %v810_v21  ;;  %v710_v30 = vcvt.s32.f32 %v198_v22  ;;  %v1222_v31 = vmul.f32 %v3856_v5, %v708_v23  ;;  %v260_v32 = vunpack.c.0.s8 %v84_v53 }
  0x42   :  { %2376 = vmatpush.bf16.msra.mxu2 %v1768_v25  ;;  %v740_v33 = vcvt.s32.f32 %v228_v27  ;;  %v742_v34 = vcvt.s32.f32 %v230_v28  ;;  %v262_v35 = vunpack.c.1.s8 %v84_v53  ;;  %v352_v36 = vunpack.c.2.s8 %v3916_v24 }
  0x43   :  { %v1784_v38 = vpack.c.bf16 %v1324_v29, %v1322_v26  ;;  %v1224_v39 = vmul.f32 %v3856_v5, %v710_v30  ;;  %v772_v40 = vcvt.s32.f32 %v260_v32  ;;  %v354_v41 = vunpack.c.3.s8 %v3916_v24 }
  0x44   :  { %v1254_v42 = vmul.f32 %v3856_v5, %v740_v33  ;;  %v1256_v43 = vmul.f32 %v3856_v5, %v742_v34  ;;  %v774_v44 = vcvt.s32.f32 %v262_v35  ;;  %v864_v45 = vcvt.s32.f32 %v352_v36  ;;  %v104_v33 = vld [vmem:[#allocation5 + $0x120] sm:$0xff] }
  0x45   :  { %2389 = vmatpush.bf16.msra.mxu3 %v1784_v38  ;;  %v1734_v47 = vpack.c.bf16 %v1224_v39, %v1222_v31  ;;  %v1286_v48 = vmul.f32 %v3856_v5, %v772_v40  ;;  %v866_v49 = vcvt.s32.f32 %v354_v41  ;;  %v384_v50 = vunpack.c.2.s8 %v3922_v37 }
  0x46   :  { %v1750_v51 = vpack.c.bf16 %v1256_v43, %v1254_v42  ;;  %v1288_v52 = vmul.f32 %v3856_v5, %v774_v44  ;;  %v1378_v53 = vmul.f32 %v3856_v5, %v864_v45  ;;  %v386_v54 = vunpack.c.3.s8 %v3922_v37  ;;  %v112_v42 = vld [vmem:[#allocation5 + $0x160] sm:$0xff] }
  0x47   :  { %2351 = vmatpush.bf16.msra.mxu0 %v1734_v47  ;;  %v1380_v55 = vmul.f32 %v3856_v5, %v866_v49  ;;  %v896_v56 = vcvt.s32.f32 %v384_v50  ;;  %v416_v57 = vunpack.c.2.s8 %v3928_v46  ;;  %v418_v58 = vunpack.c.3.s8 %v3928_v46  ;;  %v120_v47 = vld [vmem:[#allocation5 + $0x1a0] sm:$0xff] }
  0x48   :  { %2364 = vmatpush.bf16.msra.mxu1 %v1750_v51  ;;  %v1766_v60 = vpack.c.bf16 %v1288_v52, %v1286_v48  ;;  %v898_v61 = vcvt.s32.f32 %v386_v54  ;;  %v292_v63 = vunpack.c.0.s8 %v3906_v62  ;;  %v294_v0 = vunpack.c.1.s8 %v3906_v62 }
  0x49   :  { %v1812_v1 = vpack.c.bf16 %v1380_v55, %v1378_v53  ;;  %v1410_v2 = vmul.f32 %v3856_v5, %v896_v56  ;;  %v928_v3 = vcvt.s32.f32 %v416_v57  ;;  %v930_v4 = vcvt.s32.f32 %v418_v58  ;;  %v128_v56 = vld [vmem:[#allocation5 + $0x1e0] sm:$0xff] }
  0x4a   :  { %2377 = vmatpush.bf16.msra.mxu2 %v1766_v60  ;;  %v1412_v6 = vmul.f32 %v3856_v5, %v898_v61  ;;  %v804_v7 = vcvt.s32.f32 %v292_v63  ;;  %v806_v8 = vcvt.s32.f32 %v294_v0  ;;  %v448_v9 = vunpack.c.2.s8 %v130_v59 }
  0x4b   :  { %2396 = vmatpush.bf16.msrb.mxu0 %v1812_v1  ;;  %v1442_v10 = vmul.f32 %v3856_v5, %v928_v3  ;;  %v1444_v11 = vmul.f32 %v3856_v5, %v930_v4  ;;  %v450_v12 = vunpack.c.3.s8 %v130_v59  ;;  %v348_v13 = vunpack.c.0.s8 %v3916_v24 }
  0x4c   :  { %v1828_v62 = vpack.c.bf16 %v1412_v6, %v1410_v2  ;;  %v1318_v14 = vmul.f32 %v3856_v5, %v804_v7  ;;  %v1320_v15 = vmul.f32 %v3856_v5, %v806_v8  ;;  %v960_v16 = vcvt.s32.f32 %v448_v9 }
  0x4d   :  { %v1844_v17 = vpack.c.bf16 %v1444_v11, %v1442_v10  ;;  %v962_v18 = vcvt.s32.f32 %v450_v12  ;;  %v350_v19 = vunpack.c.1.s8 %v3916_v24  ;;  %v860_v20 = vcvt.s32.f32 %v348_v13 }
  0x4e   :  { %2409 = vmatpush.bf16.msrb.mxu1 %v1828_v62  ;;  %v1782_v21 = vpack.c.bf16 %v1320_v15, %v1318_v14  ;;  %v1474_v22 = vmul.f32 %v3856_v5, %v960_v16  ;;  %v380_v23 = vunpack.c.0.s8 %v3922_v37  ;;  %v382_v25 = vunpack.c.1.s8 %v3922_v37 }
  0x4f   :  { %2422 = vmatpush.bf16.msrb.mxu2 %v1844_v17  ;;  %v1476_v26 = vmul.f32 %v3856_v5, %v962_v18  ;;  %v862_v27 = vcvt.s32.f32 %v350_v19  ;;  %v1374_v28 = vmul.f32 %v3856_v5, %v860_v20  ;;  %v412_v29 = vunpack.c.0.s8 %v3928_v46 }
  0x50   :  { %2390 = vmatpush.bf16.msra.mxu3 %v1782_v21  ;;  %v892_v30 = vcvt.s32.f32 %v380_v23  ;;  %v894_v24 = vcvt.s32.f32 %v382_v25  ;;  %v414_v31 = vunpack.c.1.s8 %v3928_v46  ;;  %v444_v32 = vunpack.c.0.s8 %v130_v59 }
  0x51   :  { %v1860_v34 = vpack.c.bf16 %v1476_v26, %v1474_v22  ;;  %v1376_v35 = vmul.f32 %v3856_v5, %v862_v27  ;;  %v924_v36 = vcvt.s32.f32 %v412_v29  ;;  %v446_v37 = vunpack.c.1.s8 %v130_v59 }
  0x52   :  { %v1406_v38 = vmul.f32 %v3856_v5, %v892_v30  ;;  %v1408_v39 = vmul.f32 %v3856_v5, %v894_v24  ;;  %v926_v40 = vcvt.s32.f32 %v414_v31  ;;  %v956_v41 = vcvt.s32.f32 %v444_v32  ;;  %v3971_v24 = vld [vmem:[#allocation5 + $0x110] sm:$0xff] }
  0x53   :  { %v1810_v43 = vpack.c.bf16 %v1376_v35, %v1374_v28  ;;  %v1438_v44 = vmul.f32 %v3856_v5, %v924_v36  ;;  %v958_v45 = vcvt.s32.f32 %v446_v37  ;;  %v344_v46 = vunpack.c.2.s8 %v104_v33 }
  0x54   :  { %2435 = vmatpush.bf16.msrb.mxu3 %v1860_v34  ;;  %v1826_v48 = vpack.c.bf16 %v1408_v39, %v1406_v38  ;;  %v1440_v49 = vmul.f32 %v3856_v5, %v926_v40  ;;  %v1470_v50 = vmul.f32 %v3856_v5, %v956_v41  ;;  %v346_v51 = vunpack.c.3.s8 %v104_v33  ;;  %v3976_v39 = vld [vmem:[#allocation5 + $0x150] sm:$0xff] }
  0x55   :  { %2397 = vmatpush.bf16.msrb.mxu0 %v1810_v43  ;;  %v1472_v52 = vmul.f32 %v3856_v5, %v958_v45  ;;  %v856_v53 = vcvt.s32.f32 %v344_v46  ;;  %v376_v54 = vunpack.c.2.s8 %v112_v42  ;;  %v378_v55 = vunpack.c.3.s8 %v112_v42 }
  0x56   :  { %2410 = vmatpush.bf16.msrb.mxu1 %v1826_v48  ;;  %v1842_v57 = vpack.c.bf16 %v1440_v49, %v1438_v44  ;;  %v858_v58 = vcvt.s32.f32 %v346_v51  ;;  %v408_v59 = vunpack.c.2.s8 %v120_v47  ;;  %v410_v60 = vunpack.c.3.s8 %v120_v47  ;;  %v118_v44 = vld [vmem:[#allocation5 + $0x190] sm:$0xff] }
  0x57   :  { %v1858_v61 = vpack.c.bf16 %v1472_v52, %v1470_v50  ;;  %v1370_v63 = vmul.f32 %v3856_v5, %v856_v53  ;;  %v888_v0 = vcvt.s32.f32 %v376_v54  ;;  %v890_v1 = vcvt.s32.f32 %v378_v55  ;;  %v3986_v53 = vld [vmem:[#allocation5 + $0x1d0] sm:$0xff] }
  0x58   :  { %2423 = vmatpush.bf16.msrb.mxu2 %v1842_v57  ;;  %v1372_v2 = vmul.f32 %v3856_v5, %v858_v58  ;;  %v920_v3 = vcvt.s32.f32 %v408_v59  ;;  %v922_v4 = vcvt.s32.f32 %v410_v60  ;;  %v440_v6 = vunpack.c.2.s8 %v128_v56  ;;  %v3988_v58 = vld [vmem:[#allocation2 + $0x10] sm:$0xff] }
  0x59   :  { %2436 = vmatpush.bf16.msrb.mxu3 %v1858_v61  ;;  %v1402_v7 = vmul.f32 %v3856_v5, %v888_v0  ;;  %v1404_v8 = vmul.f32 %v3856_v5, %v890_v1  ;;  %v442_v9 = vunpack.c.3.s8 %v128_v56  ;;  %v340_v10 = vunpack.c.0.s8 %v104_v33 }
  0x5a   :  { %v1808_v11 = vpack.c.bf16 %v1372_v2, %v1370_v63  ;;  %v1434_v12 = vmul.f32 %v3856_v5, %v920_v3  ;;  %v1436_v13 = vmul.f32 %v3856_v5, %v922_v4  ;;  %v952_v62 = vcvt.s32.f32 %v440_v6 }
  0x5b   :  { %v1824_v14 = vpack.c.bf16 %v1404_v8, %v1402_v7  ;;  %v954_v15 = vcvt.s32.f32 %v442_v9  ;;  %v342_v16 = vunpack.c.1.s8 %v104_v33  ;;  %v852_v17 = vcvt.s32.f32 %v340_v10 }
  0x5c   :  { %2398 = vmatpush.bf16.msrb.mxu0 %v1808_v11  ;;  %v1840_v18 = vpack.c.bf16 %v1436_v13, %v1434_v12  ;;  %v1466_v19 = vmul.f32 %v3856_v5, %v952_v62  ;;  %v372_v20 = vunpack.c.0.s8 %v112_v42  ;;  %v374_v21 = vunpack.c.1.s8 %v112_v42 }
  0x5d   :  { %2411 = vmatpush.bf16.msrb.mxu1 %v1824_v14  ;;  %v1468_v22 = vmul.f32 %v3856_v5, %v954_v15  ;;  %v854_v23 = vcvt.s32.f32 %v342_v16  ;;  %v1366_v25 = vmul.f32 %v3856_v5, %v852_v17  ;;  %v404_v26 = vunpack.c.0.s8 %v120_v47  ;;  %v4000_v15 = vld [vmem:[#allocation2] sm:$0xff] }
  0x5e   :  { %2424 = vmatpush.bf16.msrb.mxu2 %v1840_v18  ;;  %v884_v27 = vcvt.s32.f32 %v372_v20  ;;  %v886_v28 = vcvt.s32.f32 %v374_v21  ;;  %v406_v29 = vunpack.c.1.s8 %v120_v47  ;;  %v436_v30 = vunpack.c.0.s8 %v128_v56 }
  0x5f   :  { %v1856_v31 = vpack.c.bf16 %v1468_v22, %v1466_v19  ;;  %v1368_v32 = vmul.f32 %v3856_v5, %v854_v23  ;;  %v916_v33 = vcvt.s32.f32 %v404_v26  ;;  %v438_v34 = vunpack.c.1.s8 %v128_v56 }
  0x60   :  { %v1398_v35 = vmul.f32 %v3856_v5, %v884_v27  ;;  %v1400_v36 = vmul.f32 %v3856_v5, %v886_v28  ;;  %v918_v37 = vcvt.s32.f32 %v406_v29  ;;  %v948_v38 = vcvt.s32.f32 %v436_v30  ;;  %v4008_v29 = vld [vmem:[#allocation2 + $0x18] sm:$0xff] }
  0x61   :  { %2437 = vmatpush.bf16.msrb.mxu3 %v1856_v31  ;;  %v1806_v40 = vpack.c.bf16 %v1368_v32, %v1366_v25  ;;  %v1430_v41 = vmul.f32 %v3856_v5, %v916_v33  ;;  %v950_v42 = vcvt.s32.f32 %v438_v34  ;;  %v336_v43 = vunpack.c.2.s8 %v3971_v24 }
  0x62   :  { %v1822_v45 = vpack.c.bf16 %v1400_v36, %v1398_v35  ;;  %v1432_v46 = vmul.f32 %v3856_v5, %v918_v37  ;;  %v1462_v47 = vmul.f32 %v3856_v5, %v948_v38  ;;  %v338_v48 = vunpack.c.3.s8 %v3971_v24  ;;  %v4013_v36 = vld [vmem:[#allocation2 + $0x8] sm:$0xff] }
  0x63   :  { %2399 = vmatpush.bf16.msrb.mxu0 %v1806_v40  ;;  %v1464_v49 = vmul.f32 %v3856_v5, %v950_v42  ;;  %v848_v50 = vcvt.s32.f32 %v336_v43  ;;  %v368_v51 = vunpack.c.2.s8 %v3976_v39  ;;  %v370_v52 = vunpack.c.3.s8 %v3976_v39 }
  0x64   :  { %2412 = vmatpush.bf16.msrb.mxu1 %v1822_v45  ;;  %v1838_v54 = vpack.c.bf16 %v1432_v46, %v1430_v41  ;;  %v850_v55 = vcvt.s32.f32 %v338_v48  ;;  %v400_v56 = vunpack.c.2.s8 %v118_v44  ;;  %v402_v57 = vunpack.c.3.s8 %v118_v44 }
  0x65   :  { %v1854_v59 = vpack.c.bf16 %v1464_v49, %v1462_v47  ;;  %v1362_v60 = vmul.f32 %v3856_v5, %v848_v50  ;;  %v880_v61 = vcvt.s32.f32 %v368_v51  ;;  %v882_v63 = vcvt.s32.f32 %v370_v52  ;;  %v4024_v49 = vld [vmem:[#allocation5 + $0x100] sm:$0xff] }
  0x66   :  { %2425 = vmatpush.bf16.msrb.mxu2 %v1838_v54  ;;  %v1364_v0 = vmul.f32 %v3856_v5, %v850_v55  ;;  %v912_v1 = vcvt.s32.f32 %v400_v56  ;;  %v914_v2 = vcvt.s32.f32 %v402_v57  ;;  %v432_v3 = vunpack.c.2.s8 %v3986_v53  ;;  %v4028_v54 = vld [vmem:[#allocation5 + $0x140] sm:$0xff] }
  0x67   :  { %2438 = vmatpush.bf16.msrb.mxu3 %v1854_v59  ;;  %v1394_v4 = vmul.f32 %v3856_v5, %v880_v61  ;;  %v1396_v6 = vmul.f32 %v3856_v5, %v882_v63  ;;  %v434_v7 = vunpack.c.3.s8 %v3986_v53  ;;  %v3595_v8 = vmul.f32 -1.442695, %v3988_v58  ;;  %v4033_v59 = vld [vmem:[#allocation5 + $0x180] sm:$0xff] }
  0x68   :  { %v1804_v9 = vpack.c.bf16 %v1364_v0, %v1362_v60  ;;  %v1426_v10 = vmul.f32 %v3856_v5, %v912_v1  ;;  %v1428_v11 = vmul.f32 %v3856_v5, %v914_v2  ;;  %v944_v12 = vcvt.s32.f32 %v432_v3 }
  0x69   :  { %v1820_v13 = vpack.c.bf16 %v1396_v6, %v1394_v4  ;;  %v946_v62 = vcvt.s32.f32 %v434_v7  ;;  %3621 = vpow2.f32 %v3595_v8  ;;  %v332_v14 = vunpack.c.0.s8 %v3971_v24 }
  0x6a   :  { %2400 = vmatpush.bf16.msrb.mxu0 %v1804_v9  ;;  %v1836_v16 = vpack.c.bf16 %v1428_v11, %v1426_v10  ;;  %v1458_v17 = vmul.f32 %v3856_v5, %v944_v12  ;;  %v334_v18 = vunpack.c.1.s8 %v3971_v24  ;;  %v364_v19 = vunpack.c.0.s8 %v3976_v39 }
  0x6b   :  { %2413 = vmatpush.bf16.msrb.mxu1 %v1820_v13  ;;  %v1460_v20 = vmul.f32 %v3856_v5, %v946_v62  ;;  %v844_v21 = vcvt.s32.f32 %v332_v14  ;;  %v366_v22 = vunpack.c.1.s8 %v3976_v39  ;;  %v396_v23 = vunpack.c.0.s8 %v118_v44 }
  0x6c   :  { %2426 = vmatpush.bf16.msrb.mxu2 %v1836_v16  ;;  %v846_v25 = vcvt.s32.f32 %v334_v18  ;;  %v876_v26 = vcvt.s32.f32 %v364_v19  ;;  %v398_v27 = vunpack.c.1.s8 %v118_v44  ;;  %v3593_v28 = vmul.f32 -1.442695, %v4000_v15 }
  0x6d   :  { %v1852_v30 = vpack.c.bf16 %v1460_v20, %v1458_v17  ;;  %v1358_v24 = vmul.f32 %v3856_v5, %v844_v21  ;;  %v878_v31 = vcvt.s32.f32 %v366_v22  ;;  %v908_v32 = vcvt.s32.f32 %v396_v23 }
  0x6e   :  { %v1360_v33 = vmul.f32 %v3856_v5, %v846_v25  ;;  %v1390_v34 = vmul.f32 %v3856_v5, %v876_v26  ;;  %v910_v35 = vcvt.s32.f32 %v398_v27  ;;  %3623 = vpow2.f32 %v3593_v28 }
  0x6f   :  { %v3622_v37 = vpop.eup %3621  ;;  %2439 = vmatpush.bf16.msrb.mxu3 %v1852_v30  ;;  %v1392_v38 = vmul.f32 %v3856_v5, %v878_v31  ;;  %v1422_v39 = vmul.f32 %v3856_v5, %v908_v32  ;;  %v3596_v40 = vmul.f32 -1.442695, %v4008_v29  ;;  %v428_v41 = vunpack.c.0.s8 %v3986_v53 }
  0x70   :  { %v4019_v42 = vadd.f32 1.0, %v3622_v37  ;;  %v1802_v43 = vpack.c.bf16 %v1360_v33, %v1358_v24  ;;  %v1424_v44 = vmul.f32 %v3856_v5, %v910_v35  ;;  %v430_v45 = vunpack.c.1.s8 %v3986_v53  ;;  %v4070_v33 = vld [vmem:[#allocation5 + $0x1c0] sm:$0xff] }
  0x71   :  { %v1818_v46 = vpack.c.bf16 %v1392_v38, %v1390_v34  ;;  %3625 = vpow2.f32 %v3596_v40  ;;  %v940_v47 = vcvt.s32.f32 %v428_v41  ;;  %v3594_v48 = vmul.f32 -1.442695, %v4013_v36 }
  0x72   :  { %3627 = vrcp.f32 %v4019_v42  ;;  %2401 = vmatpush.bf16.msrb.mxu0 %v1802_v43  ;;  %v2109_v50 = vand.u32 2147483647, %v4019_v42  ;;  %v1834_v51 = vpack.c.bf16 %v1424_v44, %v1422_v39  ;;  %v942_v52 = vcvt.s32.f32 %v430_v45 }
  0x73   :  { %2414 = vmatpush.bf16.msrb.mxu1 %v1818_v46  ;;  %3629 = vpow2.f32 %v3594_v48  ;;  %v1454_v53 = vmul.f32 %v3856_v5, %v940_v47  ;;  %v328_v56 = vunpack.c.2.s8 %v4024_v49  ;;  %v330_v57 = vunpack.c.3.s8 %v4024_v49 }
  0x74   :  { %v3624_v55 = vpop.eup %3623  ;;  %vm2105_vm0 = vweird.f32 %v4019_v42  ;;  %v2111_v60 = vand.u32 2147483648, %v4019_v42  ;;  %2427 = vmatpush.bf16.msrb.mxu2 %v1834_v51  ;;  %v1456_v63 = vmul.f32 %v3856_v5, %v942_v52  ;;  %v360_v2 = vunpack.c.2.s8 %v4028_v54 }
  0x75   :  { %v4037_v61 = vadd.f32 1.0, %v3624_v55  ;;  %v840_v0 = vcvt.s32.f32 %v328_v56  ;;  %v842_v1 = vcvt.s32.f32 %v330_v57  ;;  %v362_v3 = vunpack.c.3.s8 %v4028_v54 }
  0x76   :  { %vm4042_vm1 = vcmp.eq.f32.partialorder %v2109_v50, 8.507059e+37  ;;  %v392_v9 = vunpack.c.2.s8 %v4033_v59  ;;  %v1850_v12 = vpack.c.bf16 %v1456_v63, %v1454_v53  ;;  %v2112_v17 = vor.u32 1.1754944e-38, %v2111_v60 }
  0x77   :  { %v3626_v4 = vpop.eup %3625  ;;  %3631 = vrcp.f32 %v4037_v61  ;;  %v2079_v7 = vand.u32 2147483647, %v4037_v61  ;;  %v2081_v8 = vand.u32 2147483648, %v4037_v61  ;;  %v1354_v13 = vmul.f32 %v3856_v5, %v840_v0 }
  0x78   :  { %v3628_v10 = vpop.eup %3627  ;;  %v4050_v11 = vadd.f32 1.0, %v3626_v4  ;;  %v1356_v62 = vmul.f32 %v3856_v5, %v842_v1  ;;  %vm2075_vm2 = vweird.f32 %v4037_v61  ;;  %v394_v18 = vunpack.c.3.s8 %v4033_v59  ;;  %2440 = vmatpush.bf16.msrb.mxu3 %v1850_v12 }
  0x79   :  { %v3630_v14 = vpop.eup %3629  ;;  %v2101_v16 = vmul.f32 %v3628_v10, %v4019_v42  ;;  %vm2106_vm3 = vweird.f32 %v3628_v10  ;;  %v872_v25 = vcvt.s32.f32 %v360_v2  ;;  %vm4062_vm4 = vcmp.eq.f32.partialorder %v2079_v7, 8.507059e+37 }
  0x7a   :  { %3633 = vrcp.f32 %v4050_v11  ;;  %v2124_v19 = vand.u32 2147483647, %v4050_v11  ;;  %v2126_v20 = vand.u32 2147483648, %v4050_v11  ;;  %v4060_v22 = vadd.f32 1.0, %v3630_v14  ;;  %vm4075_vm6 = vmor %vm2105_vm0, %vm2106_vm3 }
  0x7b   :  { %v2102_v21 = vsub.f32 1.0, %v2101_v16  ;;  %v1800_v23 = vpack.c.bf16 %v1356_v62, %v1354_v13  ;;  %v2082_v27 = vor.u32 1.1754944e-38, %v2081_v8  ;;  %v874_v28 = vcvt.s32.f32 %v362_v3 }
  0x7c   :  { %v904_v30 = vcvt.s32.f32 %v392_v9  ;;  %vm2120_vm5 = vweird.f32 %v4050_v11  ;;  %v4067_v32 = vor.u32 1.1754944e-38, %v2126_v20  ;;  %3635 = vrcp.f32 %v4060_v22 }
  0x7d   :  { %v3632_v24 = vpop.eup %3631  ;;  %v2103_v31 = vmul.f32 %v3628_v10, %v2102_v21  ;;  %2402 = vmatpush.bf16.msrb.mxu0 %v1800_v23  ;;  %vm2090_vm7 = vweird.f32 %v4060_v22  ;;  %v2094_v37 = vand.u32 2147483647, %v4060_v22  ;;  %v2096_v38 = vand.u32 2147483648, %v4060_v22 }
  0x7e   :  { %v2071_v35 = vmul.f32 %v3632_v24, %v4037_v61  ;;  %v1386_v39 = vmul.f32 %v3856_v5, %v872_v25  ;;  %vm2076_vm8 = vweird.f32 %v3632_v24  ;;  %vm4084_vm9 = vcmp.eq.f32.partialorder %v2124_v19, 8.507059e+37 }
  0x7f   :  { %v2104_v40 = vadd.f32 %v3628_v10, %v2103_v31  ;;  %v1388_v42 = vmul.f32 %v3856_v5, %v874_v28  ;;  %v906_v43 = vcvt.s32.f32 %v394_v18  ;;  %v4089_v46 = vor.u32 1.1754944e-38, %v2096_v38  ;;  %vm4108_vm12 = vmor %vm2075_vm2, %vm2076_vm8 }
  0x80   :  { %v3634_v44 = vpop.eup %3633  ;;  %v2072_v45 = vsub.f32 1.0, %v2071_v35  ;;  %v1418_v47 = vmul.f32 %v3856_v5, %v904_v30  ;;  %v424_v48 = vunpack.c.2.s8 %v4070_v33  ;;  %vm4098_vm11 = vcmp.eq.f32.partialorder %v2094_v37, 8.507059e+37 }
  0x81   :  { %v2108_v50 = vsel %vm4075_vm6, %v3628_v10, %v2104_v40  ;;  %v2116_v51 = vmul.f32 %v3634_v44, %v4050_v11  ;;  %vm2121_vm10 = vweird.f32 %v3634_v44  ;;  %v1816_v52 = vpack.c.bf16 %v1388_v42, %v1386_v39  ;;  %v4160_v42 = vld [vmem:[#allocation5 + $0x270] sm:$0xff] }
  0x82   :  { %v2113_v55 = vsel %vm4042_vm1, %v2112_v17, %v2108_v50  ;;  %v2073_v53 = vmul.f32 %v3632_v24, %v2072_v45  ;;  %v1420_v57 = vmul.f32 %v3856_v5, %v906_v43  ;;  %v426_v60 = vunpack.c.3.s8 %v4070_v33  ;;  %v3636_v63 = vpop.eup %3635  ;;  %vm4122_vm14 = vmor %vm2120_vm5, %vm2121_vm10 }
  0x83   :  { %v2312_v0 = vmul.f32 %v2113_v55, %v3988_v58  ;;  %v2117_v2 = vsub.f32 1.0, %v2116_v51  ;;  %2415 = vmatpush.bf16.msrb.mxu1 %v1816_v52  ;;  %v936_v3 = vcvt.s32.f32 %v424_v48  ;;  %v324_v4 = vunpack.c.0.s8 %v4024_v49  ;;  %v4170_v51 = vld [vmem:[#allocation5 + $0x2b0] sm:$0xff] }
  0x84   :  { %v2074_v6 = vadd.f32 %v3632_v24, %v2073_v53  ;;  %v2086_v7 = vmul.f32 %v3636_v63, %v4060_v22  ;;  %vm2091_vm13 = vweird.f32 %v3636_v63  ;;  %v1832_v8 = vpack.c.bf16 %v1420_v57, %v1418_v47 }
  0x85   :  { %v4114_v9 = vpack.c.bf16 %v2312_v0, %v2312_v0  ;;  %v2118_v58 = vmul.f32 %v3634_v44, %v2117_v2  ;;  %v938_v10 = vcvt.s32.f32 %v426_v60  ;;  %v1450_v61 = vmul.f32 %v3856_v5, %v936_v3  ;;  %vm4139_vm15 = vmor %vm2090_vm7, %vm2091_vm13  ;;  %v4182_v3 = vld [vmem:[#allocation5 + $0x2f0] sm:$0xff] }
  0x86   :  { %v2078_v12 = vsel %vm4108_vm12, %v3632_v24, %v2074_v6  ;;  %v2087_v62 = vsub.f32 1.0, %v2086_v7  ;;  %2428 = vmatpush.bf16.msrb.mxu2 %v1832_v8  ;;  %v326_v14 = vunpack.c.1.s8 %v4024_v49  ;;  %v836_v16 = vcvt.s32.f32 %v324_v4  ;;  %v4144_v24 = vld [vmem:[#allocation5 + $0x230] sm:$0xff] }
  0x87   :  { %2378 = vmatmul.bf16.vlgmr.msra.gmra.mxu2 %v4114_v9  ;;  %v2083_v17 = vsel %vm4062_vm4, %v2082_v27, %v2078_v12  ;;  %v2119_v18 = vadd.f32 %v3634_v44, %v2118_v58  ;;  %v1452_v19 = vmul.f32 %v3856_v5, %v938_v10  ;;  %v356_v20 = vunpack.c.0.s8 %v4028_v54 }
  0x88   :  { %v2310_v11 = vmul.f32 %v2083_v17, %v4000_v15  ;;  %v2088_v21 = vmul.f32 %v3636_v63, %v2087_v62  ;;  %v838_v23 = vcvt.s32.f32 %v326_v14  ;;  %v1350_v25 = vmul.f32 %v3856_v5, %v836_v16 }
  0x89   :  { %v2123_v49 = vsel %vm4122_vm14, %v3634_v44, %v2119_v18  ;;  %v1848_v27 = vpack.c.bf16 %v1452_v19, %v1450_v61  ;;  %v358_v28 = vunpack.c.1.s8 %v4028_v54  ;;  %v868_v30 = vcvt.s32.f32 %v356_v20 }
  0x8a   :  { %v4146_v15 = vpack.c.bf16 %v2310_v11, %v2310_v11  ;;  %v2128_v31 = vsel %vm4084_vm9, %v4067_v32, %v2123_v49  ;;  %v2089_v34 = vadd.f32 %v3636_v63, %v2088_v21  ;;  %v1352_v35 = vmul.f32 %v3856_v5, %v838_v23 }
  0x8b   :  { %v2313_v22 = vmul.f32 %v2128_v31, %v4008_v29  ;;  %2441 = vmatpush.bf16.msrb.mxu3 %v1848_v27  ;;  %v870_v37 = vcvt.s32.f32 %v358_v28  ;;  %v1382_v38 = vmul.f32 %v3856_v5, %v868_v30  ;;  %v388_v54 = vunpack.c.0.s8 %v4033_v59  ;;  %v4199_v28 = vld [vmem:[#allocation2 + $0x30] sm:$0xff] }
  0x8c   :  { %2352 = vmatmul.bf16.vlgmr.msra.gmra.mxu0 %v4146_v15  ;;  %v2093_v39 = vsel %vm4139_vm15, %v3636_v63, %v2089_v34  ;;  %v1798_v40 = vpack.c.bf16 %v1352_v35, %v1350_v25  ;;  %v390_v41 = vunpack.c.1.s8 %v4033_v59  ;;  %v480_v32 = vunpack.c.2.s8 %v4144_v24 }
  0x8d   :  { %v4162_v43 = vpack.c.bf16 %v2313_v22, %v2313_v22  ;;  %v2098_v29 = vsel %vm4098_vm11, %v4089_v46, %v2093_v39  ;;  %v1384_v44 = vmul.f32 %v3856_v5, %v870_v37  ;;  %v900_v45 = vcvt.s32.f32 %v388_v54 }
  0x8e   :  { %v2311_v47 = vmul.f32 %v2098_v29, %v4013_v36  ;;  %2403 = vmatpush.bf16.msrb.mxu0 %v1798_v40  ;;  %v902_v48 = vcvt.s32.f32 %v390_v41  ;;  %v482_v50 = vunpack.c.3.s8 %v4144_v24  ;;  %v992_v59 = vcvt.s32.f32 %v480_v32  ;;  %v4208_v32 = vld [vmem:[#allocation2 + $0x20] sm:$0xff] }
  0x8f   :  { %2391 = vmatmul.bf16.vlgmr.msra.gmra.mxu3 %v4162_v43  ;;  %v1814_v52 = vpack.c.bf16 %v1384_v44, %v1382_v38  ;;  %v1414_v55 = vmul.f32 %v3856_v5, %v900_v45  ;;  %v512_v53 = vunpack.c.2.s8 %v4160_v42  ;;  %v514_v46 = vunpack.c.3.s8 %v4160_v42 }
  0x90   :  { %v4176_v56 = vpack.c.bf16 %v2311_v47, %v2311_v47  ;;  %v1416_v36 = vmul.f32 %v3856_v5, %v902_v48  ;;  %v994_v57 = vcvt.s32.f32 %v482_v50  ;;  %v1506_v60 = vmul.f32 %v3856_v5, %v992_v59  ;;  %v4212_v47 = vld [vmem:[#allocation2 + $0x38] sm:$0xff] }
  0x91   :  { %2416 = vmatpush.bf16.msrb.mxu1 %v1814_v52  ;;  %v1024_v63 = vcvt.s32.f32 %v512_v53  ;;  %v1026_v0 = vcvt.s32.f32 %v514_v46  ;;  %v544_v1 = vunpack.c.2.s8 %v4170_v51  ;;  %v546_v2 = vunpack.c.3.s8 %v4170_v51  ;;  %v4216_v52 = vld [vmem:[#allocation5 + $0x220] sm:$0xff] }
  0x92   :  { %2365 = vmatmul.bf16.vlgmr.msra.gmra.mxu1 %v4176_v56  ;;  %v1830_v4 = vpack.c.bf16 %v1416_v36, %v1414_v55  ;;  %v1508_v6 = vmul.f32 %v3856_v5, %v994_v57  ;;  %v420_v7 = vunpack.c.0.s8 %v4070_v33  ;;  %v422_v8 = vunpack.c.1.s8 %v4070_v33  ;;  %v4221_v36 = vld [vmem:[#allocation5 + $0x260] sm:$0xff] }
  0x93   :  { %v1538_v58 = vmul.f32 %v3856_v5, %v1024_v63  ;;  %v1540_v10 = vmul.f32 %v3856_v5, %v1026_v0  ;;  %v1056_v61 = vcvt.s32.f32 %v544_v1  ;;  %v1058_v12 = vcvt.s32.f32 %v546_v2 }
  0x94   :  { %2429 = vmatpush.bf16.msrb.mxu2 %v1830_v4  ;;  %v1876_v13 = vpack.c.bf16 %v1508_v6, %v1506_v60  ;;  %v932_v62 = vcvt.s32.f32 %v420_v7  ;;  %v934_v14 = vcvt.s32.f32 %v422_v8  ;;  %v576_v16 = vunpack.c.2.s8 %v4182_v3  ;;  %v4227_v6 = vld [vmem:[#allocation5 + $0x2a0] sm:$0xff] }
  0x95   :  { %v1892_v17 = vpack.c.bf16 %v1540_v10, %v1538_v58  ;;  %v1570_v18 = vmul.f32 %v3856_v5, %v1056_v61  ;;  %v1572_v19 = vmul.f32 %v3856_v5, %v1058_v12  ;;  %v578_v20 = vunpack.c.3.s8 %v4182_v3 }
  0x96   :  { %2448 = vmatpush.bf16.msra.mxu0 %v1876_v13  ;;  %v1446_v33 = vmul.f32 %v3856_v5, %v932_v62  ;;  %v1448_v11 = vmul.f32 %v3856_v5, %v934_v14  ;;  %v1088_v21 = vcvt.s32.f32 %v576_v16  ;;  %v476_v23 = vunpack.c.0.s8 %v4144_v24 }
  0x97   :  { %2461 = vmatpush.bf16.msra.mxu1 %v1892_v17  ;;  %v1908_v25 = vpack.c.bf16 %v1572_v19, %v1570_v18  ;;  %v1090_v49 = vcvt.s32.f32 %v578_v20  ;;  %v478_v26 = vunpack.c.1.s8 %v4144_v24  ;;  %v508_v27 = vunpack.c.0.s8 %v4160_v42 }
  0x98   :  { %v1846_v30 = vpack.c.bf16 %v1448_v11, %v1446_v33  ;;  %v1602_v31 = vmul.f32 %v3856_v5, %v1088_v21  ;;  %v988_v34 = vcvt.s32.f32 %v476_v23  ;;  %v510_v35 = vunpack.c.1.s8 %v4160_v42  ;;  %v4239_v23 = vld [vmem:[#allocation2 + $0x28] sm:$0xff] }
  0x99   :  { %2474 = vmatpush.bf16.msra.mxu2 %v1908_v25  ;;  %v1604_v22 = vmul.f32 %v3856_v5, %v1090_v49  ;;  %v990_v37 = vcvt.s32.f32 %v478_v26  ;;  %v1020_v38 = vcvt.s32.f32 %v508_v27  ;;  %v540_v54 = vunpack.c.0.s8 %v4170_v51 }
  0x9a   :  { %2442 = vmatpush.bf16.msrb.mxu3 %v1846_v30  ;;  %v1502_v24 = vmul.f32 %v3856_v5, %v988_v34  ;;  %v1022_v39 = vcvt.s32.f32 %v510_v35  ;;  %v542_v40 = vunpack.c.1.s8 %v4170_v51  ;;  %v3599_v41 = vmul.f32 -1.442695, %v4199_v28 }
  0x9b   :  { %v1924_v29 = vpack.c.bf16 %v1604_v22, %v1602_v31  ;;  %v1504_v42 = vmul.f32 %v3856_v5, %v990_v37  ;;  %v1534_v44 = vmul.f32 %v3856_v5, %v1020_v38  ;;  %v1052_v45 = vcvt.s32.f32 %v540_v54 }
  0x9c   :  { %v1536_v48 = vmul.f32 %v3856_v5, %v1022_v39  ;;  %v1054_v50 = vcvt.s32.f32 %v542_v40  ;;  %3637 = vpow2.f32 %v3599_v41  ;;  %v572_v59 = vunpack.c.0.s8 %v4182_v3  ;;  %v4256_v39 = vld [vmem:[#allocation5 + $0x2e0] sm:$0xff] }
  0x9d   :  { %v1874_v51 = vpack.c.bf16 %v1504_v42, %v1502_v24  ;;  %v1566_v55 = vmul.f32 %v3856_v5, %v1052_v45  ;;  %v574_v53 = vunpack.c.1.s8 %v4182_v3  ;;  %v3597_v46 = vmul.f32 -1.442695, %v4208_v32 }
  0x9e   :  { %2487 = vmatpush.bf16.msra.mxu3 %v1924_v29  ;;  %v1890_v57 = vpack.c.bf16 %v1536_v48, %v1534_v44  ;;  %v1568_v60 = vmul.f32 %v3856_v5, %v1054_v50  ;;  %v1084_v63 = vcvt.s32.f32 %v572_v59  ;;  %v3600_v0 = vmul.f32 -1.442695, %v4212_v47 }
  0x9f   :  { %2449 = vmatpush.bf16.msra.mxu0 %v1874_v51  ;;  %v1086_v1 = vcvt.s32.f32 %v574_v53  ;;  %3639 = vpow2.f32 %v3597_v46  ;;  %v472_v2 = vunpack.c.2.s8 %v4216_v52  ;;  %v474_v4 = vunpack.c.3.s8 %v4216_v52 }
  0xa0   :  { %2462 = vmatpush.bf16.msra.mxu1 %v1890_v57  ;;  %v1906_v3 = vpack.c.bf16 %v1568_v60, %v1566_v55  ;;  %v1598_v7 = vmul.f32 %v3856_v5, %v1084_v63  ;;  %3641 = vpow2.f32 %v3600_v0  ;;  %v504_v8 = vunpack.c.2.s8 %v4221_v36 }
  0xa1   :  { %v1600_v58 = vmul.f32 %v3856_v5, %v1086_v1  ;;  %v984_v10 = vcvt.s32.f32 %v472_v2  ;;  %v986_v61 = vcvt.s32.f32 %v474_v4  ;;  %v506_v12 = vunpack.c.3.s8 %v4221_v36 }
  0xa2   :  { %v3638_v13 = vpop.eup %3637  ;;  %2475 = vmatpush.bf16.msra.mxu2 %v1906_v3  ;;  %v1016_v62 = vcvt.s32.f32 %v504_v8  ;;  %v536_v14 = vunpack.c.2.s8 %v4227_v6  ;;  %v538_v16 = vunpack.c.3.s8 %v4227_v6  ;;  %v3598_v54 = vmul.f32 -1.442695, %v4239_v23 }
  0xa3   :  { %v4235_v17 = vadd.f32 1.0, %v3638_v13  ;;  %v1922_v18 = vpack.c.bf16 %v1600_v58, %v1598_v7  ;;  %v1498_v19 = vmul.f32 %v3856_v5, %v984_v10  ;;  %v1500_v20 = vmul.f32 %v3856_v5, %v986_v61 }
  0xa4   :  { %v1018_v33 = vcvt.s32.f32 %v506_v12  ;;  %v1048_v11 = vcvt.s32.f32 %v536_v14  ;;  %v1050_v21 = vcvt.s32.f32 %v538_v16  ;;  %v1530_v27 = vmul.f32 %v3856_v5, %v1016_v62 }
  0xa5   :  { %v3640_v25 = vpop.eup %3639  ;;  %3643 = vrcp.f32 %v4235_v17  ;;  %v2169_v49 = vand.u32 2147483647, %v4235_v17  ;;  %v2171_v26 = vand.u32 2147483648, %v4235_v17  ;;  %2488 = vmatpush.bf16.msra.mxu3 %v1922_v18  ;;  %v1872_v34 = vpack.c.bf16 %v1500_v20, %v1498_v19 }
  0xa6   :  { %v3642_v30 = vpop.eup %3641  ;;  %v4245_v31 = vadd.f32 1.0, %v3640_v25  ;;  %v1532_v35 = vmul.f32 %v3856_v5, %v1018_v33  ;;  %v1562_v22 = vmul.f32 %v3856_v5, %v1048_v11  ;;  %v1564_v38 = vmul.f32 %v3856_v5, %v1050_v21 }
  0xa7   :  { %v4249_v37 = vadd.f32 1.0, %v3642_v30  ;;  %vm2165_vm0 = vweird.f32 %v4235_v17  ;;  %2450 = vmatpush.bf16.msra.mxu0 %v1872_v34  ;;  %v2172_v40 = vor.u32 1.1754944e-38, %v2171_v26  ;;  %vm4261_vm1 = vcmp.eq.f32.partialorder %v2169_v49, 8.507059e+37 }
  0xa8   :  { %3645 = vrcp.f32 %v4245_v31  ;;  %v2141_v24 = vand.u32 2147483648, %v4245_v31  ;;  %v2139_v41 = vand.u32 2147483647, %v4245_v31  ;;  %vm2135_vm2 = vweird.f32 %v4245_v31 }
  0xa9   :  { %3647 = vrcp.f32 %v4249_v37  ;;  %v2186_v29 = vand.u32 2147483648, %v4249_v37  ;;  %v2184_v44 = vand.u32 2147483647, %v4249_v37  ;;  %v1888_v45 = vpack.c.bf16 %v1532_v35, %v1530_v27 }
  0xaa   :  { %v1904_v48 = vpack.c.bf16 %v1564_v38, %v1562_v22  ;;  %v4267_v59 = vor.u32 1.1754944e-38, %v2141_v24  ;;  %vm2180_vm3 = vweird.f32 %v4249_v37  ;;  %3649 = vpow2.f32 %v3598_v54 }
  0xab   :  { %v3644_v50 = vpop.eup %3643  ;;  %v568_v51 = vunpack.c.2.s8 %v4256_v39  ;;  %v4272_v53 = vor.u32 1.1754944e-38, %v2186_v29  ;;  %2463 = vmatpush.bf16.msra.mxu1 %v1888_v45  ;;  %v570_v46 = vunpack.c.3.s8 %v4256_v39  ;;  %v468_v57 = vunpack.c.0.s8 %v4216_v52 }
  0xac   :  { %v2161_v55 = vmul.f32 %v3644_v50, %v4235_v17  ;;  %2476 = vmatpush.bf16.msra.mxu2 %v1904_v48  ;;  %vm2166_vm4 = vweird.f32 %v3644_v50  ;;  %vm4276_vm5 = vcmp.eq.f32.partialorder %v2139_v41, 8.507059e+37  ;;  %v470_v0 = vunpack.c.1.s8 %v4216_v52 }
  0xad   :  { %v1080_v63 = vcvt.s32.f32 %v568_v51  ;;  %v500_v1 = vunpack.c.0.s8 %v4221_v36  ;;  %vm4282_vm6 = vcmp.eq.f32.partialorder %v2184_v44, 8.507059e+37  ;;  %v1082_v7 = vcvt.s32.f32 %v570_v46  ;;  %vm4294_vm9 = vmor %vm2165_vm0, %vm2166_vm4  ;;  %v4333_v51 = vld [vmem:[#allocation5 + $0x210] sm:$0xff] }
  0xae   :  { %v3646_v2 = vpop.eup %3645  ;;  %v2162_v4 = vsub.f32 1.0, %v2161_v55  ;;  %v980_v8 = vcvt.s32.f32 %v468_v57  ;;  %v502_v58 = vunpack.c.1.s8 %v4221_v36  ;;  %v982_v13 = vcvt.s32.f32 %v470_v0 }
  0xaf   :  { %v3648_v10 = vpop.eup %3647  ;;  %v2131_v61 = vmul.f32 %v3646_v2, %v4245_v31  ;;  %vm2136_vm7 = vweird.f32 %v3646_v2  ;;  %v1594_v12 = vmul.f32 %v3856_v5, %v1080_v63  ;;  %v1596_v14 = vmul.f32 %v3856_v5, %v1082_v7 }
  0xb0   :  { %v2163_v52 = vmul.f32 %v3644_v50, %v2162_v4  ;;  %v2176_v62 = vmul.f32 %v3648_v10, %v4249_v37  ;;  %vm2181_vm8 = vweird.f32 %v3648_v10  ;;  %v3650_v16 = vpop.eup %3649  ;;  %v1494_v19 = vmul.f32 %v3856_v5, %v980_v8  ;;  %vm4308_vm10 = vmor %vm2135_vm2, %vm2136_vm7 }
  0xb1   :  { %v2132_v36 = vsub.f32 1.0, %v2131_v61  ;;  %v1496_v20 = vmul.f32 %v3856_v5, %v982_v13  ;;  %v1012_v33 = vcvt.s32.f32 %v500_v1  ;;  %v4300_v25 = vadd.f32 1.0, %v3650_v16  ;;  %vm4319_vm11 = vmor %vm2180_vm3, %vm2181_vm8  ;;  %v4365_v13 = vld [vmem:[#allocation5 + $0x290] sm:$0xff] }
  0xb2   :  { %v2164_v11 = vadd.f32 %v3644_v50, %v2163_v52  ;;  %v2177_v21 = vsub.f32 1.0, %v2176_v62  ;;  %v1920_v49 = vpack.c.bf16 %v1596_v14, %v1594_v12  ;;  %v1014_v30 = vcvt.s32.f32 %v502_v58 }
  0xb3   :  { %v2133_v26 = vmul.f32 %v3646_v2, %v2132_v36  ;;  %v1870_v27 = vpack.c.bf16 %v1496_v20, %v1494_v19  ;;  %v532_v17 = vunpack.c.0.s8 %v4227_v6  ;;  %3651 = vrcp.f32 %v4300_v25  ;;  %v158_v20 = vld [vmem:[#allocation5 + $0x2d0] sm:$0xff] }
  0xb4   :  { %v2168_v34 = vsel %vm4294_vm9, %v3644_v50, %v2164_v11  ;;  %v2178_v22 = vmul.f32 %v3648_v10, %v2177_v21  ;;  %2489 = vmatpush.bf16.msra.mxu3 %v1920_v49  ;;  %v1526_v38 = vmul.f32 %v3856_v5, %v1012_v33  ;;  %v2154_v31 = vand.u32 2147483647, %v4300_v25 }
  0xb5   :  { %v2173_v54 = vsel %vm4261_vm1, %v2172_v40, %v2168_v34  ;;  %v2134_v24 = vadd.f32 %v3646_v2, %v2133_v26  ;;  %v2156_v29 = vand.u32 2147483648, %v4300_v25  ;;  %2451 = vmatpush.bf16.msra.mxu0 %v1870_v27  ;;  %v1528_v48 = vmul.f32 %v3856_v5, %v1014_v30 }
  0xb6   :  { %v2316_v44 = vmul.f32 %v2173_v54, %v4199_v28  ;;  %v2179_v45 = vadd.f32 %v3648_v10, %v2178_v22  ;;  %v534_v40 = vunpack.c.1.s8 %v4227_v6  ;;  %vm2150_vm12 = vweird.f32 %v4300_v25 }
  0xb7   :  { %v2138_v42 = vsel %vm4308_vm10, %v3646_v2, %v2134_v24  ;;  %v4331_v37 = vor.u32 1.1754944e-38, %v2156_v29  ;;  %v1044_v50 = vcvt.s32.f32 %v532_v17  ;;  %v1886_v6 = vpack.c.bf16 %v1528_v48, %v1526_v38 }
  0xb8   :  { %v4335_v55 = vpack.c.bf16 %v2316_v44, %v2316_v44  ;;  %v2143_v28 = vsel %vm4276_vm5, %v4267_v59, %v2138_v42  ;;  %v2183_v46 = vsel %vm4319_vm11, %v3648_v10, %v2179_v45  ;;  %vm4346_vm13 = vcmp.eq.f32.partialorder %v2154_v31, 8.507059e+37 }
  0xb9   :  { %v2314_v57 = vmul.f32 %v2143_v28, %v4208_v32  ;;  %v2188_v63 = vsel %vm4282_vm6, %v4272_v53, %v2183_v46  ;;  %v1046_v1 = vcvt.s32.f32 %v534_v40  ;;  %v1558_v2 = vmul.f32 %v3856_v5, %v1044_v50  ;;  %v3652_v4 = vpop.eup %3651  ;;  %2464 = vmatpush.bf16.msra.mxu1 %v1886_v6  ;;  %v4356_v53 = vld [vmem:[#allocation5 + $0x250] sm:$0xff] }
  0xba   :  { %2430 = vmatmul.bf16.vlgmr.msrb.gmra.mxu2 %v4335_v55  ;;  %v2317_v59 = vmul.f32 %v2188_v63, %v4212_v47  ;;  %v564_v60 = vunpack.c.0.s8 %v4256_v39  ;;  %v566_v32 = vunpack.c.1.s8 %v4256_v39  ;;  %v464_v3 = vunpack.c.2.s8 %v4333_v51 }
  0xbb   :  { %v4358_v7 = vpack.c.bf16 %v2314_v57, %v2314_v57  ;;  %v2146_v8 = vmul.f32 %v3652_v4, %v4300_v25  ;;  %vm2151_vm14 = vweird.f32 %v3652_v4  ;;  %v1560_v58 = vmul.f32 %v3856_v5, %v1046_v1 }
  0xbc   :  { %v4362_v10 = vpack.c.bf16 %v2317_v59, %v2317_v59  ;;  %v1076_v61 = vcvt.s32.f32 %v564_v60  ;;  %v1078_v47 = vcvt.s32.f32 %v566_v32  ;;  %v466_v12 = vunpack.c.3.s8 %v4333_v51  ;;  %vm4378_vm15 = vmor %vm2150_vm12, %vm2151_vm14  ;;  %v4404_v32 = vld [vmem:[#allocation5 + $0x200] sm:$0xff] }
  0xbd   :  { %2404 = vmatmul.bf16.vlgmr.msrb.gmra.mxu0 %v4358_v7  ;;  %v2147_v39 = vsub.f32 1.0, %v2146_v8  ;;  %v1902_v52 = vpack.c.bf16 %v1560_v58, %v1558_v2  ;;  %v976_v62 = vcvt.s32.f32 %v464_v3  ;;  %v496_v14 = vunpack.c.2.s8 %v4356_v53 }
  0xbe   :  { %2443 = vmatmul.bf16.vlgmr.msrb.gmra.mxu3 %v4362_v10  ;;  %v1590_v16 = vmul.f32 %v3856_v5, %v1076_v61  ;;  %v1592_v18 = vmul.f32 %v3856_v5, %v1078_v47  ;;  %v978_v36 = vcvt.s32.f32 %v466_v12  ;;  %v498_v19 = vunpack.c.3.s8 %v4356_v53 }
  0xbf   :  { %v2148_v33 = vmul.f32 %v3652_v4, %v2147_v39  ;;  %2477 = vmatpush.bf16.msra.mxu2 %v1902_v52  ;;  %v1490_v11 = vmul.f32 %v3856_v5, %v976_v62  ;;  %v1008_v21 = vcvt.s32.f32 %v496_v14  ;;  %v528_v49 = vunpack.c.2.s8 %v4365_v13 }
  0xc0   :  { %v1918_v27 = vpack.c.bf16 %v1592_v18, %v1590_v16  ;;  %v1492_v30 = vmul.f32 %v3856_v5, %v978_v36  ;;  %v1010_v17 = vcvt.s32.f32 %v498_v19  ;;  %v530_v34 = vunpack.c.3.s8 %v4365_v13  ;;  %v140_v16 = vld [vmem:[#allocation5 + $0x240] sm:$0xff] }
  0xc1   :  { %v2149_v35 = vadd.f32 %v3652_v4, %v2148_v33  ;;  %v1522_v22 = vmul.f32 %v3856_v5, %v1008_v21  ;;  %v1040_v38 = vcvt.s32.f32 %v528_v49  ;;  %v560_v54 = vunpack.c.2.s8 %v158_v20  ;;  %v148_v33 = vld [vmem:[#allocation5 + $0x280] sm:$0xff] }
  0xc2   :  { %2490 = vmatpush.bf16.msra.mxu3 %v1918_v27  ;;  %v1868_v24 = vpack.c.bf16 %v1492_v30, %v1490_v11  ;;  %v1524_v41 = vmul.f32 %v3856_v5, %v1010_v17  ;;  %v1042_v25 = vcvt.s32.f32 %v530_v34  ;;  %v562_v31 = vunpack.c.3.s8 %v158_v20  ;;  %v4417_v34 = vld [vmem:[#allocation5 + $0x2c0] sm:$0xff] }
  0xc3   :  { %v2153_v29 = vsel %vm4378_vm15, %v3652_v4, %v2149_v35  ;;  %v1554_v44 = vmul.f32 %v3856_v5, %v1040_v38  ;;  %v1072_v45 = vcvt.s32.f32 %v560_v54  ;;  %v460_v48 = vunpack.c.0.s8 %v4333_v51 }
  0xc4   :  { %v2158_v40 = vsel %vm4346_vm13, %v4331_v37, %v2153_v29  ;;  %2452 = vmatpush.bf16.msra.mxu0 %v1868_v24  ;;  %v1884_v42 = vpack.c.bf16 %v1524_v41, %v1522_v22  ;;  %v1556_v50 = vmul.f32 %v3856_v5, %v1042_v25  ;;  %v1074_v28 = vcvt.s32.f32 %v562_v31 }
  0xc5   :  { %v2315_v46 = vmul.f32 %v2158_v40, %v4239_v23  ;;  %v1586_v6 = vmul.f32 %v3856_v5, %v1072_v45  ;;  %v462_v57 = vunpack.c.1.s8 %v4333_v51  ;;  %v972_v63 = vcvt.s32.f32 %v460_v48 }
  0xc6   :  { %2465 = vmatpush.bf16.msra.mxu1 %v1884_v42  ;;  %v1900_v1 = vpack.c.bf16 %v1556_v50, %v1554_v44  ;;  %v1588_v2 = vmul.f32 %v3856_v5, %v1074_v28  ;;  %v492_v4 = vunpack.c.0.s8 %v4356_v53  ;;  %v494_v37 = vunpack.c.1.s8 %v4356_v53 }
  0xc7   :  { %v4400_v0 = vpack.c.bf16 %v2315_v46, %v2315_v46  ;;  %v974_v59 = vcvt.s32.f32 %v462_v57  ;;  %v1486_v60 = vmul.f32 %v3856_v5, %v972_v63  ;;  %v524_v23 = vunpack.c.0.s8 %v4365_v13 }
  0xc8   :  { %2478 = vmatpush.bf16.msra.mxu2 %v1900_v1  ;;  %v1916_v51 = vpack.c.bf16 %v1588_v2, %v1586_v6  ;;  %v1004_v3 = vcvt.s32.f32 %v492_v4  ;;  %v1006_v8 = vcvt.s32.f32 %v494_v37  ;;  %v526_v58 = vunpack.c.1.s8 %v4365_v13 }
  0xc9   :  { %2417 = vmatmul.bf16.vlgmr.msrb.gmra.mxu1 %v4400_v0  ;;  %v1488_v61 = vmul.f32 %v3856_v5, %v974_v59  ;;  %v1036_v53 = vcvt.s32.f32 %v524_v23  ;;  %v556_v47 = vunpack.c.0.s8 %v158_v20  ;;  %v558_v12 = vunpack.c.1.s8 %v158_v20 }
  0xca   :  { %2491 = vmatpush.bf16.msra.mxu3 %v1916_v51  ;;  %v1518_v39 = vmul.f32 %v3856_v5, %v1004_v3  ;;  %v1520_v52 = vmul.f32 %v3856_v5, %v1006_v8  ;;  %v1038_v62 = vcvt.s32.f32 %v526_v58  ;;  %v456_v14 = vunpack.c.2.s8 %v4404_v32  ;;  %v4431_v3 = vld [vmem:[#allocation5 + $0x330] sm:$0xff] }
  0xcb   :  { %v1866_v18 = vpack.c.bf16 %v1488_v61, %v1486_v60  ;;  %v1550_v36 = vmul.f32 %v3856_v5, %v1036_v53  ;;  %v1068_v13 = vcvt.s32.f32 %v556_v47  ;;  %v1070_v19 = vcvt.s32.f32 %v558_v12  ;;  %v4434_v47 = vld [vmem:[#allocation5 + $0x370] sm:$0xff] }
  0xcc   :  { %v1882_v11 = vpack.c.bf16 %v1520_v52, %v1518_v39  ;;  %v1552_v21 = vmul.f32 %v3856_v5, %v1038_v62  ;;  %v458_v20 = vunpack.c.3.s8 %v4404_v32  ;;  %v968_v49 = vcvt.s32.f32 %v456_v14 }
  0xcd   :  { %2453 = vmatpush.bf16.msra.mxu0 %v1866_v18  ;;  %v1582_v26 = vmul.f32 %v3856_v5, %v1068_v13  ;;  %v1584_v27 = vmul.f32 %v3856_v5, %v1070_v19  ;;  %v488_v30 = vunpack.c.2.s8 %v140_v16  ;;  %v490_v17 = vunpack.c.3.s8 %v140_v16 }
  0xce   :  { %2466 = vmatpush.bf16.msra.mxu1 %v1882_v11  ;;  %v1898_v35 = vpack.c.bf16 %v1552_v21, %v1550_v36  ;;  %v970_v22 = vcvt.s32.f32 %v458_v20  ;;  %v1482_v38 = vmul.f32 %v3856_v5, %v968_v49  ;;  %v520_v54 = vunpack.c.2.s8 %v148_v33  ;;  %v4442_v21 = vld [vmem:[#allocation5 + $0x3b0] sm:$0xff] }
  0xcf   :  { %v1914_v24 = vpack.c.bf16 %v1584_v27, %v1582_v26  ;;  %v1000_v41 = vcvt.s32.f32 %v488_v30  ;;  %v1002_v25 = vcvt.s32.f32 %v490_v17  ;;  %v522_v31 = vunpack.c.3.s8 %v148_v33 }
  0xd0   :  { %2479 = vmatpush.bf16.msra.mxu2 %v1898_v35  ;;  %v1484_v29 = vmul.f32 %v3856_v5, %v970_v22  ;;  %v1032_v44 = vcvt.s32.f32 %v520_v54  ;;  %v552_v45 = vunpack.c.2.s8 %v4417_v34  ;;  %v554_v48 = vunpack.c.3.s8 %v4417_v34 }
  0xd1   :  { %2492 = vmatpush.bf16.msra.mxu3 %v1914_v24  ;;  %v1514_v40 = vmul.f32 %v3856_v5, %v1000_v41  ;;  %v1516_v42 = vmul.f32 %v3856_v5, %v1002_v25  ;;  %v1034_v50 = vcvt.s32.f32 %v522_v31  ;;  %v452_v28 = vunpack.c.0.s8 %v4404_v32  ;;  %v4451_v41 = vld [vmem:[#allocation2 + $0x40] sm:$0xff]  ;;  %v4453_v25 = vld [vmem:[#allocation2 + $0x50] sm:$0xff] }
  0xd2   :  { %v1864_v46 = vpack.c.bf16 %v1484_v29, %v1482_v38  ;;  %v1546_v6 = vmul.f32 %v3856_v5, %v1032_v44  ;;  %v1064_v57 = vcvt.s32.f32 %v552_v45  ;;  %v1066_v63 = vcvt.s32.f32 %v554_v48  ;;  %v4457_v48 = vld [vmem:[#allocation5 + $0x3f0] sm:$0xff] }
  0xd3   :  { %v1880_v1 = vpack.c.bf16 %v1516_v42, %v1514_v40  ;;  %v1548_v2 = vmul.f32 %v3856_v5, %v1034_v50  ;;  %v454_v4 = vunpack.c.1.s8 %v4404_v32  ;;  %v964_v37 = vcvt.s32.f32 %v452_v28 }
  0xd4   :  { %2454 = vmatpush.bf16.msra.mxu0 %v1864_v46  ;;  %v1578_v59 = vmul.f32 %v3856_v5, %v1064_v57  ;;  %v1580_v60 = vmul.f32 %v3856_v5, %v1066_v63  ;;  %v484_v23 = vunpack.c.0.s8 %v140_v16  ;;  %v486_v51 = vunpack.c.1.s8 %v140_v16 }
  0xd5   :  { %2467 = vmatpush.bf16.msra.mxu1 %v1880_v1  ;;  %v1896_v8 = vpack.c.bf16 %v1548_v2, %v1546_v6  ;;  %v966_v58 = vcvt.s32.f32 %v454_v4  ;;  %v1478_v61 = vmul.f32 %v3856_v5, %v964_v37  ;;  %v516_v53 = vunpack.c.0.s8 %v148_v33 }
  0xd6   :  { %v1912_v12 = vpack.c.bf16 %v1580_v60, %v1578_v59  ;;  %v996_v32 = vcvt.s32.f32 %v484_v23  ;;  %v998_v39 = vcvt.s32.f32 %v486_v51  ;;  %v518_v52 = vunpack.c.1.s8 %v148_v33  ;;  %v4466_v59 = vld [vmem:[#allocation2 + $0x48] sm:$0xff]  ;;  %v4468_v60 = vld [vmem:[#allocation2 + $0x58] sm:$0xff] }
  0xd7   :  { %2480 = vmatpush.bf16.msra.mxu2 %v1896_v8  ;;  %v1480_v62 = vmul.f32 %v3856_v5, %v966_v58  ;;  %v1028_v14 = vcvt.s32.f32 %v516_v53  ;;  %v608_v16 = vunpack.c.2.s8 %v4431_v3  ;;  %v610_v18 = vunpack.c.3.s8 %v4431_v3 }
  0xd8   :  { %2493 = vmatpush.bf16.msra.mxu3 %v1912_v12  ;;  %v1510_v36 = vmul.f32 %v3856_v5, %v996_v32  ;;  %v1512_v13 = vmul.f32 %v3856_v5, %v998_v39  ;;  %v1030_v19 = vcvt.s32.f32 %v518_v52  ;;  %v640_v11 = vunpack.c.2.s8 %v4434_v47 }
  0xd9   :  { %v1862_v20 = vpack.c.bf16 %v1480_v62, %v1478_v61  ;;  %v1542_v33 = vmul.f32 %v3856_v5, %v1028_v14  ;;  %v1120_v49 = vcvt.s32.f32 %v608_v16  ;;  %v1122_v26 = vcvt.s32.f32 %v610_v18 }
  0xda   :  { %v1878_v27 = vpack.c.bf16 %v1512_v13, %v1510_v36  ;;  %v1544_v30 = vmul.f32 %v3856_v5, %v1030_v19  ;;  %v642_v17 = vunpack.c.3.s8 %v4434_v47  ;;  %v1152_v35 = vcvt.s32.f32 %v640_v11 }
  0xdb   :  { %2455 = vmatpush.bf16.msra.mxu0 %v1862_v20  ;;  %v1634_v22 = vmul.f32 %v3856_v5, %v1120_v49  ;;  %v1636_v38 = vmul.f32 %v3856_v5, %v1122_v26  ;;  %v672_v54 = vunpack.c.2.s8 %v4442_v21  ;;  %v674_v24 = vunpack.c.3.s8 %v4442_v21 }
  0xdc   :  { %2468 = vmatpush.bf16.msra.mxu1 %v1878_v27  ;;  %v1894_v31 = vpack.c.bf16 %v1544_v30, %v1542_v33  ;;  %v1154_v29 = vcvt.s32.f32 %v642_v17  ;;  %v1666_v44 = vmul.f32 %v3856_v5, %v1152_v35  ;;  %v548_v45 = vunpack.c.0.s8 %v4417_v34 }
  0xdd   :  { %v1940_v40 = vpack.c.bf16 %v1636_v38, %v1634_v22  ;;  %v1184_v42 = vcvt.s32.f32 %v672_v54  ;;  %v1186_v50 = vcvt.s32.f32 %v674_v24  ;;  %v550_v28 = vunpack.c.1.s8 %v4417_v34 }
  0xde   :  { %2481 = vmatpush.bf16.msra.mxu2 %v1894_v31  ;;  %v1668_v46 = vmul.f32 %v3856_v5, %v1154_v29  ;;  %v1060_v6 = vcvt.s32.f32 %v548_v45  ;;  %v3601_v57 = vmul.f32 -1.442695, %v4451_v41  ;;  %v3603_v63 = vmul.f32 -1.442695, %v4453_v25 }
  0xdf   :  { %2500 = vmatpush.bf16.msrb.mxu0 %v1940_v40  ;;  %v1698_v1 = vmul.f32 %v3856_v5, %v1184_v42  ;;  %v1700_v2 = vmul.f32 %v3856_v5, %v1186_v50  ;;  %v1062_v4 = vcvt.s32.f32 %v550_v28  ;;  %v704_v37 = vunpack.c.2.s8 %v4457_v48 }
  0xe0   :  { %v1956_v34 = vpack.c.bf16 %v1668_v46, %v1666_v44  ;;  %v1574_v23 = vmul.f32 %v3856_v5, %v1060_v6  ;;  %3653 = vpow2.f32 %v3601_v57  ;;  %v706_v51 = vunpack.c.3.s8 %v4457_v48 }
  0xe1   :  { %v1972_v8 = vpack.c.bf16 %v1700_v2, %v1698_v1  ;;  %v1576_v58 = vmul.f32 %v3856_v5, %v1062_v4  ;;  %3655 = vpow2.f32 %v3603_v63  ;;  %v1216_v61 = vcvt.s32.f32 %v704_v37 }
  0xe2   :  { %2513 = vmatpush.bf16.msrb.mxu1 %v1956_v34  ;;  %v1218_v53 = vcvt.s32.f32 %v706_v51  ;;  %v3602_v12 = vmul.f32 -1.442695, %v4466_v59  ;;  %v3604_v32 = vmul.f32 -1.442695, %v4468_v60  ;;  %v604_v39 = vunpack.c.0.s8 %v4431_v3 }
  0xe3   :  { %2526 = vmatpush.bf16.msrb.mxu2 %v1972_v8  ;;  %v1910_v52 = vpack.c.bf16 %v1576_v58, %v1574_v23  ;;  %v1730_v62 = vmul.f32 %v3856_v5, %v1216_v61  ;;  %v606_v14 = vunpack.c.1.s8 %v4431_v3  ;;  %v636_v16 = vunpack.c.0.s8 %v4434_v47  ;;  %v4526_v61 = vld [vmem:[#allocation5 + $0x320] sm:$0xff] }
  0xe4   :  { %v1732_v18 = vmul.f32 %v3856_v5, %v1218_v53  ;;  %3657 = vpow2.f32 %v3602_v12  ;;  %v1116_v36 = vcvt.s32.f32 %v604_v39  ;;  %v638_v13 = vunpack.c.1.s8 %v4434_v47 }
  0xe5   :  { %2494 = vmatpush.bf16.msra.mxu3 %v1910_v52  ;;  %3659 = vpow2.f32 %v3604_v32  ;;  %v1118_v19 = vcvt.s32.f32 %v606_v14  ;;  %v1148_v11 = vcvt.s32.f32 %v636_v16  ;;  %v668_v20 = vunpack.c.0.s8 %v4442_v21  ;;  %v4533_v52 = vld [vmem:[#allocation5 + $0x360] sm:$0xff] }
  0xe6   :  { %v3654_v33 = vpop.eup %3653  ;;  %v1988_v49 = vpack.c.bf16 %v1732_v18, %v1730_v62  ;;  %v1150_v26 = vcvt.s32.f32 %v638_v13  ;;  %v670_v27 = vunpack.c.1.s8 %v4442_v21  ;;  %v1630_v17 = vmul.f32 %v3856_v5, %v1116_v36 }
  0xe7   :  { %v3656_v3 = vpop.eup %3655  ;;  %v4483_v30 = vadd.f32 1.0, %v3654_v33  ;;  %v1632_v35 = vmul.f32 %v3856_v5, %v1118_v19  ;;  %v1662_v47 = vmul.f32 %v3856_v5, %v1148_v11  ;;  %v1180_v24 = vcvt.s32.f32 %v668_v20 }
  0xe8   :  { %v4487_v22 = vadd.f32 1.0, %v3656_v3  ;;  %v1664_v38 = vmul.f32 %v3856_v5, %v1150_v26  ;;  %v1182_v44 = vcvt.s32.f32 %v670_v27  ;;  %v700_v28 = vunpack.c.0.s8 %v4457_v48 }
  0xe9   :  { %2539 = vmatpush.bf16.msrb.mxu3 %v1988_v49  ;;  %3661 = vrcp.f32 %v4483_v30  ;;  %v2201_v54 = vand.u32 2147483648, %v4483_v30  ;;  %v2199_v31 = vand.u32 2147483647, %v4483_v30  ;;  %v1938_v50 = vpack.c.bf16 %v1632_v35, %v1630_v17 }
  0xea   :  { %v3658_v21 = vpop.eup %3657  ;;  %3663 = vrcp.f32 %v4487_v22  ;;  %v2231_v29 = vand.u32 2147483648, %v4487_v22  ;;  %v2229_v40 = vand.u32 2147483647, %v4487_v22  ;;  %vm2195_vm0 = vweird.f32 %v4483_v30 }
  0xeb   :  { %v3660_v45 = vpop.eup %3659  ;;  %v4497_v42 = vadd.f32 1.0, %v3658_v21  ;;  %vm2225_vm1 = vweird.f32 %v4487_v22  ;;  %v1954_v6 = vpack.c.bf16 %v1664_v38, %v1662_v47  ;;  %v4504_v57 = vor.u32 1.1754944e-38, %v2201_v54  ;;  %2501 = vmatpush.bf16.msrb.mxu0 %v1938_v50 }
  0xec   :  { %v4502_v46 = vadd.f32 1.0, %v3660_v45  ;;  %v4506_v63 = vor.u32 1.1754944e-38, %v2231_v29  ;;  %vm4510_vm2 = vcmp.eq.f32.partialorder %v2199_v31, 8.507059e+37  ;;  %vm4518_vm4 = vcmp.eq.f32.partialorder %v2229_v40, 8.507059e+37 }
  0xed   :  { %3665 = vrcp.f32 %v4497_v42  ;;  %v2216_v1 = vand.u32 2147483648, %v4497_v42  ;;  %vm2210_vm3 = vweird.f32 %v4497_v42  ;;  %v2214_v4 = vand.u32 2147483647, %v4497_v42  ;;  %2514 = vmatpush.bf16.msrb.mxu1 %v1954_v6 }
  0xee   :  { %3667 = vrcp.f32 %v4502_v46  ;;  %v2246_v37 = vand.u32 2147483648, %v4502_v46  ;;  %vm2240_vm5 = vweird.f32 %v4502_v46  ;;  %v2244_v51 = vand.u32 2147483647, %v4502_v46 }
  0xef   :  { %v3662_v34 = vpop.eup %3661  ;;  %v1694_v8 = vmul.f32 %v3856_v5, %v1180_v24  ;;  %v1696_v58 = vmul.f32 %v3856_v5, %v1182_v44  ;;  %v4529_v32 = vor.u32 1.1754944e-38, %v2216_v1  ;;  %v702_v16 = vunpack.c.1.s8 %v4457_v48 }
  0xf0   :  { %v3664_v53 = vpop.eup %3663  ;;  %v2191_v12 = vmul.f32 %v3662_v34, %v4483_v30  ;;  %vm2196_vm6 = vweird.f32 %v3662_v34  ;;  %v4531_v39 = vor.u32 1.1754944e-38, %v2246_v37  ;;  %vm4537_vm8 = vcmp.eq.f32.partialorder %v2214_v4, 8.507059e+37 }
  0xf1   :  { %v2221_v62 = vmul.f32 %v3664_v53, %v4487_v22  ;;  %vm2226_vm7 = vweird.f32 %v3664_v53  ;;  %v1970_v14 = vpack.c.bf16 %v1696_v58, %v1694_v8  ;;  %v1212_v13 = vcvt.s32.f32 %v700_v28  ;;  %vm4554_vm11 = vmor %vm2195_vm0, %vm2196_vm6  ;;  %v174_v58 = vld [vmem:[#allocation5 + $0x350] sm:$0xff] }
  0xf2   :  { %v2192_v18 = vsub.f32 1.0, %v2191_v12  ;;  %v600_v19 = vunpack.c.2.s8 %v4526_v61  ;;  %v602_v11 = vunpack.c.3.s8 %v4526_v61  ;;  %vm4543_vm9 = vcmp.eq.f32.partialorder %v2244_v51, 8.507059e+37  ;;  %vm4563_vm13 = vmor %vm2225_vm1, %vm2226_vm7 }
  0xf3   :  { %v3666_v20 = vpop.eup %3665  ;;  %v2222_v33 = vsub.f32 1.0, %v2221_v62  ;;  %2527 = vmatpush.bf16.msrb.mxu2 %v1970_v14  ;;  %v1214_v26 = vcvt.s32.f32 %v702_v16  ;;  %v632_v48 = vunpack.c.2.s8 %v4533_v52  ;;  %v634_v27 = vunpack.c.3.s8 %v4533_v52  ;;  %v4583_v62 = vld [vmem:[#allocation5 + $0x3a0] sm:$0xff] }
  0xf4   :  { %v3668_v3 = vpop.eup %3667  ;;  %v2193_v17 = vmul.f32 %v3662_v34, %v2192_v18  ;;  %v2206_v35 = vmul.f32 %v3666_v20, %v4497_v42  ;;  %vm2211_vm10 = vweird.f32 %v3666_v20  ;;  %v1726_v47 = vmul.f32 %v3856_v5, %v1212_v13 }
  0xf5   :  { %v2223_v54 = vmul.f32 %v3664_v53, %v2222_v33  ;;  %v2236_v24 = vmul.f32 %v3668_v3, %v4502_v46  ;;  %vm2241_vm12 = vweird.f32 %v3668_v3  ;;  %v1728_v21 = vmul.f32 %v3856_v5, %v1214_v26  ;;  %vm4579_vm14 = vmor %vm2210_vm3, %vm2211_vm10 }
  0xf6   :  { %v2194_v31 = vadd.f32 %v3662_v34, %v2193_v17  ;;  %v2207_v44 = vsub.f32 1.0, %v2206_v35  ;;  %v1112_v30 = vcvt.s32.f32 %v600_v19  ;;  %v1114_v45 = vcvt.s32.f32 %v602_v11  ;;  %vm4592_vm15 = vmor %vm2240_vm5, %vm2241_vm12  ;;  %v192_v11 = vld [vmem:[#allocation5 + $0x3e0] sm:$0xff] }
  0xf7   :  { %v2224_v40 = vadd.f32 %v3664_v53, %v2223_v54  ;;  %v2237_v50 = vsub.f32 1.0, %v2236_v24  ;;  %v1986_v28 = vpack.c.bf16 %v1728_v21, %v1726_v47  ;;  %v1144_v6 = vcvt.s32.f32 %v632_v48 }
  0xf8   :  { %v2198_v1 = vsel %vm4554_vm11, %v3662_v34, %v2194_v31  ;;  %v2208_v4 = vmul.f32 %v3666_v20, %v2207_v44  ;;  %v1626_v37 = vmul.f32 %v3856_v5, %v1112_v30  ;;  %v1628_v51 = vmul.f32 %v3856_v5, %v1114_v45 }
  0xf9   :  { %v2203_v22 = vsel %vm4510_vm2, %v4504_v57, %v2198_v1  ;;  %v2228_v8 = vsel %vm4563_vm13, %v3664_v53, %v2224_v40  ;;  %v2238_v34 = vmul.f32 %v3668_v3, %v2237_v50  ;;  %2540 = vmatpush.bf16.msrb.mxu3 %v1986_v28  ;;  %v1146_v12 = vcvt.s32.f32 %v634_v27 }
  0xfa   :  { %v2318_v14 = vmul.f32 %v2203_v22, %v4451_v41  ;;  %v2233_v57 = vsel %vm4518_vm4, %v4506_v63, %v2228_v8  ;;  %v2209_v2 = vadd.f32 %v3666_v20, %v2208_v4  ;;  %v1936_v53 = vpack.c.bf16 %v1628_v51, %v1626_v37  ;;  %v166_v37 = vld [vmem:[#allocation5 + $0x310] sm:$0xff] }
  0xfb   :  { %v2320_v16 = vmul.f32 %v2233_v57, %v4453_v25  ;;  %v2239_v18 = vadd.f32 %v3668_v3, %v2238_v34  ;;  %v1658_v13 = vmul.f32 %v3856_v5, %v1144_v6  ;;  %v1660_v41 = vmul.f32 %v3856_v5, %v1146_v12 }
  0xfc   :  { %v4599_v19 = vpack.c.bf16 %v2318_v14, %v2318_v14  ;;  %v2213_v63 = vsel %vm4579_vm14, %v3666_v20, %v2209_v2  ;;  %2502 = vmatpush.bf16.msrb.mxu0 %v1936_v53  ;;  %v664_v46 = vunpack.c.2.s8 %v4583_v62  ;;  %v666_v23 = vunpack.c.3.s8 %v4583_v62 }
  0xfd   :  { %v4605_v33 = vpack.c.bf16 %v2320_v16, %v2320_v16  ;;  %v2218_v25 = vsel %vm4537_vm8, %v4529_v32, %v2213_v63  ;;  %v2243_v26 = vsel %vm4592_vm15, %v3668_v3, %v2239_v18  ;;  %v1952_v48 = vpack.c.bf16 %v1660_v41, %v1658_v13  ;;  %v182_v18 = vld [vmem:[#allocation5 + $0x390] sm:$0xff] }
  0xfe   :  { %2456 = vmatmul.bf16.vlgmr.msra.gmra.mxu0 %v4599_v19  ;;  %v2319_v20 = vmul.f32 %v2218_v25, %v4466_v59  ;;  %v2248_v27 = vsel %vm4543_vm9, %v4531_v39, %v2243_v26  ;;  %v1176_v17 = vcvt.s32.f32 %v664_v46  ;;  %v1178_v35 = vcvt.s32.f32 %v666_v23  ;;  %v190_v26 = vld [vmem:[#allocation5 + $0x3d0] sm:$0xff] }
  0xff   :  { %2482 = vmatmul.bf16.vlgmr.msra.gmra.mxu2 %v4605_v33  ;;  %v2321_v47 = vmul.f32 %v2248_v27, %v4468_v60  ;;  %2515 = vmatpush.bf16.msrb.mxu1 %v1952_v48  ;;  %v696_v32 = vunpack.c.2.s8 %v192_v11  ;;  %v698_v36 = vunpack.c.3.s8 %v192_v11  ;;  %v596_v3 = vunpack.c.0.s8 %v4526_v61 }
 0x100   :  { %v4620_v38 = vpack.c.bf16 %v2319_v20, %v2319_v20  ;;  %v1690_v54 = vmul.f32 %v3856_v5, %v1176_v17  ;;  %v1692_v59 = vmul.f32 %v3856_v5, %v1178_v35  ;;  %v598_v49 = vunpack.c.1.s8 %v4526_v61 }
 0x101   :  { %v4625_v39 = vpack.c.bf16 %v2321_v47, %v2321_v47  ;;  %v1208_v24 = vcvt.s32.f32 %v696_v32  ;;  %v1210_v21 = vcvt.s32.f32 %v698_v36  ;;  %v1108_v31 = vcvt.s32.f32 %v596_v3 }
 0x102   :  { %2469 = vmatmul.bf16.vlgmr.msra.gmra.mxu1 %v4620_v38  ;;  %v1968_v60 = vpack.c.bf16 %v1692_v59, %v1690_v54  ;;  %v1110_v29 = vcvt.s32.f32 %v598_v49  ;;  %v628_v44 = vunpack.c.0.s8 %v4533_v52  ;;  %v630_v30 = vunpack.c.1.s8 %v4533_v52 }
 0x103   :  { %2495 = vmatmul.bf16.vlgmr.msra.gmra.mxu3 %v4625_v39  ;;  %v1722_v45 = vmul.f32 %v3856_v5, %v1208_v24  ;;  %v1724_v40 = vmul.f32 %v3856_v5, %v1210_v21  ;;  %v1622_v61 = vmul.f32 %v3856_v5, %v1108_v31  ;;  %v660_v50 = vunpack.c.0.s8 %v4583_v62 }
 0x104   :  { %2528 = vmatpush.bf16.msrb.mxu2 %v1968_v60  ;;  %v1624_v28 = vmul.f32 %v3856_v5, %v1110_v29  ;;  %v1140_v6 = vcvt.s32.f32 %v628_v44  ;;  %v1142_v1 = vcvt.s32.f32 %v630_v30  ;;  %v662_v4 = vunpack.c.1.s8 %v4583_v62 }
 0x105   :  { %v1984_v51 = vpack.c.bf16 %v1724_v40, %v1722_v45  ;;  %v1172_v52 = vcvt.s32.f32 %v660_v50  ;;  %v692_v22 = vunpack.c.0.s8 %v192_v11  ;;  %v694_v8 = vunpack.c.1.s8 %v192_v11 }
 0x106   :  { %v1934_v34 = vpack.c.bf16 %v1624_v28, %v1622_v61  ;;  %v1654_v12 = vmul.f32 %v3856_v5, %v1140_v6  ;;  %v1656_v14 = vmul.f32 %v3856_v5, %v1142_v1  ;;  %v1174_v57 = vcvt.s32.f32 %v662_v4 }
 0x107   :  { %2541 = vmatpush.bf16.msrb.mxu3 %v1984_v51  ;;  %v1686_v2 = vmul.f32 %v3856_v5, %v1172_v52  ;;  %v1204_v42 = vcvt.s32.f32 %v692_v22  ;;  %v1206_v53 = vcvt.s32.f32 %v694_v8  ;;  %v592_v16 = vunpack.c.2.s8 %v166_v37 }
 0x108   :  { %2503 = vmatpush.bf16.msrb.mxu0 %v1934_v34  ;;  %v1950_v62 = vpack.c.bf16 %v1656_v14, %v1654_v12  ;;  %v1688_v13 = vmul.f32 %v3856_v5, %v1174_v57  ;;  %v594_v41 = vunpack.c.3.s8 %v166_v37  ;;  %v624_v63 = vunpack.c.2.s8 %v174_v58 }
 0x109   :  { %v1718_v46 = vmul.f32 %v3856_v5, %v1204_v42  ;;  %v1720_v23 = vmul.f32 %v3856_v5, %v1206_v53  ;;  %v1104_v11 = vcvt.s32.f32 %v592_v16  ;;  %v626_v25 = vunpack.c.3.s8 %v174_v58 }
 0x10a   :  { %2516 = vmatpush.bf16.msrb.mxu1 %v1950_v62  ;;  %v1966_v48 = vpack.c.bf16 %v1688_v13, %v1686_v2  ;;  %v1106_v20 = vcvt.s32.f32 %v594_v41  ;;  %v1136_v27 = vcvt.s32.f32 %v624_v63  ;;  %v656_v17 = vunpack.c.2.s8 %v182_v18  ;;  %v164_v2 = vld [vmem:[#allocation5 + $0x300] sm:$0xff] }
 0x10b   :  { %v1982_v35 = vpack.c.bf16 %v1720_v23, %v1718_v46  ;;  %v1618_v47 = vmul.f32 %v3856_v5, %v1104_v11  ;;  %v1138_v32 = vcvt.s32.f32 %v626_v25  ;;  %v658_v36 = vunpack.c.3.s8 %v182_v18  ;;  %v172_v13 = vld [vmem:[#allocation5 + $0x340] sm:$0xff] }
 0x10c   :  { %2529 = vmatpush.bf16.msrb.mxu2 %v1966_v48  ;;  %v1620_v3 = vmul.f32 %v3856_v5, %v1106_v20  ;;  %v1650_v54 = vmul.f32 %v3856_v5, %v1136_v27  ;;  %v1168_v59 = vcvt.s32.f32 %v656_v17  ;;  %v688_v49 = vunpack.c.2.s8 %v190_v26 }
 0x10d   :  { %2542 = vmatpush.bf16.msrb.mxu3 %v1982_v35  ;;  %v1652_v24 = vmul.f32 %v3856_v5, %v1138_v32  ;;  %v1170_v21 = vcvt.s32.f32 %v658_v36  ;;  %v690_v31 = vunpack.c.3.s8 %v190_v26  ;;  %v588_v60 = vunpack.c.0.s8 %v166_v37 }
 0x10e   :  { %v1932_v29 = vpack.c.bf16 %v1620_v3, %v1618_v47  ;;  %v1682_v44 = vmul.f32 %v3856_v5, %v1168_v59  ;;  %v1200_v30 = vcvt.s32.f32 %v688_v49  ;;  %v590_v45 = vunpack.c.1.s8 %v166_v37  ;;  %v4661_v3 = vld [vmem:[#allocation5 + $0x3c0] sm:$0xff] }
 0x10f   :  { %v1948_v40 = vpack.c.bf16 %v1652_v24, %v1650_v54  ;;  %v1684_v61 = vmul.f32 %v3856_v5, %v1170_v21  ;;  %v1202_v50 = vcvt.s32.f32 %v690_v31  ;;  %v1100_v28 = vcvt.s32.f32 %v588_v60 }
 0x110   :  { %2504 = vmatpush.bf16.msrb.mxu0 %v1932_v29  ;;  %v1714_v6 = vmul.f32 %v3856_v5, %v1200_v30  ;;  %v1102_v1 = vcvt.s32.f32 %v590_v45  ;;  %v620_v4 = vunpack.c.0.s8 %v174_v58  ;;  %v622_v51 = vunpack.c.1.s8 %v174_v58 }
 0x111   :  { %2517 = vmatpush.bf16.msrb.mxu1 %v1948_v40  ;;  %v1964_v52 = vpack.c.bf16 %v1684_v61, %v1682_v44  ;;  %v1716_v22 = vmul.f32 %v3856_v5, %v1202_v50  ;;  %v1614_v8 = vmul.f32 %v3856_v5, %v1100_v28  ;;  %v652_v34 = vunpack.c.0.s8 %v182_v18 }
 0x112   :  { %v1616_v37 = vmul.f32 %v3856_v5, %v1102_v1  ;;  %v1132_v12 = vcvt.s32.f32 %v620_v4  ;;  %v1134_v14 = vcvt.s32.f32 %v622_v51  ;;  %v654_v57 = vunpack.c.1.s8 %v182_v18  ;;  %v4656_v18 = vld [vmem:[#allocation5 + $0x380] sm:$0xff] }
 0x113   :  { %2530 = vmatpush.bf16.msrb.mxu2 %v1964_v52  ;;  %v1980_v42 = vpack.c.bf16 %v1716_v22, %v1714_v6  ;;  %v1164_v53 = vcvt.s32.f32 %v652_v34  ;;  %v684_v16 = vunpack.c.0.s8 %v190_v26  ;;  %v686_v62 = vunpack.c.1.s8 %v190_v26 }
 0x114   :  { %v1930_v58 = vpack.c.bf16 %v1616_v37, %v1614_v8  ;;  %v1646_v41 = vmul.f32 %v3856_v5, %v1132_v12  ;;  %v1648_v63 = vmul.f32 %v3856_v5, %v1134_v14  ;;  %v1166_v46 = vcvt.s32.f32 %v654_v57 }
 0x115   :  { %2543 = vmatpush.bf16.msrb.mxu3 %v1980_v42  ;;  %v1678_v23 = vmul.f32 %v3856_v5, %v1164_v53  ;;  %v1196_v11 = vcvt.s32.f32 %v684_v16  ;;  %v1198_v25 = vcvt.s32.f32 %v686_v62  ;;  %v584_v48 = vunpack.c.2.s8 %v164_v2  ;;  %v4674_v53 = vld [vmem:[#allocation5 + $0x38] sm:$0xff] }
 0x116   :  { %2505 = vmatpush.bf16.msrb.mxu0 %v1930_v58  ;;  %v1946_v20 = vpack.c.bf16 %v1648_v63, %v1646_v41  ;;  %v1680_v27 = vmul.f32 %v3856_v5, %v1166_v46  ;;  %v586_v26 = vunpack.c.3.s8 %v164_v2  ;;  %v616_v17 = vunpack.c.2.s8 %v172_v13 }
 0x117   :  { %v1710_v35 = vmul.f32 %v3856_v5, %v1196_v11  ;;  %v1712_v47 = vmul.f32 %v3856_v5, %v1198_v25  ;;  %v1096_v32 = vcvt.s32.f32 %v584_v48  ;;  %v618_v36 = vunpack.c.3.s8 %v172_v13 }
 0x118   :  { %2518 = vmatpush.bf16.msrb.mxu1 %v1946_v20  ;;  %v1962_v54 = vpack.c.bf16 %v1680_v27, %v1678_v23  ;;  %v1098_v59 = vcvt.s32.f32 %v586_v26  ;;  %v1128_v49 = vcvt.s32.f32 %v616_v17  ;;  %v648_v24 = vunpack.c.2.s8 %v4656_v18  ;;  %v4686_v27 = vld [vmem:[#allocation5 + $0x78] sm:$0xff] }
 0x119   :  { %v1978_v21 = vpack.c.bf16 %v1712_v47, %v1710_v35  ;;  %v1610_v31 = vmul.f32 %v3856_v5, %v1096_v32  ;;  %v1130_v60 = vcvt.s32.f32 %v618_v36  ;;  %v650_v29 = vunpack.c.3.s8 %v4656_v18 }
 0x11a   :  { %2531 = vmatpush.bf16.msrb.mxu2 %v1962_v54  ;;  %v1612_v44 = vmul.f32 %v3856_v5, %v1098_v59  ;;  %v1642_v30 = vmul.f32 %v3856_v5, %v1128_v49  ;;  %v1160_v45 = vcvt.s32.f32 %v648_v24  ;;  %v680_v40 = vunpack.c.2.s8 %v4661_v3 }
 0x11b   :  { %2544 = vmatpush.bf16.msrb.mxu3 %v1978_v21  ;;  %v1644_v61 = vmul.f32 %v3856_v5, %v1130_v60  ;;  %v1162_v50 = vcvt.s32.f32 %v650_v29  ;;  %v682_v28 = vunpack.c.3.s8 %v4661_v3  ;;  %v580_v6 = vunpack.c.0.s8 %v164_v2 }
 0x11c   :  { %v1928_v1 = vpack.c.bf16 %v1612_v44, %v1610_v31  ;;  %v1674_v4 = vmul.f32 %v3856_v5, %v1160_v45  ;;  %v1192_v51 = vcvt.s32.f32 %v680_v40  ;;  %v582_v52 = vunpack.c.1.s8 %v164_v2  ;;  %v4702_v45 = vld [vmem:[#allocation2 + $0x60] sm:$0xff] }
 0x11d   :  { %v1944_v22 = vpack.c.bf16 %v1644_v61, %v1642_v30  ;;  %v1676_v8 = vmul.f32 %v3856_v5, %v1162_v50  ;;  %v1194_v34 = vcvt.s32.f32 %v682_v28  ;;  %v1092_v37 = vcvt.s32.f32 %v580_v6  ;;  %v4705_v6 = vld [vmem:[#allocation2 + $0x70] sm:$0xff] }
 0x11e   :  { %2506 = vmatpush.bf16.msrb.mxu0 %v1928_v1  ;;  %v1706_v12 = vmul.f32 %v3856_v5, %v1192_v51  ;;  %v1094_v14 = vcvt.s32.f32 %v582_v52  ;;  %v612_v57 = vunpack.c.0.s8 %v172_v13  ;;  %v614_v42 = vunpack.c.1.s8 %v172_v13  ;;  %v67_v13 = vld [vmem:[%s5518_s4 + $0x8] sm:$0xff] }
 0x11f   :  { %2519 = vmatpush.bf16.msrb.mxu1 %v1944_v22  ;;  %v1960_v16 = vpack.c.bf16 %v1676_v8, %v1674_v4  ;;  %v1708_v62 = vmul.f32 %v3856_v5, %v1194_v34  ;;  %v1606_v58 = vmul.f32 %v3856_v5, %v1092_v37  ;;  %v644_v2 = vunpack.c.0.s8 %v4656_v18  ;;  %v4708_v22 = vld [vmem:[#allocation5 + $0xf8] sm:$0xff] }
 0x120   :  { %v1608_v41 = vmul.f32 %v3856_v5, %v1094_v14  ;;  %v1124_v63 = vcvt.s32.f32 %v612_v57  ;;  %v1126_v46 = vcvt.s32.f32 %v614_v42  ;;  %v646_v23 = vunpack.c.1.s8 %v4656_v18  ;;  %v4690_v18 = vld [vmem:[#allocation5 + $0xb8] sm:$0xff] }
 0x121   :  { %2532 = vmatpush.bf16.msrb.mxu2 %v1960_v16  ;;  %v1976_v11 = vpack.c.bf16 %v1708_v62, %v1706_v12  ;;  %v1156_v25 = vcvt.s32.f32 %v644_v2  ;;  %v225_v48 = vunpack.c.2.s8 %v4674_v53  ;;  %v227_v20 = vunpack.c.3.s8 %v4674_v53  ;;  %v4716_v62 = vld [vmem:[#allocation2 + $0x68] sm:$0xff] }
 0x122   :  { %v1926_v26 = vpack.c.bf16 %v1608_v41, %v1606_v58  ;;  %v1638_v17 = vmul.f32 %v3856_v5, %v1124_v63  ;;  %v1640_v35 = vmul.f32 %v3856_v5, %v1126_v46  ;;  %v1158_v47 = vcvt.s32.f32 %v646_v23 }
 0x123   :  { %2545 = vmatpush.bf16.msrb.mxu3 %v1976_v11  ;;  %v1670_v32 = vmul.f32 %v3856_v5, %v1156_v25  ;;  %v737_v36 = vcvt.s32.f32 %v225_v48  ;;  %v739_v54 = vcvt.s32.f32 %v227_v20  ;;  %v4693_v59 = vperm.slane %v67_v13, 7 }
 0x124   :  { %2507 = vmatpush.bf16.msrb.mxu0 %v1926_v26  ;;  %v1942_v49 = vpack.c.bf16 %v1640_v35, %v1638_v17  ;;  %v1672_v24 = vmul.f32 %v3856_v5, %v1158_v47  ;;  %v257_v21 = vunpack.c.2.s8 %v4686_v27  ;;  %v259_v31 = vunpack.c.3.s8 %v4686_v27 }
 0x125   :  { %v1251_v60 = vmul.f32 %v4693_v59, %v737_v36  ;;  %v1253_v29 = vmul.f32 %v4693_v59, %v739_v54  ;;  %v289_v44 = vunpack.c.2.s8 %v4690_v18  ;;  %v291_v30 = vunpack.c.3.s8 %v4690_v18 }
 0x126   :  { %2520 = vmatpush.bf16.msrb.mxu1 %v1942_v49  ;;  %v1958_v40 = vpack.c.bf16 %v1672_v24, %v1670_v32  ;;  %v769_v61 = vcvt.s32.f32 %v257_v21  ;;  %v771_v50 = vcvt.s32.f32 %v259_v31  ;;  %v676_v28 = vunpack.c.0.s8 %v4661_v3 }
 0x127   :  { %v1749_v1 = vpack.c.bf16 %v1253_v29, %v1251_v60  ;;  %v801_v4 = vcvt.s32.f32 %v289_v44  ;;  %v803_v51 = vcvt.s32.f32 %v291_v30  ;;  %v678_v52 = vunpack.c.1.s8 %v4661_v3  ;;  %v4718_v3 = vld [vmem:[#allocation2 + $0x78] sm:$0xff] }
 0x128   :  { %2533 = vmatpush.bf16.msrb.mxu2 %v1958_v40  ;;  %v1283_v8 = vmul.f32 %v4693_v59, %v769_v61  ;;  %v1285_v34 = vmul.f32 %v4693_v59, %v771_v50  ;;  %v1188_v37 = vcvt.s32.f32 %v676_v28  ;;  %v3605_v12 = vmul.f32 -1.442695, %v4702_v45 }
 0x129   :  { %2552 = vmatpush.bf16.msra.mxu0 %v1749_v1  ;;  %v1315_v14 = vmul.f32 %v4693_v59, %v801_v4  ;;  %v1317_v57 = vmul.f32 %v4693_v59, %v803_v51  ;;  %v1190_v42 = vcvt.s32.f32 %v678_v52  ;;  %v3607_v16 = vmul.f32 -1.442695, %v4705_v6 }
 0x12a   :  { %v1765_v58 = vpack.c.bf16 %v1285_v34, %v1283_v8  ;;  %v1702_v2 = vmul.f32 %v3856_v5, %v1188_v37  ;;  %3669 = vpow2.f32 %v3605_v12  ;;  %v321_v41 = vunpack.c.2.s8 %v4708_v22 }
 0x12b   :  { %v1781_v63 = vpack.c.bf16 %v1317_v57, %v1315_v14  ;;  %v1704_v46 = vmul.f32 %v3856_v5, %v1190_v42  ;;  %3671 = vpow2.f32 %v3607_v16  ;;  %v323_v23 = vunpack.c.3.s8 %v4708_v22 }
 0x12c   :  { %2565 = vmatpush.bf16.msra.mxu1 %v1765_v58  ;;  %v833_v13 = vcvt.s32.f32 %v321_v41  ;;  %v3606_v11 = vmul.f32 -1.442695, %v4716_v62  ;;  %v3608_v25 = vmul.f32 -1.442695, %v4718_v3  ;;  %v221_v48 = vunpack.c.0.s8 %v4674_v53 }
 0x12d   :  { %2578 = vmatpush.bf16.msra.mxu2 %v1781_v63  ;;  %v1974_v20 = vpack.c.bf16 %v1704_v46, %v1702_v2  ;;  %v835_v26 = vcvt.s32.f32 %v323_v23  ;;  %v223_v17 = vunpack.c.1.s8 %v4674_v53  ;;  %v253_v35 = vunpack.c.0.s8 %v4686_v27 }
 0x12e   :  { %v1347_v5 = vmul.f32 %v4693_v59, %v833_v13  ;;  %3673 = vpow2.f32 %v3606_v11  ;;  %v733_v47 = vcvt.s32.f32 %v221_v48  ;;  %v255_v32 = vunpack.c.1.s8 %v4686_v27  ;;  %v4776_v48 = vld [vmem:[#allocation5 + $0x28] sm:$0xff] }
 0x12f   :  { %2546 = vmatpush.bf16.msrb.mxu3 %v1974_v20  ;;  %v1349_v36 = vmul.f32 %v4693_v59, %v835_v26  ;;  %3675 = vpow2.f32 %v3608_v25  ;;  %v735_v54 = vcvt.s32.f32 %v223_v17  ;;  %v765_v49 = vcvt.s32.f32 %v253_v35 }
 0x130   :  { %v3670_v24 = vpop.eup %3669  ;;  %v1247_v21 = vmul.f32 %v4693_v59, %v733_v47  ;;  %v767_v31 = vcvt.s32.f32 %v255_v32  ;;  %v285_v53 = vunpack.c.0.s8 %v4690_v18  ;;  %v287_v27 = vunpack.c.1.s8 %v4690_v18 }
 0x131   :  { %v3672_v60 = vpop.eup %3671  ;;  %v4734_v29 = vadd.f32 1.0, %v3670_v24  ;;  %v1797_v44 = vpack.c.bf16 %v1349_v36, %v1347_v5  ;;  %v1249_v30 = vmul.f32 %v4693_v59, %v735_v54  ;;  %v1279_v61 = vmul.f32 %v4693_v59, %v765_v49  ;;  %v4783_v5 = vld [vmem:[#allocation5 + $0x68] sm:$0xff] }
 0x132   :  { %v4738_v40 = vadd.f32 1.0, %v3672_v60  ;;  %v1281_v50 = vmul.f32 %v4693_v59, %v767_v31  ;;  %v797_v52 = vcvt.s32.f32 %v285_v53  ;;  %v799_v12 = vcvt.s32.f32 %v287_v27 }
 0x133   :  { %3677 = vrcp.f32 %v4734_v29  ;;  %v2261_v28 = vand.u32 2147483648, %v4734_v29  ;;  %2591 = vmatpush.bf16.msra.mxu3 %v1797_v44  ;;  %v2259_v4 = vand.u32 2147483647, %v4734_v29  ;;  %v1747_v37 = vpack.c.bf16 %v1249_v30, %v1247_v21 }
 0x134   :  { %v3674_v1 = vpop.eup %3673  ;;  %3679 = vrcp.f32 %v4738_v40  ;;  %v2291_v51 = vand.u32 2147483648, %v4738_v40  ;;  %v2289_v8 = vand.u32 2147483647, %v4738_v40  ;;  %vm2255_vm0 = vweird.f32 %v4734_v29 }
 0x135   :  { %v3676_v18 = vpop.eup %3675  ;;  %v4748_v34 = vadd.f32 1.0, %v3674_v1  ;;  %vm2285_vm1 = vweird.f32 %v4738_v40  ;;  %v1763_v57 = vpack.c.bf16 %v1281_v50, %v1279_v61  ;;  %v4754_v42 = vor.u32 1.1754944e-38, %v2261_v28  ;;  %2553 = vmatpush.bf16.msra.mxu0 %v1747_v37 }
 0x136   :  { %v4752_v14 = vadd.f32 1.0, %v3676_v18  ;;  %v4756_v16 = vor.u32 1.1754944e-38, %v2291_v51  ;;  %vm4760_vm2 = vcmp.eq.f32.partialorder %v2259_v4, 8.507059e+37  ;;  %vm4768_vm4 = vcmp.eq.f32.partialorder %v2289_v8, 8.507059e+37 }
 0x137   :  { %3681 = vrcp.f32 %v4748_v34  ;;  %v2276_v58 = vand.u32 2147483648, %v4748_v34  ;;  %vm2270_vm3 = vweird.f32 %v4748_v34  ;;  %v2274_v41 = vand.u32 2147483647, %v4748_v34  ;;  %2566 = vmatpush.bf16.msra.mxu1 %v1763_v57 }
 0x138   :  { %3683 = vrcp.f32 %v4752_v14  ;;  %v2306_v63 = vand.u32 2147483648, %v4752_v14  ;;  %vm2300_vm5 = vweird.f32 %v4752_v14  ;;  %v2304_v13 = vand.u32 2147483647, %v4752_v14 }
 0x139   :  { %v3678_v46 = vpop.eup %3677  ;;  %v1311_v11 = vmul.f32 %v4693_v59, %v797_v52  ;;  %v1313_v25 = vmul.f32 %v4693_v59, %v799_v12  ;;  %v4779_v17 = vor.u32 1.1754944e-38, %v2276_v58  ;;  %v317_v36 = vunpack.c.0.s8 %v4708_v22 }
 0x13a   :  { %v3680_v20 = vpop.eup %3679  ;;  %v2251_v26 = vmul.f32 %v3678_v46, %v4734_v29  ;;  %vm2256_vm6 = vweird.f32 %v3678_v46  ;;  %v4781_v35 = vor.u32 1.1754944e-38, %v2306_v63  ;;  %vm4787_vm8 = vcmp.eq.f32.partialorder %v2274_v41, 8.507059e+37 }
 0x13b   :  { %v2281_v47 = vmul.f32 %v3680_v20, %v4738_v40  ;;  %vm2286_vm7 = vweird.f32 %v3680_v20  ;;  %v1779_v32 = vpack.c.bf16 %v1313_v25, %v1311_v11  ;;  %v319_v24 = vunpack.c.1.s8 %v4708_v22  ;;  %vm4804_vm11 = vmor %vm2255_vm0, %vm2256_vm6 }
 0x13c   :  { %v2252_v54 = vsub.f32 1.0, %v2251_v26  ;;  %v217_v21 = vunpack.c.2.s8 %v4776_v48  ;;  %v219_v31 = vunpack.c.3.s8 %v4776_v48  ;;  %vm4794_vm9 = vcmp.eq.f32.partialorder %v2304_v13, 8.507059e+37  ;;  %vm4813_vm13 = vmor %vm2285_vm1, %vm2286_vm7 }
 0x13d   :  { %v3682_v53 = vpop.eup %3681  ;;  %v2282_v60 = vsub.f32 1.0, %v2281_v47  ;;  %2579 = vmatpush.bf16.msra.mxu2 %v1779_v32  ;;  %v829_v30 = vcvt.s32.f32 %v317_v36  ;;  %v249_v27 = vunpack.c.2.s8 %v4783_v5  ;;  %v251_v61 = vunpack.c.3.s8 %v4783_v5  ;;  %v71_v36 = vld [vmem:[#allocation5 + $0x18] sm:$0xff] }
 0x13e   :  { %v3684_v50 = vpop.eup %3683  ;;  %v2253_v28 = vmul.f32 %v3678_v46, %v2252_v54  ;;  %v2266_v22 = vmul.f32 %v3682_v53, %v4748_v34  ;;  %vm2271_vm10 = vweird.f32 %v3682_v53  ;;  %v831_v1 = vcvt.s32.f32 %v319_v24  ;;  %v4834_v24 = vld [vmem:[#allocation5 + $0xa8] sm:$0xff] }
 0x13f   :  { %v2283_v51 = vmul.f32 %v3680_v20, %v2282_v60  ;;  %v2296_v52 = vmul.f32 %v3684_v50, %v4752_v14  ;;  %vm2301_vm12 = vweird.f32 %v3684_v50  ;;  %v1343_v18 = vmul.f32 %v4693_v59, %v829_v30  ;;  %vm4829_vm14 = vmor %vm2270_vm3, %vm2271_vm10 }
 0x140   :  { %v2254_v8 = vadd.f32 %v3678_v46, %v2253_v28  ;;  %v2267_v12 = vsub.f32 1.0, %v2266_v22  ;;  %v1345_v29 = vmul.f32 %v4693_v59, %v831_v1  ;;  %v729_v57 = vcvt.s32.f32 %v217_v21  ;;  %vm4843_vm15 = vmor %vm2300_vm5, %vm2301_vm12  ;;  %v97_v28 = vld [vmem:[#allocation5 + $0xe8] sm:$0xff] }
 0x141   :  { %v2284_v58 = vadd.f32 %v3680_v20, %v2283_v51  ;;  %v2297_v41 = vsub.f32 1.0, %v2296_v52  ;;  %v731_v63 = vcvt.s32.f32 %v219_v31  ;;  %v761_v13 = vcvt.s32.f32 %v249_v27 }
 0x142   :  { %v2258_v11 = vsel %vm4804_vm11, %v3678_v46, %v2254_v8  ;;  %v2268_v25 = vmul.f32 %v3682_v53, %v2267_v12  ;;  %v1795_v26 = vpack.c.bf16 %v1345_v29, %v1343_v18  ;;  %v1243_v47 = vmul.f32 %v4693_v59, %v729_v57 }
 0x143   :  { %v2263_v40 = vsel %vm4760_vm2, %v4754_v42, %v2258_v11  ;;  %v2288_v32 = vsel %vm4813_vm13, %v3680_v20, %v2284_v58  ;;  %v2298_v54 = vmul.f32 %v3684_v50, %v2297_v41  ;;  %v1245_v46 = vmul.f32 %v4693_v59, %v731_v63 }
 0x144   :  { %v2322_v21 = vmul.f32 %v2263_v40, %v4702_v45  ;;  %v2293_v42 = vsel %vm4768_vm4, %v4756_v16, %v2288_v32  ;;  %v2269_v2 = vadd.f32 %v3682_v53, %v2268_v25  ;;  %2592 = vmatpush.bf16.msra.mxu3 %v1795_v26  ;;  %v763_v20 = vcvt.s32.f32 %v251_v61 }
 0x145   :  { %v2324_v31 = vmul.f32 %v2293_v42, %v4705_v6  ;;  %v2299_v60 = vadd.f32 %v3684_v50, %v2298_v54  ;;  %v1745_v30 = vpack.c.bf16 %v1245_v46, %v1243_v47  ;;  %v1275_v45 = vmul.f32 %v4693_v59, %v761_v13  ;;  %v79_v42 = vld [vmem:[#allocation5 + $0x58] sm:$0xff] }
 0x146   :  { %v4849_v27 = vpack.c.bf16 %v2322_v21, %v2322_v21  ;;  %v2273_v16 = vsel %vm4829_vm14, %v3682_v53, %v2269_v2  ;;  %v1277_v23 = vmul.f32 %v4693_v59, %v763_v20  ;;  %v281_v14 = vunpack.c.2.s8 %v4834_v24 }
 0x147   :  { %v4855_v22 = vpack.c.bf16 %v2324_v31, %v2324_v31  ;;  %v2278_v6 = vsel %vm4787_vm8, %v4779_v17, %v2273_v16  ;;  %v2303_v61 = vsel %vm4843_vm15, %v3684_v50, %v2299_v60  ;;  %2554 = vmatpush.bf16.msra.mxu0 %v1745_v30  ;;  %v283_v1 = vunpack.c.3.s8 %v4834_v24 }
 0x148   :  { %2508 = vmatmul.bf16.vlgmr.msrb.gmra.mxu0 %v4849_v27  ;;  %v2323_v53 = vmul.f32 %v2278_v6, %v4716_v62  ;;  %v2308_v4 = vsel %vm4794_vm9, %v4781_v35, %v2303_v61  ;;  %v1761_v51 = vpack.c.bf16 %v1277_v23, %v1275_v45  ;;  %v793_v52 = vcvt.s32.f32 %v281_v14  ;;  %v4891_v23 = vld [vmem:[#allocation5 + $0x98] sm:$0xff] }
 0x149   :  { %2534 = vmatmul.bf16.vlgmr.msrb.gmra.mxu2 %v4855_v22  ;;  %v2325_v17 = vmul.f32 %v2308_v4, %v4718_v3  ;;  %v795_v49 = vcvt.s32.f32 %v283_v1  ;;  %v313_v18 = vunpack.c.2.s8 %v97_v28  ;;  %v315_v50 = vunpack.c.3.s8 %v97_v28 }
 0x14a   :  { %v4870_v8 = vpack.c.bf16 %v2323_v53, %v2323_v53  ;;  %2567 = vmatpush.bf16.msra.mxu1 %v1761_v51  ;;  %v1307_v37 = vmul.f32 %v4693_v59, %v793_v52  ;;  %v213_v62 = vunpack.c.0.s8 %v4776_v48  ;;  %v215_v12 = vunpack.c.1.s8 %v4776_v48 }
 0x14b   :  { %v4875_v44 = vpack.c.bf16 %v2325_v17, %v2325_v17  ;;  %v1309_v35 = vmul.f32 %v4693_v59, %v795_v49  ;;  %v825_v29 = vcvt.s32.f32 %v313_v18  ;;  %v827_v57 = vcvt.s32.f32 %v315_v50  ;;  %v95_v18 = vld [vmem:[#allocation5 + $0xd8] sm:$0xff] }
 0x14c   :  { %2521 = vmatmul.bf16.vlgmr.msrb.gmra.mxu1 %v4870_v8  ;;  %v725_v3 = vcvt.s32.f32 %v213_v62  ;;  %v727_v58 = vcvt.s32.f32 %v215_v12  ;;  %v245_v41 = vunpack.c.0.s8 %v4783_v5  ;;  %v247_v63 = vunpack.c.1.s8 %v4783_v5 }
 0x14d   :  { %2547 = vmatmul.bf16.vlgmr.msrb.gmra.mxu3 %v4875_v44  ;;  %v1777_v13 = vpack.c.bf16 %v1309_v35, %v1307_v37  ;;  %v1339_v11 = vmul.f32 %v4693_v59, %v825_v29  ;;  %v1341_v48 = vmul.f32 %v4693_v59, %v827_v57  ;;  %v277_v25 = vunpack.c.0.s8 %v4834_v24 }
 0x14e   :  { %v1239_v26 = vmul.f32 %v4693_v59, %v725_v3  ;;  %v1241_v47 = vmul.f32 %v4693_v59, %v727_v58  ;;  %v757_v40 = vcvt.s32.f32 %v245_v41  ;;  %v759_v32 = vcvt.s32.f32 %v247_v63 }
 0x14f   :  { %2580 = vmatpush.bf16.msra.mxu2 %v1777_v13  ;;  %v1793_v54 = vpack.c.bf16 %v1341_v48, %v1339_v11  ;;  %v279_v5 = vunpack.c.1.s8 %v4834_v24  ;;  %v789_v46 = vcvt.s32.f32 %v277_v25  ;;  %v309_v21 = vunpack.c.0.s8 %v97_v28 }
 0x150   :  { %v1743_v2 = vpack.c.bf16 %v1241_v47, %v1239_v26  ;;  %v1271_v34 = vmul.f32 %v4693_v59, %v757_v40  ;;  %v1273_v20 = vmul.f32 %v4693_v59, %v759_v32  ;;  %v311_v31 = vunpack.c.1.s8 %v97_v28 }
 0x151   :  { %2593 = vmatpush.bf16.msra.mxu3 %v1793_v54  ;;  %v791_v60 = vcvt.s32.f32 %v279_v5  ;;  %v1303_v30 = vmul.f32 %v4693_v59, %v789_v46  ;;  %v821_v45 = vcvt.s32.f32 %v309_v21  ;;  %v209_v16 = vunpack.c.2.s8 %v71_v36 }
 0x152   :  { %2555 = vmatpush.bf16.msra.mxu0 %v1743_v2  ;;  %v1759_v14 = vpack.c.bf16 %v1273_v20, %v1271_v34  ;;  %v823_v24 = vcvt.s32.f32 %v311_v31  ;;  %v211_v6 = vunpack.c.3.s8 %v71_v36  ;;  %v241_v61 = vunpack.c.2.s8 %v79_v42 }
 0x153   :  { %v1305_v1 = vmul.f32 %v4693_v59, %v791_v60  ;;  %v1335_v53 = vmul.f32 %v4693_v59, %v821_v45  ;;  %v721_v4 = vcvt.s32.f32 %v209_v16  ;;  %v243_v51 = vunpack.c.3.s8 %v79_v42 }
 0x154   :  { %2568 = vmatpush.bf16.msra.mxu1 %v1759_v14  ;;  %v1337_v28 = vmul.f32 %v4693_v59, %v823_v24  ;;  %v723_v52 = vcvt.s32.f32 %v211_v6  ;;  %v753_v17 = vcvt.s32.f32 %v241_v61  ;;  %v273_v49 = vunpack.c.2.s8 %v4891_v23  ;;  %v69_v14 = vld [vmem:[#allocation5 + $0x8] sm:$0xff] }
 0x155   :  { %v1775_v50 = vpack.c.bf16 %v1305_v1, %v1303_v30  ;;  %v1235_v37 = vmul.f32 %v4693_v59, %v721_v4  ;;  %v755_v62 = vcvt.s32.f32 %v243_v51  ;;  %v275_v12 = vunpack.c.3.s8 %v4891_v23  ;;  %v77_v1 = vld [vmem:[#allocation5 + $0x48] sm:$0xff] }
 0x156   :  { %v1791_v35 = vpack.c.bf16 %v1337_v28, %v1335_v53  ;;  %v1237_v29 = vmul.f32 %v4693_v59, %v723_v52  ;;  %v1267_v57 = vmul.f32 %v4693_v59, %v753_v17  ;;  %v785_v3 = vcvt.s32.f32 %v273_v49 }
 0x157   :  { %2581 = vmatpush.bf16.msra.mxu2 %v1775_v50  ;;  %v1269_v58 = vmul.f32 %v4693_v59, %v755_v62  ;;  %v787_v41 = vcvt.s32.f32 %v275_v12  ;;  %v305_v63 = vunpack.c.2.s8 %v95_v18  ;;  %v307_v13 = vunpack.c.3.s8 %v95_v18 }
 0x158   :  { %2594 = vmatpush.bf16.msra.mxu3 %v1791_v35  ;;  %v1741_v11 = vpack.c.bf16 %v1237_v29, %v1235_v37  ;;  %v1299_v48 = vmul.f32 %v4693_v59, %v785_v3  ;;  %v205_v25 = vunpack.c.0.s8 %v71_v36  ;;  %v207_v26 = vunpack.c.1.s8 %v71_v36  ;;  %v4913_v37 = vld [vmem:[#allocation5 + $0x88] sm:$0xff] }
 0x159   :  { %v1757_v47 = vpack.c.bf16 %v1269_v58, %v1267_v57  ;;  %v1301_v40 = vmul.f32 %v4693_v59, %v787_v41  ;;  %v817_v32 = vcvt.s32.f32 %v305_v63  ;;  %v819_v54 = vcvt.s32.f32 %v307_v13 }
 0x15a   :  { %2556 = vmatpush.bf16.msra.mxu0 %v1741_v11  ;;  %v717_v5 = vcvt.s32.f32 %v205_v25  ;;  %v719_v46 = vcvt.s32.f32 %v207_v26  ;;  %v237_v21 = vunpack.c.0.s8 %v79_v42  ;;  %v239_v2 = vunpack.c.1.s8 %v79_v42  ;;  %v4919_v11 = vld [vmem:[#allocation5 + $0xc8] sm:$0xff] }
 0x15b   :  { %2569 = vmatpush.bf16.msra.mxu1 %v1757_v47  ;;  %v1773_v34 = vpack.c.bf16 %v1301_v40, %v1299_v48  ;;  %v1331_v20 = vmul.f32 %v4693_v59, %v817_v32  ;;  %v1333_v31 = vmul.f32 %v4693_v59, %v819_v54  ;;  %v269_v60 = vunpack.c.0.s8 %v4891_v23 }
 0x15c   :  { %v1231_v36 = vmul.f32 %v4693_v59, %v717_v5  ;;  %v1233_v30 = vmul.f32 %v4693_v59, %v719_v46  ;;  %v749_v45 = vcvt.s32.f32 %v237_v21  ;;  %v751_v16 = vcvt.s32.f32 %v239_v2 }
 0x15d   :  { %2582 = vmatpush.bf16.msra.mxu2 %v1773_v34  ;;  %v1789_v24 = vpack.c.bf16 %v1333_v31, %v1331_v20  ;;  %v271_v6 = vunpack.c.1.s8 %v4891_v23  ;;  %v781_v42 = vcvt.s32.f32 %v269_v60  ;;  %v301_v61 = vunpack.c.0.s8 %v95_v18 }
 0x15e   :  { %v1739_v53 = vpack.c.bf16 %v1233_v30, %v1231_v36  ;;  %v1263_v4 = vmul.f32 %v4693_v59, %v749_v45  ;;  %v1265_v51 = vmul.f32 %v4693_v59, %v751_v16  ;;  %v303_v28 = vunpack.c.1.s8 %v95_v18 }
 0x15f   :  { %2595 = vmatpush.bf16.msra.mxu3 %v1789_v24  ;;  %v783_v52 = vcvt.s32.f32 %v271_v6  ;;  %v1295_v17 = vmul.f32 %v4693_v59, %v781_v42  ;;  %v813_v49 = vcvt.s32.f32 %v301_v61  ;;  %v201_v50 = vunpack.c.2.s8 %v69_v14 }
 0x160   :  { %2557 = vmatpush.bf16.msra.mxu0 %v1739_v53  ;;  %v1755_v62 = vpack.c.bf16 %v1265_v51, %v1263_v4  ;;  %v815_v23 = vcvt.s32.f32 %v303_v28  ;;  %v203_v12 = vunpack.c.3.s8 %v69_v14  ;;  %v233_v35 = vunpack.c.2.s8 %v77_v1  ;;  %v4930_v4 = vld [vmem:[#allocation5 + $0x138] sm:$0xff] }
 0x161   :  { %v1297_v29 = vmul.f32 %v4693_v59, %v783_v52  ;;  %v1327_v57 = vmul.f32 %v4693_v59, %v813_v49  ;;  %v713_v3 = vcvt.s32.f32 %v201_v50  ;;  %v235_v58 = vunpack.c.3.s8 %v77_v1 }
 0x162   :  { %2570 = vmatpush.bf16.msra.mxu1 %v1755_v62  ;;  %v1329_v18 = vmul.f32 %v4693_v59, %v815_v23  ;;  %v715_v41 = vcvt.s32.f32 %v203_v12  ;;  %v745_v63 = vcvt.s32.f32 %v233_v35  ;;  %v265_v13 = vunpack.c.2.s8 %v4913_v37  ;;  %v4937_v23 = vld [vmem:[#allocation5 + $0x178] sm:$0xff] }
 0x163   :  { %v1771_v48 = vpack.c.bf16 %v1297_v29, %v1295_v17  ;;  %v1227_v25 = vmul.f32 %v4693_v59, %v713_v3  ;;  %v747_v26 = vcvt.s32.f32 %v235_v58  ;;  %v267_v47 = vunpack.c.3.s8 %v4913_v37 }
 0x164   :  { %v1787_v40 = vpack.c.bf16 %v1329_v18, %v1327_v57  ;;  %v1229_v32 = vmul.f32 %v4693_v59, %v715_v41  ;;  %v1259_v54 = vmul.f32 %v4693_v59, %v745_v63  ;;  %v777_v5 = vcvt.s32.f32 %v265_v13  ;;  %v4941_v57 = vld [vmem:[#allocation5 + $0x1b8] sm:$0xff] }
 0x165   :  { %2583 = vmatpush.bf16.msra.mxu2 %v1771_v48  ;;  %v1261_v46 = vmul.f32 %v4693_v59, %v747_v26  ;;  %v779_v21 = vcvt.s32.f32 %v267_v47  ;;  %v297_v2 = vunpack.c.2.s8 %v4919_v11  ;;  %v299_v34 = vunpack.c.3.s8 %v4919_v11 }
 0x166   :  { %2596 = vmatpush.bf16.msra.mxu3 %v1787_v40  ;;  %v1737_v20 = vpack.c.bf16 %v1229_v32, %v1227_v25  ;;  %v1291_v31 = vmul.f32 %v4693_v59, %v777_v5  ;;  %v197_v60 = vunpack.c.0.s8 %v69_v14  ;;  %v199_v36 = vunpack.c.1.s8 %v69_v14 }
 0x167   :  { %v1753_v30 = vpack.c.bf16 %v1261_v46, %v1259_v54  ;;  %v1293_v45 = vmul.f32 %v4693_v59, %v779_v21  ;;  %v809_v16 = vcvt.s32.f32 %v297_v2  ;;  %v811_v24 = vcvt.s32.f32 %v299_v34 }
 0x168   :  { %2558 = vmatpush.bf16.msra.mxu0 %v1737_v20  ;;  %v709_v6 = vcvt.s32.f32 %v197_v60  ;;  %v711_v42 = vcvt.s32.f32 %v199_v36  ;;  %v229_v61 = vunpack.c.0.s8 %v77_v1  ;;  %v231_v53 = vunpack.c.1.s8 %v77_v1 }
 0x169   :  { %2571 = vmatpush.bf16.msra.mxu1 %v1753_v30  ;;  %v1769_v51 = vpack.c.bf16 %v1293_v45, %v1291_v31  ;;  %v1323_v28 = vmul.f32 %v4693_v59, %v809_v16  ;;  %v1325_v52 = vmul.f32 %v4693_v59, %v811_v24  ;;  %v261_v14 = vunpack.c.0.s8 %v4913_v37  ;;  %v131_v31 = vld [vmem:[#allocation5 + $0x1f8] sm:$0xff] }
 0x16a   :  { %v1223_v17 = vmul.f32 %v4693_v59, %v709_v6  ;;  %v1225_v49 = vmul.f32 %v4693_v59, %v711_v42  ;;  %v741_v50 = vcvt.s32.f32 %v229_v61  ;;  %v743_v62 = vcvt.s32.f32 %v231_v53 }
 0x16b   :  { %2584 = vmatpush.bf16.msra.mxu2 %v1769_v51  ;;  %v1785_v1 = vpack.c.bf16 %v1325_v52, %v1323_v28  ;;  %v263_v12 = vunpack.c.1.s8 %v4913_v37  ;;  %v773_v35 = vcvt.s32.f32 %v261_v14  ;;  %v353_v29 = vunpack.c.2.s8 %v4930_v4 }
 0x16c   :  { %v1735_v3 = vpack.c.bf16 %v1225_v49, %v1223_v17  ;;  %v1255_v58 = vmul.f32 %v4693_v59, %v741_v50  ;;  %v1257_v18 = vmul.f32 %v4693_v59, %v743_v62  ;;  %v355_v41 = vunpack.c.3.s8 %v4930_v4 }
 0x16d   :  { %2597 = vmatpush.bf16.msra.mxu3 %v1785_v1  ;;  %v775_v63 = vcvt.s32.f32 %v263_v12  ;;  %v1287_v13 = vmul.f32 %v4693_v59, %v773_v35  ;;  %v865_v48 = vcvt.s32.f32 %v353_v29  ;;  %v385_v25 = vunpack.c.2.s8 %v4937_v23 }
 0x16e   :  { %2559 = vmatpush.bf16.msra.mxu0 %v1735_v3  ;;  %v1751_v37 = vpack.c.bf16 %v1257_v18, %v1255_v58  ;;  %v867_v26 = vcvt.s32.f32 %v355_v41  ;;  %v387_v47 = vunpack.c.3.s8 %v4937_v23  ;;  %v417_v40 = vunpack.c.2.s8 %v4941_v57 }
 0x16f   :  { %v1289_v32 = vmul.f32 %v4693_v59, %v775_v63  ;;  %v1379_v54 = vmul.f32 %v4693_v59, %v865_v48  ;;  %v897_v5 = vcvt.s32.f32 %v385_v25  ;;  %v419_v46 = vunpack.c.3.s8 %v4941_v57  ;;  %v105_v48 = vld [vmem:[#allocation5 + $0x128] sm:$0xff] }
 0x170   :  { %2572 = vmatpush.bf16.msra.mxu1 %v1751_v37  ;;  %v1381_v21 = vmul.f32 %v4693_v59, %v867_v26  ;;  %v899_v2 = vcvt.s32.f32 %v387_v47  ;;  %v929_v34 = vcvt.s32.f32 %v417_v40  ;;  %v293_v20 = vunpack.c.0.s8 %v4919_v11  ;;  %v113_v26 = vld [vmem:[#allocation5 + $0x168] sm:$0xff] }
 0x171   :  { %v1767_v60 = vpack.c.bf16 %v1289_v32, %v1287_v13  ;;  %v1411_v36 = vmul.f32 %v4693_v59, %v897_v5  ;;  %v931_v30 = vcvt.s32.f32 %v419_v46  ;;  %v295_v45 = vunpack.c.1.s8 %v4919_v11  ;;  %2560 = vmatmul.bf16.vlgmr.msra.gmra.mxu0 %v4146_v15 }
 0x172   :  { %v1813_v16 = vpack.c.bf16 %v1381_v21, %v1379_v54  ;;  %v1413_v24 = vmul.f32 %v4693_v59, %v899_v2  ;;  %v1443_v6 = vmul.f32 %v4693_v59, %v929_v34  ;;  %v805_v42 = vcvt.s32.f32 %v293_v20  ;;  %v4978_v34 = vld [vmem:[#allocation5 + $0x1a8] sm:$0xff] }
 0x173   :  { %2585 = vmatpush.bf16.msra.mxu2 %v1767_v60  ;;  %v1445_v61 = vmul.f32 %v4693_v59, %v931_v30  ;;  %v807_v53 = vcvt.s32.f32 %v295_v45  ;;  %v449_v51 = vunpack.c.2.s8 %v131_v31  ;;  %v451_v28 = vunpack.c.3.s8 %v131_v31  ;;  %2573 = vmatmul.bf16.vlgmr.msra.gmra.mxu1 %v4176_v56 }
 0x174   :  { %2604 = vmatpush.bf16.msrb.mxu0 %v1813_v16  ;;  %v1829_v52 = vpack.c.bf16 %v1413_v24, %v1411_v36  ;;  %v1319_v11 = vmul.f32 %v4693_v59, %v805_v42  ;;  %v349_v15 = vunpack.c.0.s8 %v4930_v4  ;;  %v351_v14 = vunpack.c.1.s8 %v4930_v4 }
 0x175   :  { %v1845_v17 = vpack.c.bf16 %v1445_v61, %v1443_v6  ;;  %v1321_v49 = vmul.f32 %v4693_v59, %v807_v53  ;;  %v961_v50 = vcvt.s32.f32 %v449_v51  ;;  %v963_v62 = vcvt.s32.f32 %v451_v28  ;;  %v129_v53 = vld [vmem:[#allocation5 + $0x1e8] sm:$0xff] }
 0x176   :  { %2617 = vmatpush.bf16.msrb.mxu1 %v1829_v52  ;;  %v861_v1 = vcvt.s32.f32 %v349_v15  ;;  %v863_v12 = vcvt.s32.f32 %v351_v14  ;;  %v381_v35 = vunpack.c.0.s8 %v4937_v23  ;;  %v383_v56 = vunpack.c.1.s8 %v4937_v23  ;;  %2586 = vmatmul.bf16.vlgmr.msra.gmra.mxu2 %v4114_v9 }
 0x177   :  { %2630 = vmatpush.bf16.msrb.mxu2 %v1845_v17  ;;  %v1783_v29 = vpack.c.bf16 %v1321_v49, %v1319_v11  ;;  %v1475_v3 = vmul.f32 %v4693_v59, %v961_v50  ;;  %v1477_v4 = vmul.f32 %v4693_v59, %v963_v62  ;;  %v413_v58 = vunpack.c.0.s8 %v4941_v57 }
 0x178   :  { %v1375_v18 = vmul.f32 %v4693_v59, %v861_v1  ;;  %v1377_v41 = vmul.f32 %v4693_v59, %v863_v12  ;;  %v893_v63 = vcvt.s32.f32 %v381_v35  ;;  %v895_v13 = vcvt.s32.f32 %v383_v56 }
 0x179   :  { %2598 = vmatpush.bf16.msra.mxu3 %v1783_v29  ;;  %v1861_v25 = vpack.c.bf16 %v1477_v4, %v1475_v3  ;;  %v415_v23 = vunpack.c.1.s8 %v4941_v57  ;;  %v925_v9 = vcvt.s32.f32 %v413_v58  ;;  %v445_v37 = vunpack.c.0.s8 %v131_v31 }
 0x17a   :  { %v1811_v47 = vpack.c.bf16 %v1377_v41, %v1375_v18  ;;  %v1407_v40 = vmul.f32 %v4693_v59, %v893_v63  ;;  %v1409_v32 = vmul.f32 %v4693_v59, %v895_v13  ;;  %v447_v54 = vunpack.c.1.s8 %v131_v31 }
 0x17b   :  { %v927_v5 = vcvt.s32.f32 %v415_v23  ;;  %v1439_v46 = vmul.f32 %v4693_v59, %v925_v9  ;;  %v957_v21 = vcvt.s32.f32 %v445_v37  ;;  %v345_v2 = vunpack.c.2.s8 %v105_v48 }
 0x17c   :  { %2605 = vmatpush.bf16.msrb.mxu0 %v1811_v47  ;;  %v1827_v20 = vpack.c.bf16 %v1409_v32, %v1407_v40  ;;  %v959_v57 = vcvt.s32.f32 %v447_v54  ;;  %v347_v60 = vunpack.c.3.s8 %v105_v48  ;;  %v377_v36 = vunpack.c.2.s8 %v113_v26  ;;  %2599 = vmatmul.bf16.vlgmr.msra.gmra.mxu3 %v4162_v43 }
 0x17d   :  { %2643 = vmatpush.bf16.msrb.mxu3 %v1861_v25  ;;  %v1441_v30 = vmul.f32 %v4693_v59, %v927_v5  ;;  %v1471_v45 = vmul.f32 %v4693_v59, %v957_v21  ;;  %v857_v31 = vcvt.s32.f32 %v345_v2  ;;  %v379_v16 = vunpack.c.3.s8 %v113_v26  ;;  %v103_v5 = vld [vmem:[#allocation5 + $0x118] sm:$0xff] }
 0x17e   :  { %2618 = vmatpush.bf16.msrb.mxu1 %v1827_v20  ;;  %v1473_v24 = vmul.f32 %v4693_v59, %v959_v57  ;;  %v859_v6 = vcvt.s32.f32 %v347_v60  ;;  %v889_v42 = vcvt.s32.f32 %v377_v36  ;;  %v409_v61 = vunpack.c.2.s8 %v4978_v34  ;;  %v111_v20 = vld [vmem:[#allocation5 + $0x158] sm:$0xff] }
 0x17f   :  { %v1843_v51 = vpack.c.bf16 %v1441_v30, %v1439_v46  ;;  %v1371_v28 = vmul.f32 %v4693_v59, %v857_v31  ;;  %v891_v52 = vcvt.s32.f32 %v379_v16  ;;  %v411_v43 = vunpack.c.3.s8 %v4978_v34 }
 0x180   :  { %v1859_v11 = vpack.c.bf16 %v1473_v24, %v1471_v45  ;;  %v1373_v15 = vmul.f32 %v4693_v59, %v859_v6  ;;  %v1403_v14 = vmul.f32 %v4693_v59, %v889_v42  ;;  %v921_v17 = vcvt.s32.f32 %v409_v61  ;;  %v5001_v6 = vld [vmem:[#allocation5 + $0x198] sm:$0xff] }
 0x181   :  { %2631 = vmatpush.bf16.msrb.mxu2 %v1843_v51  ;;  %v1405_v49 = vmul.f32 %v4693_v59, %v891_v52  ;;  %v923_v50 = vcvt.s32.f32 %v411_v43  ;;  %v441_v62 = vunpack.c.2.s8 %v129_v53  ;;  %v443_v1 = vunpack.c.3.s8 %v129_v53 }
 0x182   :  { %2644 = vmatpush.bf16.msrb.mxu3 %v1859_v11  ;;  %v1809_v12 = vpack.c.bf16 %v1373_v15, %v1371_v28  ;;  %v1435_v35 = vmul.f32 %v4693_v59, %v921_v17  ;;  %v341_v56 = vunpack.c.0.s8 %v105_v48  ;;  %v343_v29 = vunpack.c.1.s8 %v105_v48 }
 0x183   :  { %v1825_v3 = vpack.c.bf16 %v1405_v49, %v1403_v14  ;;  %v1437_v4 = vmul.f32 %v4693_v59, %v923_v50  ;;  %v953_v58 = vcvt.s32.f32 %v441_v62  ;;  %v955_v18 = vcvt.s32.f32 %v443_v1  ;;  %v127_v49 = vld [vmem:[#allocation5 + $0x1d8] sm:$0xff] }
 0x184   :  { %2606 = vmatpush.bf16.msrb.mxu0 %v1809_v12  ;;  %v853_v41 = vcvt.s32.f32 %v341_v56  ;;  %v855_v63 = vcvt.s32.f32 %v343_v29  ;;  %v373_v13 = vunpack.c.0.s8 %v113_v26  ;;  %v375_v25 = vunpack.c.1.s8 %v113_v26 }
 0x185   :  { %2619 = vmatpush.bf16.msrb.mxu1 %v1825_v3  ;;  %v1841_v23 = vpack.c.bf16 %v1437_v4, %v1435_v35  ;;  %v1467_v9 = vmul.f32 %v4693_v59, %v953_v58  ;;  %v1469_v37 = vmul.f32 %v4693_v59, %v955_v18  ;;  %v405_v47 = vunpack.c.0.s8 %v4978_v34 }
 0x186   :  { %v1367_v48 = vmul.f32 %v4693_v59, %v853_v41  ;;  %v1369_v40 = vmul.f32 %v4693_v59, %v855_v63  ;;  %v885_v32 = vcvt.s32.f32 %v373_v13  ;;  %v887_v54 = vcvt.s32.f32 %v375_v25  ;;  %v5012_v63 = vpop.f32.mrf.mxu0 }
 0x187   :  { %2632 = vmatpush.bf16.msrb.mxu2 %v1841_v23  ;;  %v1857_v46 = vpack.c.bf16 %v1469_v37, %v1467_v9  ;;  %v407_v21 = vunpack.c.1.s8 %v4978_v34  ;;  %v917_v26 = vcvt.s32.f32 %v405_v47  ;;  %v437_v2 = vunpack.c.0.s8 %v129_v53 }
 0x188   :  { %v1807_v57 = vpack.c.bf16 %v1369_v40, %v1367_v48  ;;  %v1399_v60 = vmul.f32 %v4693_v59, %v885_v32  ;;  %v1401_v36 = vmul.f32 %v4693_v59, %v887_v54  ;;  %v439_v30 = vunpack.c.1.s8 %v129_v53 }
 0x189   :  { %2645 = vmatpush.bf16.msrb.mxu3 %v1857_v46  ;;  %v919_v45 = vcvt.s32.f32 %v407_v21  ;;  %v1431_v31 = vmul.f32 %v4693_v59, %v917_v26  ;;  %v949_v16 = vcvt.s32.f32 %v437_v2  ;;  %v337_v24 = vunpack.c.2.s8 %v103_v5 }
 0x18a   :  { %2607 = vmatpush.bf16.msrb.mxu0 %v1807_v57  ;;  %v1823_v42 = vpack.c.bf16 %v1401_v36, %v1399_v60  ;;  %v951_v34 = vcvt.s32.f32 %v439_v30  ;;  %v339_v61 = vunpack.c.3.s8 %v103_v5  ;;  %v369_v51 = vunpack.c.2.s8 %v111_v20 }
 0x18b   :  { %v1433_v28 = vmul.f32 %v4693_v59, %v919_v45  ;;  %v1463_v52 = vmul.f32 %v4693_v59, %v949_v16  ;;  %v849_v43 = vcvt.s32.f32 %v337_v24  ;;  %v371_v11 = vunpack.c.3.s8 %v111_v20  ;;  %v5021_v16 = vpop.f32.mrf.mxu1 }
 0x18c   :  { %2620 = vmatpush.bf16.msrb.mxu1 %v1823_v42  ;;  %v1465_v53 = vmul.f32 %v4693_v59, %v951_v34  ;;  %v851_v15 = vcvt.s32.f32 %v339_v61  ;;  %v881_v14 = vcvt.s32.f32 %v369_v51  ;;  %v401_v17 = vunpack.c.2.s8 %v5001_v6  ;;  %v5024_v61 = vld [vmem:[#allocation5 + $0x148] sm:$0xff] }
 0x18d   :  { %v1839_v50 = vpack.c.bf16 %v1433_v28, %v1431_v31  ;;  %v1363_v62 = vmul.f32 %v4693_v59, %v849_v43  ;;  %v883_v1 = vcvt.s32.f32 %v371_v11  ;;  %v403_v12 = vunpack.c.3.s8 %v5001_v6  ;;  %v101_v31 = vld [vmem:[#allocation5 + $0x108] sm:$0xff] }
 0x18e   :  { %v1855_v35 = vpack.c.bf16 %v1465_v53, %v1463_v52  ;;  %v1365_v56 = vmul.f32 %v4693_v59, %v851_v15  ;;  %v1395_v29 = vmul.f32 %v4693_v59, %v881_v14  ;;  %v913_v3 = vcvt.s32.f32 %v401_v17  ;;  %v5029_v17 = vld [vmem:[#allocation5 + $0x188] sm:$0xff] }
 0x18f   :  { %2633 = vmatpush.bf16.msrb.mxu2 %v1839_v50  ;;  %v1397_v4 = vmul.f32 %v4693_v59, %v883_v1  ;;  %v915_v58 = vcvt.s32.f32 %v403_v12  ;;  %v433_v18 = vunpack.c.2.s8 %v127_v49  ;;  %v435_v41 = vunpack.c.3.s8 %v127_v49  ;;  %v2355_v50 = vpop.f32.mrf.mxu0 }
 0x190   :  { %2646 = vmatpush.bf16.msrb.mxu3 %v1855_v35  ;;  %v1805_v13 = vpack.c.bf16 %v1365_v56, %v1363_v62  ;;  %v1427_v25 = vmul.f32 %v4693_v59, %v913_v3  ;;  %v333_v23 = vunpack.c.0.s8 %v103_v5  ;;  %v335_v9 = vunpack.c.1.s8 %v103_v5  ;;  %v5035_v3 = vpop.f32.mrf.mxu2 }
 0x191   :  { %v1821_v37 = vpack.c.bf16 %v1397_v4, %v1395_v29  ;;  %v1429_v47 = vmul.f32 %v4693_v59, %v915_v58  ;;  %v945_v48 = vcvt.s32.f32 %v433_v18  ;;  %v947_v40 = vcvt.s32.f32 %v435_v41 }
 0x192   :  { %2608 = vmatpush.bf16.msrb.mxu0 %v1805_v13  ;;  %v845_v32 = vcvt.s32.f32 %v333_v23  ;;  %v847_v54 = vcvt.s32.f32 %v335_v9  ;;  %v365_v46 = vunpack.c.0.s8 %v111_v20  ;;  %v367_v21 = vunpack.c.1.s8 %v111_v20  ;;  %v5039_v13 = vld [vmem:[#allocation5 + $0x1c8] sm:$0xff] }
 0x193   :  { %2621 = vmatpush.bf16.msrb.mxu1 %v1821_v37  ;;  %v1837_v26 = vpack.c.bf16 %v1429_v47, %v1427_v25  ;;  %v1459_v2 = vmul.f32 %v4693_v59, %v945_v48  ;;  %v1461_v57 = vmul.f32 %v4693_v59, %v947_v40  ;;  %v397_v60 = vunpack.c.0.s8 %v5001_v6 }
 0x194   :  { %v1359_v5 = vmul.f32 %v4693_v59, %v845_v32  ;;  %v1361_v36 = vmul.f32 %v4693_v59, %v847_v54  ;;  %v877_v30 = vcvt.s32.f32 %v365_v46  ;;  %v879_v45 = vcvt.s32.f32 %v367_v21  ;;  %v5045_v54 = vpop.f32.mrf.mxu3  ;;  %v2368_v46 = vpop.f32.mrf.mxu1 }
 0x195   :  { %2634 = vmatpush.bf16.msrb.mxu2 %v1837_v26  ;;  %v1853_v24 = vpack.c.bf16 %v1461_v57, %v1459_v2  ;;  %v399_v20 = vunpack.c.1.s8 %v5001_v6  ;;  %v909_v42 = vcvt.s32.f32 %v397_v60  ;;  %v429_v34 = vunpack.c.0.s8 %v127_v49 }
 0x196   :  { %v1803_v51 = vpack.c.bf16 %v1361_v36, %v1359_v5  ;;  %v1391_v28 = vmul.f32 %v4693_v59, %v877_v30  ;;  %v1393_v52 = vmul.f32 %v4693_v59, %v879_v45  ;;  %v431_v43 = vunpack.c.1.s8 %v127_v49 }
 0x197   :  { %2647 = vmatpush.bf16.msrb.mxu3 %v1853_v24  ;;  %v911_v11 = vcvt.s32.f32 %v399_v20  ;;  %v1423_v53 = vmul.f32 %v4693_v59, %v909_v42  ;;  %v941_v15 = vcvt.s32.f32 %v429_v34  ;;  %v329_v14 = vunpack.c.2.s8 %v101_v31 }
 0x198   :  { %2609 = vmatpush.bf16.msrb.mxu0 %v1803_v51  ;;  %v1819_v6 = vpack.c.bf16 %v1393_v52, %v1391_v28  ;;  %v943_v62 = vcvt.s32.f32 %v431_v43  ;;  %v331_v1 = vunpack.c.3.s8 %v101_v31  ;;  %v361_v12 = vunpack.c.2.s8 %v5024_v61  ;;  %v5054_v43 = vld [vmem:[#allocation5 + $0x238] sm:$0xff] }
 0x199   :  { %v1425_v35 = vmul.f32 %v4693_v59, %v911_v11  ;;  %v1455_v56 = vmul.f32 %v4693_v59, %v941_v15  ;;  %v841_v49 = vcvt.s32.f32 %v329_v14  ;;  %v363_v29 = vunpack.c.3.s8 %v5024_v61  ;;  %v2381_v14 = vpop.f32.mrf.mxu2 }
 0x19a   :  { %2622 = vmatpush.bf16.msrb.mxu1 %v1819_v6  ;;  %v1457_v4 = vmul.f32 %v4693_v59, %v943_v62  ;;  %v843_v58 = vcvt.s32.f32 %v331_v1  ;;  %v873_v18 = vcvt.s32.f32 %v361_v12  ;;  %v393_v41 = vunpack.c.2.s8 %v5029_v17  ;;  %v5061_v12 = vld [vmem:[#allocation5 + $0x278] sm:$0xff] }
 0x19b   :  { %v1835_v25 = vpack.c.bf16 %v1425_v35, %v1423_v53  ;;  %v1355_v23 = vmul.f32 %v4693_v59, %v841_v49  ;;  %v875_v9 = vcvt.s32.f32 %v363_v29  ;;  %v395_v37 = vunpack.c.3.s8 %v5029_v17  ;;  %v5065_v29 = vld [vmem:[#allocation5 + $0x2b8] sm:$0xff] }
 0x19c   :  { %v1851_v47 = vpack.c.bf16 %v1457_v4, %v1455_v56  ;;  %v1357_v48 = vmul.f32 %v4693_v59, %v843_v58  ;;  %v1387_v40 = vmul.f32 %v4693_v59, %v873_v18  ;;  %v905_v32 = vcvt.s32.f32 %v393_v41 }
 0x19d   :  { %2635 = vmatpush.bf16.msrb.mxu2 %v1835_v25  ;;  %v1389_v21 = vmul.f32 %v4693_v59, %v875_v9  ;;  %v907_v26 = vcvt.s32.f32 %v395_v37  ;;  %v425_v2 = vunpack.c.2.s8 %v5039_v13  ;;  %v427_v57 = vunpack.c.3.s8 %v5039_v13  ;;  %v2394_v25 = vpop.f32.mrf.mxu3 }
 0x19e   :  { %2648 = vmatpush.bf16.msrb.mxu3 %v1851_v47  ;;  %v1801_v60 = vpack.c.bf16 %v1357_v48, %v1355_v23  ;;  %v1419_v5 = vmul.f32 %v4693_v59, %v905_v32  ;;  %v325_v36 = vunpack.c.0.s8 %v101_v31  ;;  %v327_v30 = vunpack.c.1.s8 %v101_v31 }
 0x19f   :  { %v1817_v45 = vpack.c.bf16 %v1389_v21, %v1387_v40  ;;  %v1421_v24 = vmul.f32 %v4693_v59, %v907_v26  ;;  %v937_v20 = vcvt.s32.f32 %v425_v2  ;;  %v939_v42 = vcvt.s32.f32 %v427_v57 }
 0x1a0   :  { %2610 = vmatpush.bf16.msrb.mxu0 %v1801_v60  ;;  %v837_v34 = vcvt.s32.f32 %v325_v36  ;;  %v839_v51 = vcvt.s32.f32 %v327_v30  ;;  %v357_v28 = vunpack.c.0.s8 %v5024_v61  ;;  %v359_v52 = vunpack.c.1.s8 %v5024_v61  ;;  %v3701_v36 = vld [vmem:[%s5518_s4] sm:$0xff] }
 0x1a1   :  { %2623 = vmatpush.bf16.msrb.mxu1 %v1817_v45  ;;  %v1833_v11 = vpack.c.bf16 %v1421_v24, %v1419_v5  ;;  %v1451_v53 = vmul.f32 %v4693_v59, %v937_v20  ;;  %v1453_v31 = vmul.f32 %v4693_v59, %v939_v42  ;;  %v389_v15 = vunpack.c.0.s8 %v5029_v17  ;;  %v5081_v45 = vld [vmem:[#allocation5 + $0x2f8] sm:$0xff] }
 0x1a2   :  { %v1351_v50 = vmul.f32 %v4693_v59, %v837_v34  ;;  %v1353_v6 = vmul.f32 %v4693_v59, %v839_v51  ;;  %v869_v62 = vcvt.s32.f32 %v357_v28  ;;  %v871_v1 = vcvt.s32.f32 %v359_v52 }
 0x1a3   :  { %2636 = vmatpush.bf16.msrb.mxu2 %v1833_v11  ;;  %v1849_v61 = vpack.c.bf16 %v1453_v31, %v1451_v53  ;;  %v391_v35 = vunpack.c.1.s8 %v5029_v17  ;;  %v901_v56 = vcvt.s32.f32 %v389_v15  ;;  %v481_v49 = vunpack.c.2.s8 %v5054_v43 }
 0x1a4   :  { %v1799_v4 = vpack.c.bf16 %v1353_v6, %v1351_v50  ;;  %v1383_v58 = vmul.f32 %v4693_v59, %v869_v62  ;;  %v1385_v18 = vmul.f32 %v4693_v59, %v871_v1  ;;  %v483_v41 = vunpack.c.3.s8 %v5054_v43 }
 0x1a5   :  { %2649 = vmatpush.bf16.msrb.mxu3 %v1849_v61  ;;  %v903_v23 = vcvt.s32.f32 %v391_v35  ;;  %v1415_v9 = vmul.f32 %v4693_v59, %v901_v56  ;;  %v993_v37 = vcvt.s32.f32 %v481_v49  ;;  %v513_v17 = vunpack.c.2.s8 %v5061_v12 }
 0x1a6   :  { %2611 = vmatpush.bf16.msrb.mxu0 %v1799_v4  ;;  %v1815_v47 = vpack.c.bf16 %v1385_v18, %v1383_v58  ;;  %v995_v48 = vcvt.s32.f32 %v483_v41  ;;  %v515_v40 = vunpack.c.3.s8 %v5061_v12  ;;  %v545_v32 = vunpack.c.2.s8 %v5065_v29  ;;  %v5104_v41 = vpop.f32.mrf.mxu0 }
 0x1a7   :  { %v1417_v46 = vmul.f32 %v4693_v59, %v903_v23  ;;  %v1507_v21 = vmul.f32 %v4693_v59, %v993_v37  ;;  %v1025_v26 = vcvt.s32.f32 %v513_v17  ;;  %v547_v2 = vunpack.c.3.s8 %v5065_v29 }
 0x1a8   :  { %2624 = vmatpush.bf16.msrb.mxu1 %v1815_v47  ;;  %v1509_v57 = vmul.f32 %v4693_v59, %v995_v48  ;;  %v1027_v60 = vcvt.s32.f32 %v515_v40  ;;  %v1057_v5 = vcvt.s32.f32 %v545_v32  ;;  %v2342_v30 = vperm.slane %v3701_v36, 6  ;;  %v5109_v48 = vld [vmem:[#allocation5 + $0x228] sm:$0xff]  ;;  %v5111_v40 = vpop.f32.mrf.mxu1 }
 0x1a9   :  { %v1831_v24 = vpack.c.bf16 %v1417_v46, %v1415_v9  ;;  %v1539_v20 = vmul.f32 %v4693_v59, %v1025_v26  ;;  %v1059_v42 = vcvt.s32.f32 %v547_v2  ;;  %v421_v34 = vunpack.c.0.s8 %v5039_v13  ;;  %2612 = vmatmul.bf16.vlgmr.msrb.gmra.mxu0 %v4358_v7 }
 0x1aa   :  { %v1877_v51 = vpack.c.bf16 %v1509_v57, %v1507_v21  ;;  %v1541_v28 = vmul.f32 %v4693_v59, %v1027_v60  ;;  %v1571_v52 = vmul.f32 %v4693_v59, %v1057_v5  ;;  %v2354_v11 = vadd.f32 %v5012_v63, %v2342_v30  ;;  %v145_v60 = vld [vmem:[#allocation5 + $0x268] sm:$0xff] }
 0x1ab   :  { %2637 = vmatpush.bf16.msrb.mxu2 %v1831_v24  ;;  %v1573_v53 = vmul.f32 %v4693_v59, %v1059_v42  ;;  %v423_v31 = vunpack.c.1.s8 %v5039_v13  ;;  %v933_v15 = vcvt.s32.f32 %v421_v34  ;;  %v577_v14 = vunpack.c.2.s8 %v5081_v45  ;;  %2625 = vmatmul.bf16.vlgmr.msrb.gmra.mxu1 %v4400_v0 }
 0x1ac   :  { %2656 = vmatpush.bf16.msra.mxu0 %v1877_v51  ;;  %v1893_v50 = vpack.c.bf16 %v1541_v28, %v1539_v20  ;;  %v579_v7 = vunpack.c.3.s8 %v5081_v45  ;;  %v2367_v6 = vadd.f32 %v5021_v16, %v2354_v11  ;;  %v477_v62 = vunpack.c.0.s8 %v5054_v43  ;;  %v5124_v20 = vld [vmem:[#allocation5 + $0x2a8] sm:$0xff] }
 0x1ad   :  { %v1909_v1 = vpack.c.bf16 %v1573_v53, %v1571_v52  ;;  %v935_v63 = vcvt.s32.f32 %v423_v31  ;;  %v1447_v61 = vmul.f32 %v4693_v59, %v933_v15  ;;  %v1089_v35 = vcvt.s32.f32 %v577_v14  ;;  %v5129_v53 = vld [vmem:[#allocation5 + $0x2e8] sm:$0xff] }
 0x1ae   :  { %2669 = vmatpush.bf16.msra.mxu1 %v1893_v50  ;;  %v1091_v13 = vcvt.s32.f32 %v579_v7  ;;  %v479_v56 = vunpack.c.1.s8 %v5054_v43  ;;  %v989_v49 = vcvt.s32.f32 %v477_v62  ;;  %v509_v0 = vunpack.c.0.s8 %v5061_v12  ;;  %2638 = vmatmul.bf16.vlgmr.msrb.gmra.mxu2 %v4335_v55  ;;  %v2407_v7 = vpop.f32.mrf.mxu0 }
 0x1af   :  { %2682 = vmatpush.bf16.msra.mxu2 %v1909_v1  ;;  %v1449_v4 = vmul.f32 %v4693_v59, %v935_v63  ;;  %v1603_v16 = vmul.f32 %v4693_v59, %v1089_v35  ;;  %v511_v58 = vunpack.c.1.s8 %v5061_v12  ;;  %v541_v18 = vunpack.c.0.s8 %v5065_v29 }
 0x1b0   :  { %v1605_v25 = vmul.f32 %v4693_v59, %v1091_v13  ;;  %v991_v23 = vcvt.s32.f32 %v479_v56  ;;  %v1503_v43 = vmul.f32 %v4693_v59, %v989_v49  ;;  %v1021_v9 = vcvt.s32.f32 %v509_v0  ;;  %v5140_v56 = vpop.f32.mrf.mxu3  ;;  %v2420_v49 = vpop.f32.mrf.mxu1 }
 0x1b1   :  { %v1847_v37 = vpack.c.bf16 %v1449_v4, %v1447_v61  ;;  %v1023_v17 = vcvt.s32.f32 %v511_v58  ;;  %v543_v55 = vunpack.c.1.s8 %v5065_v29  ;;  %v1053_v47 = vcvt.s32.f32 %v541_v18 }
 0x1b2   :  { %v1925_v12 = vpack.c.bf16 %v1605_v25, %v1603_v16  ;;  %v1505_v32 = vmul.f32 %v4693_v59, %v991_v23  ;;  %v1535_v46 = vmul.f32 %v4693_v59, %v1021_v9  ;;  %v2380_v21 = vadd.f32 %v5035_v3, %v2367_v6 }
 0x1b3   :  { %2650 = vmatpush.bf16.msrb.mxu3 %v1847_v37  ;;  %v1537_v26 = vmul.f32 %v4693_v59, %v1023_v17  ;;  %v1055_v2 = vcvt.s32.f32 %v543_v55  ;;  %v1567_v57 = vmul.f32 %v4693_v59, %v1053_v47  ;;  %v573_v29 = vunpack.c.0.s8 %v5081_v45 }
 0x1b4   :  { %v1875_v5 = vpack.c.bf16 %v1505_v32, %v1503_v43  ;;  %v575_v36 = vunpack.c.1.s8 %v5081_v45  ;;  %v5121_v30 = vadd.f32 %v5045_v54, %v2380_v21  ;;  %v473_v24 = vunpack.c.2.s8 %v5109_v48  ;;  %v5131_v54 = vpop.f32.mrf.mxu2 }
 0x1b5   :  { %v1891_v3 = vpack.c.bf16 %v1537_v26, %v1535_v46  ;;  %v1569_v42 = vmul.f32 %v4693_v59, %v1055_v2  ;;  %v1085_v34 = vcvt.s32.f32 %v573_v29  ;;  %v475_v51 = vunpack.c.3.s8 %v5109_v48 }
 0x1b6   :  { %2657 = vmatpush.bf16.msra.mxu0 %v1875_v5  ;;  %v1087_v28 = vcvt.s32.f32 %v575_v36  ;;  %2651 = vmatmul.bf16.vlgmr.msrb.gmra.mxu3 %v4362_v10  ;;  %v985_v52 = vcvt.s32.f32 %v473_v24  ;;  %v505_v11 = vunpack.c.2.s8 %v145_v60  ;;  %v507_v45 = vunpack.c.3.s8 %v145_v60 }
 0x1b7   :  { %2695 = vmatpush.bf16.msra.mxu3 %v1925_v12  ;;  %2670 = vmatpush.bf16.msra.mxu1 %v1891_v3  ;;  %v1907_v31 = vpack.c.bf16 %v1569_v42, %v1567_v57  ;;  %v1599_v15 = vmul.f32 %v4693_v59, %v1085_v34  ;;  %v987_v14 = vcvt.s32.f32 %v475_v51  ;;  %v537_v50 = vunpack.c.2.s8 %v5124_v20  ;;  %v5153_v3 = vld [vmem:[#allocation5 + $0x218] sm:$0xff] }
 0x1b8   :  { %v1601_v6 = vmul.f32 %v4693_v59, %v1087_v28  ;;  %v1499_v62 = vmul.f32 %v4693_v59, %v985_v52  ;;  %v1017_v10 = vcvt.s32.f32 %v505_v11  ;;  %v1019_v1 = vcvt.s32.f32 %v507_v45 }
 0x1b9   :  { %2683 = vmatpush.bf16.msra.mxu2 %v1907_v31  ;;  %v1501_v63 = vmul.f32 %v4693_v59, %v987_v14  ;;  %v539_v61 = vunpack.c.3.s8 %v5124_v20  ;;  %v1049_v35 = vcvt.s32.f32 %v537_v50  ;;  %v569_v13 = vunpack.c.2.s8 %v5129_v53  ;;  %v143_v31 = vld [vmem:[#allocation5 + $0x258] sm:$0xff] }
 0x1ba   :  { %v1923_v0 = vpack.c.bf16 %v1601_v6, %v1599_v15  ;;  %v1531_v4 = vmul.f32 %v4693_v59, %v1017_v10  ;;  %v1533_v16 = vmul.f32 %v4693_v59, %v1019_v1  ;;  %v571_v58 = vunpack.c.3.s8 %v5129_v53  ;;  %v2446_v15 = vpop.f32.mrf.mxu3  ;;  %v5163_v6 = vld [vmem:[#allocation5 + $0x298] sm:$0xff] }
 0x1bb   :  { %v1873_v18 = vpack.c.bf16 %v1501_v63, %v1499_v62  ;;  %v1051_v25 = vcvt.s32.f32 %v539_v61  ;;  %v1563_v23 = vmul.f32 %v4693_v59, %v1049_v35  ;;  %v1081_v43 = vcvt.s32.f32 %v569_v13 }
 0x1bc   :  { %2696 = vmatpush.bf16.msra.mxu3 %v1923_v0  ;;  %v1889_v9 = vpack.c.bf16 %v1533_v16, %v1531_v4  ;;  %v1083_v37 = vcvt.s32.f32 %v571_v58  ;;  %v469_v17 = vunpack.c.0.s8 %v5109_v48  ;;  %v471_v55 = vunpack.c.1.s8 %v5109_v48  ;;  %v2433_v29 = vpop.f32.mrf.mxu2  ;;  %v5169_v58 = vld [vmem:[#allocation5 + $0x2d8] sm:$0xff] }
 0x1bd   :  { %2658 = vmatpush.bf16.msra.mxu0 %v1873_v18  ;;  %v1565_v47 = vmul.f32 %v4693_v59, %v1051_v25  ;;  %v1595_v12 = vmul.f32 %v4693_v59, %v1081_v43  ;;  %v501_v32 = vunpack.c.0.s8 %v145_v60  ;;  %v503_v46 = vunpack.c.1.s8 %v145_v60 }
 0x1be   :  { %2671 = vmatpush.bf16.msra.mxu1 %v1889_v9  ;;  %v1597_v21 = vmul.f32 %v4693_v59, %v1083_v37  ;;  %v981_v26 = vcvt.s32.f32 %v469_v17  ;;  %v983_v2 = vcvt.s32.f32 %v471_v55  ;;  %v533_v57 = vunpack.c.0.s8 %v5124_v20 }
 0x1bf   :  { %v1905_v5 = vpack.c.bf16 %v1565_v47, %v1563_v23  ;;  %v1013_v36 = vcvt.s32.f32 %v501_v32  ;;  %v1015_v24 = vcvt.s32.f32 %v503_v46  ;;  %v535_v48 = vunpack.c.1.s8 %v5124_v20 }
 0x1c0   :  { %v1921_v42 = vpack.c.bf16 %v1597_v21, %v1595_v12  ;;  %v1495_v34 = vmul.f32 %v4693_v59, %v981_v26  ;;  %v1497_v60 = vmul.f32 %v4693_v59, %v983_v2  ;;  %v1045_v51 = vcvt.s32.f32 %v533_v57 }
 0x1c1   :  { %2684 = vmatpush.bf16.msra.mxu2 %v1905_v5  ;;  %v1527_v28 = vmul.f32 %v4693_v59, %v1013_v36  ;;  %v1529_v52 = vmul.f32 %v4693_v59, %v1015_v24  ;;  %v1047_v11 = vcvt.s32.f32 %v535_v48  ;;  %v565_v45 = vunpack.c.0.s8 %v5129_v53 }
 0x1c2   :  { %2697 = vmatpush.bf16.msra.mxu3 %v1921_v42  ;;  %v1871_v20 = vpack.c.bf16 %v1497_v60, %v1495_v34  ;;  %v1559_v14 = vmul.f32 %v4693_v59, %v1045_v51  ;;  %v567_v50 = vunpack.c.1.s8 %v5129_v53  ;;  %v465_v7 = vunpack.c.2.s8 %v5153_v3 }
 0x1c3   :  { %v1887_v62 = vpack.c.bf16 %v1529_v52, %v1527_v28  ;;  %v1561_v10 = vmul.f32 %v4693_v59, %v1047_v11  ;;  %v1077_v1 = vcvt.s32.f32 %v565_v45  ;;  %v467_v63 = vunpack.c.3.s8 %v5153_v3 }
 0x1c4   :  { %2659 = vmatpush.bf16.msra.mxu0 %v1871_v20  ;;  %v1079_v61 = vcvt.s32.f32 %v567_v50  ;;  %v977_v35 = vcvt.s32.f32 %v465_v7  ;;  %v497_v13 = vunpack.c.2.s8 %v143_v31  ;;  %v499_v49 = vunpack.c.3.s8 %v143_v31 }
 0x1c5   :  { %2672 = vmatpush.bf16.msra.mxu1 %v1887_v62  ;;  %v1903_v0 = vpack.c.bf16 %v1561_v10, %v1559_v14  ;;  %v1591_v4 = vmul.f32 %v4693_v59, %v1077_v1  ;;  %v979_v53 = vcvt.s32.f32 %v467_v63  ;;  %v529_v16 = vunpack.c.2.s8 %v5163_v6 }
 0x1c6   :  { %v1593_v18 = vmul.f32 %v4693_v59, %v1079_v61  ;;  %v1491_v25 = vmul.f32 %v4693_v59, %v977_v35  ;;  %v1009_v23 = vcvt.s32.f32 %v497_v13  ;;  %v1011_v43 = vcvt.s32.f32 %v499_v49  ;;  %v141_v13 = vld [vmem:[#allocation5 + $0x248] sm:$0xff] }
 0x1c7   :  { %2685 = vmatpush.bf16.msra.mxu2 %v1903_v0  ;;  %v1493_v9 = vmul.f32 %v4693_v59, %v979_v53  ;;  %v531_v37 = vunpack.c.3.s8 %v5163_v6  ;;  %v1041_v17 = vcvt.s32.f32 %v529_v16  ;;  %v2406_v55 = vadd.f32 %v5104_v41, %v5121_v30  ;;  %v149_v53 = vld [vmem:[#allocation5 + $0x288] sm:$0xff] }
 0x1c8   :  { %v1919_v47 = vpack.c.bf16 %v1593_v18, %v1591_v4  ;;  %v1523_v12 = vmul.f32 %v4693_v59, %v1009_v23  ;;  %v1525_v32 = vmul.f32 %v4693_v59, %v1011_v43  ;;  %v561_v46 = vunpack.c.2.s8 %v5169_v58 }
 0x1c9   :  { %v1869_v21 = vpack.c.bf16 %v1493_v9, %v1491_v25  ;;  %v1043_v26 = vcvt.s32.f32 %v531_v37  ;;  %v1555_v2 = vmul.f32 %v4693_v59, %v1041_v17  ;;  %v563_v57 = vunpack.c.3.s8 %v5169_v58  ;;  %v5202_v17 = vld [vmem:[#allocation5 + $0x2c8] sm:$0xff] }
 0x1ca   :  { %2698 = vmatpush.bf16.msra.mxu3 %v1919_v47  ;;  %v1885_v29 = vpack.c.bf16 %v1525_v32, %v1523_v12  ;;  %v1073_v5 = vcvt.s32.f32 %v561_v46  ;;  %v2419_v36 = vadd.f32 %v5111_v40, %v2406_v55  ;;  %v461_v41 = vunpack.c.0.s8 %v5153_v3 }
 0x1cb   :  { %2660 = vmatpush.bf16.msra.mxu0 %v1869_v21  ;;  %v1557_v30 = vmul.f32 %v4693_v59, %v1043_v26  ;;  %v1075_v24 = vcvt.s32.f32 %v563_v57  ;;  %v463_v48 = vunpack.c.1.s8 %v5153_v3  ;;  %v493_v42 = vunpack.c.0.s8 %v143_v31  ;;  %v133_v3 = vld [vmem:[#allocation5 + $0x208] sm:$0xff] }
 0x1cc   :  { %2673 = vmatpush.bf16.msra.mxu1 %v1885_v29  ;;  %v1587_v34 = vmul.f32 %v4693_v59, %v1073_v5  ;;  %v973_v60 = vcvt.s32.f32 %v461_v41  ;;  %v495_v51 = vunpack.c.1.s8 %v143_v31  ;;  %v525_v28 = vunpack.c.0.s8 %v5163_v6 }
 0x1cd   :  { %v1901_v52 = vpack.c.bf16 %v1557_v30, %v1555_v2  ;;  %v1589_v11 = vmul.f32 %v4693_v59, %v1075_v24  ;;  %v975_v40 = vcvt.s32.f32 %v463_v48  ;;  %v1005_v45 = vcvt.s32.f32 %v493_v42 }
 0x1ce   :  { %v1487_v15 = vmul.f32 %v4693_v59, %v973_v60  ;;  %v1007_v20 = vcvt.s32.f32 %v495_v51  ;;  %v527_v14 = vunpack.c.1.s8 %v5163_v6  ;;  %v1037_v50 = vcvt.s32.f32 %v525_v28 }
 0x1cf   :  { %2686 = vmatpush.bf16.msra.mxu2 %v1901_v52  ;;  %v1917_v7 = vpack.c.bf16 %v1589_v11, %v1587_v34  ;;  %v1489_v62 = vmul.f32 %v4693_v59, %v975_v40  ;;  %v1519_v31 = vmul.f32 %v4693_v59, %v1005_v45  ;;  %v2432_v10 = vadd.f32 %v5131_v54, %v2419_v36 }
 0x1d0   :  { %v1521_v1 = vmul.f32 %v4693_v59, %v1007_v20  ;;  %v1039_v63 = vcvt.s32.f32 %v527_v14  ;;  %v1551_v61 = vmul.f32 %v4693_v59, %v1037_v50  ;;  %v557_v35 = vunpack.c.0.s8 %v5169_v58 }
 0x1d1   :  { %2699 = vmatpush.bf16.msra.mxu3 %v1917_v7  ;;  %v1867_v6 = vpack.c.bf16 %v1489_v62, %v1487_v15  ;;  %v559_v49 = vunpack.c.1.s8 %v5169_v58  ;;  %v5199_v0 = vadd.f32 %v5140_v56, %v2432_v10  ;;  %v457_v4 = vunpack.c.2.s8 %v133_v3  ;;  %v5216_v62 = vld [vmem:[#allocation5 + $0x338] sm:$0xff] }
 0x1d2   :  { %v1883_v16 = vpack.c.bf16 %v1521_v1, %v1519_v31  ;;  %v1553_v54 = vmul.f32 %v4693_v59, %v1039_v63  ;;  %v1069_v18 = vcvt.s32.f32 %v557_v35  ;;  %v459_v25 = vunpack.c.3.s8 %v133_v3  ;;  %v5218_v31 = vpop.f32.mrf.mxu0 }
 0x1d3   :  { %2661 = vmatpush.bf16.msra.mxu0 %v1867_v6  ;;  %v1071_v23 = vcvt.s32.f32 %v559_v49  ;;  %v969_v43 = vcvt.s32.f32 %v457_v4  ;;  %v489_v9 = vunpack.c.2.s8 %v141_v13  ;;  %v491_v37 = vunpack.c.3.s8 %v141_v13 }
 0x1d4   :  { %2674 = vmatpush.bf16.msra.mxu1 %v1883_v16  ;;  %v1899_v55 = vpack.c.bf16 %v1553_v54, %v1551_v61  ;;  %v1583_v58 = vmul.f32 %v4693_v59, %v1069_v18  ;;  %v971_v56 = vcvt.s32.f32 %v459_v25  ;;  %v521_v47 = vunpack.c.2.s8 %v149_v53  ;;  %v5220_v61 = vld [vmem:[#allocation5 + $0x378] sm:$0xff] }
 0x1d5   :  { %v1585_v12 = vmul.f32 %v4693_v59, %v1071_v23  ;;  %v1483_v32 = vmul.f32 %v4693_v59, %v969_v43  ;;  %v1001_v46 = vcvt.s32.f32 %v489_v9  ;;  %v1003_v21 = vcvt.s32.f32 %v491_v37  ;;  %v5227_v25 = vld [vmem:[#allocation5 + $0x3b8] sm:$0xff] }
 0x1d6   :  { %2687 = vmatpush.bf16.msra.mxu2 %v1899_v55  ;;  %v1485_v26 = vmul.f32 %v4693_v59, %v971_v56  ;;  %v523_v2 = vunpack.c.3.s8 %v149_v53  ;;  %v1033_v57 = vcvt.s32.f32 %v521_v47  ;;  %v553_v29 = vunpack.c.2.s8 %v5202_v17  ;;  %v5234_v47 = vpop.f32.mrf.mxu1 }
 0x1d7   :  { %v1915_v5 = vpack.c.bf16 %v1585_v12, %v1583_v58  ;;  %v1515_v36 = vmul.f32 %v4693_v59, %v1001_v46  ;;  %v1517_v41 = vmul.f32 %v4693_v59, %v1003_v21  ;;  %v555_v30 = vunpack.c.3.s8 %v5202_v17 }
 0x1d8   :  { %v1865_v24 = vpack.c.bf16 %v1485_v26, %v1483_v32  ;;  %v1035_v48 = vcvt.s32.f32 %v523_v2  ;;  %v1547_v42 = vmul.f32 %v4693_v59, %v1033_v57  ;;  %v1065_v34 = vcvt.s32.f32 %v553_v29  ;;  %v5238_v26 = vld [vmem:[#allocation5 + $0x3f8] sm:$0xff] }
 0x1d9   :  { %2700 = vmatpush.bf16.msra.mxu3 %v1915_v5  ;;  %v1881_v60 = vpack.c.bf16 %v1517_v41, %v1515_v36  ;;  %v1067_v51 = vcvt.s32.f32 %v555_v30  ;;  %v453_v28 = vunpack.c.0.s8 %v133_v3  ;;  %v455_v52 = vunpack.c.1.s8 %v133_v3 }
 0x1da   :  { %2662 = vmatpush.bf16.msra.mxu0 %v1865_v24  ;;  %v1549_v11 = vmul.f32 %v4693_v59, %v1035_v48  ;;  %v1579_v40 = vmul.f32 %v4693_v59, %v1065_v34  ;;  %v485_v45 = vunpack.c.0.s8 %v141_v13  ;;  %v487_v15 = vunpack.c.1.s8 %v141_v13  ;;  %v2459_v48 = vpop.f32.mrf.mxu0 }
 0x1db   :  { %2675 = vmatpush.bf16.msra.mxu1 %v1881_v60  ;;  %v1581_v20 = vmul.f32 %v4693_v59, %v1067_v51  ;;  %v965_v14 = vcvt.s32.f32 %v453_v28  ;;  %v967_v50 = vcvt.s32.f32 %v455_v52  ;;  %v517_v7 = vunpack.c.0.s8 %v149_v53 }
 0x1dc   :  { %v1897_v10 = vpack.c.bf16 %v1549_v11, %v1547_v42  ;;  %v997_v1 = vcvt.s32.f32 %v485_v45  ;;  %v999_v3 = vcvt.s32.f32 %v487_v15  ;;  %v519_v63 = vunpack.c.1.s8 %v149_v53 }
 0x1dd   :  { %v1913_v35 = vpack.c.bf16 %v1581_v20, %v1579_v40  ;;  %v1479_v6 = vmul.f32 %v4693_v59, %v965_v14  ;;  %v1481_v13 = vmul.f32 %v4693_v59, %v967_v50  ;;  %v1029_v49 = vcvt.s32.f32 %v517_v7 }
 0x1de   :  { %2688 = vmatpush.bf16.msra.mxu2 %v1897_v10  ;;  %v1511_v4 = vmul.f32 %v4693_v59, %v997_v1  ;;  %v1513_v16 = vmul.f32 %v4693_v59, %v999_v3  ;;  %v1031_v54 = vcvt.s32.f32 %v519_v63  ;;  %v609_v18 = vunpack.c.2.s8 %v5216_v62  ;;  %v5260_v63 = vpop.f32.mrf.mxu2 }
 0x1df   :  { %2701 = vmatpush.bf16.msra.mxu3 %v1913_v35  ;;  %v1863_v53 = vpack.c.bf16 %v1481_v13, %v1479_v6  ;;  %v1543_v23 = vmul.f32 %v4693_v59, %v1029_v49  ;;  %v611_v43 = vunpack.c.3.s8 %v5216_v62  ;;  %v641_v9 = vunpack.c.2.s8 %v5220_v61  ;;  %v2472_v35 = vpop.f32.mrf.mxu1 }
 0x1e0   :  { %v1879_v37 = vpack.c.bf16 %v1513_v16, %v1511_v4  ;;  %v1545_v55 = vmul.f32 %v4693_v59, %v1031_v54  ;;  %v1121_v58 = vcvt.s32.f32 %v609_v18  ;;  %v643_v56 = vunpack.c.3.s8 %v5220_v61  ;;  %v5265_v18 = vld [vmem:[#allocation5 + $0x328] sm:$0xff] }
 0x1e1   :  { %2663 = vmatpush.bf16.msra.mxu0 %v1863_v53  ;;  %v1123_v12 = vcvt.s32.f32 %v611_v43  ;;  %v1153_v32 = vcvt.s32.f32 %v641_v9  ;;  %v673_v46 = vunpack.c.2.s8 %v5227_v25  ;;  %v675_v21 = vunpack.c.3.s8 %v5227_v25  ;;  %v5269_v9 = vpop.f32.mrf.mxu3 }
 0x1e2   :  { %2676 = vmatpush.bf16.msra.mxu1 %v1879_v37  ;;  %v1895_v2 = vpack.c.bf16 %v1545_v55, %v1543_v23  ;;  %v1635_v57 = vmul.f32 %v4693_v59, %v1121_v58  ;;  %v1155_v29 = vcvt.s32.f32 %v643_v56  ;;  %v549_v5 = vunpack.c.0.s8 %v5202_v17 }
 0x1e3   :  { %v1637_v36 = vmul.f32 %v4693_v59, %v1123_v12  ;;  %v1667_v41 = vmul.f32 %v4693_v59, %v1153_v32  ;;  %v1185_v30 = vcvt.s32.f32 %v673_v46  ;;  %v1187_v24 = vcvt.s32.f32 %v675_v21  ;;  %v5274_v12 = vld [vmem:[#allocation5 + $0x368] sm:$0xff] }
 0x1e4   :  { %2689 = vmatpush.bf16.msra.mxu2 %v1895_v2  ;;  %v1669_v42 = vmul.f32 %v4693_v59, %v1155_v29  ;;  %v551_v34 = vunpack.c.1.s8 %v5202_v17  ;;  %v1061_v60 = vcvt.s32.f32 %v549_v5  ;;  %2664 = vmatmul.bf16.vlgmr.msra.gmra.mxu0 %v4599_v19  ;;  %v705_v51 = vunpack.c.2.s8 %v5238_v26  ;;  %v5279_v2 = vld [vmem:[#allocation5 + $0x3a8] sm:$0xff] }
 0x1e5   :  { %v1941_v28 = vpack.c.bf16 %v1637_v36, %v1635_v57  ;;  %v1699_v52 = vmul.f32 %v4693_v59, %v1185_v30  ;;  %v1701_v11 = vmul.f32 %v4693_v59, %v1187_v24  ;;  %v707_v40 = vunpack.c.3.s8 %v5238_v26  ;;  %2677 = vmatmul.bf16.vlgmr.msra.gmra.mxu1 %v4620_v38 }
 0x1e6   :  { %v1957_v45 = vpack.c.bf16 %v1669_v42, %v1667_v41  ;;  %v1063_v15 = vcvt.s32.f32 %v551_v34  ;;  %v1575_v20 = vmul.f32 %v4693_v59, %v1061_v60  ;;  %v1217_v14 = vcvt.s32.f32 %v705_v51 }
 0x1e7   :  { %2708 = vmatpush.bf16.msrb.mxu0 %v1941_v28  ;;  %v1973_v17 = vpack.c.bf16 %v1701_v11, %v1699_v52  ;;  %2690 = vmatmul.bf16.vlgmr.msra.gmra.mxu2 %v4605_v33  ;;  %v1219_v19 = vcvt.s32.f32 %v707_v40  ;;  %v605_v50 = vunpack.c.0.s8 %v5216_v62  ;;  %v607_v7 = vunpack.c.1.s8 %v5216_v62  ;;  %v2485_v28 = vpop.f32.mrf.mxu2 }
 0x1e8   :  { %2721 = vmatpush.bf16.msrb.mxu1 %v1957_v45  ;;  %v1577_v10 = vmul.f32 %v4693_v59, %v1063_v15  ;;  %v1731_v1 = vmul.f32 %v4693_v59, %v1217_v14  ;;  %v637_v38 = vunpack.c.0.s8 %v5220_v61  ;;  %v639_v3 = vunpack.c.1.s8 %v5220_v61 }
 0x1e9   :  { %2734 = vmatpush.bf16.msrb.mxu2 %v1973_v17  ;;  %v1733_v33 = vmul.f32 %v4693_v59, %v1219_v19  ;;  %v1117_v6 = vcvt.s32.f32 %v605_v50  ;;  %v1119_v13 = vcvt.s32.f32 %v607_v7  ;;  %v669_v49 = vunpack.c.0.s8 %v5227_v25 }
 0x1ea   :  { %v1911_v62 = vpack.c.bf16 %v1577_v10, %v1575_v20  ;;  %v1149_v4 = vcvt.s32.f32 %v637_v38  ;;  %v1151_v16 = vcvt.s32.f32 %v639_v3  ;;  %v671_v54 = vunpack.c.1.s8 %v5227_v25  ;;  %v2498_v10 = vpop.f32.mrf.mxu3 }
 0x1eb   :  { %v1989_v53 = vpack.c.bf16 %v1733_v33, %v1731_v1  ;;  %v1631_v61 = vmul.f32 %v4693_v59, %v1117_v6  ;;  %v1633_v23 = vmul.f32 %v4693_v59, %v1119_v13  ;;  %v1181_v43 = vcvt.s32.f32 %v669_v49 }
 0x1ec   :  { %2702 = vmatpush.bf16.msra.mxu3 %v1911_v62  ;;  %v1663_v37 = vmul.f32 %v4693_v59, %v1149_v4  ;;  %v1665_v55 = vmul.f32 %v4693_v59, %v1151_v16  ;;  %v1183_v58 = vcvt.s32.f32 %v671_v54  ;;  %v701_v56 = vunpack.c.0.s8 %v5238_v26 }
 0x1ed   :  { %v1939_v25 = vpack.c.bf16 %v1633_v23, %v1631_v61  ;;  %v1695_v32 = vmul.f32 %v4693_v59, %v1181_v43  ;;  %v703_v46 = vunpack.c.1.s8 %v5238_v26  ;;  %v601_v21 = vunpack.c.2.s8 %v5265_v18  ;;  %v5286_v26 = vld [vmem:[#allocation5 + $0x3e8] sm:$0xff] }
 0x1ee   :  { %v1955_v57 = vpack.c.bf16 %v1665_v55, %v1663_v37  ;;  %v1697_v29 = vmul.f32 %v4693_v59, %v1183_v58  ;;  %v1213_v5 = vcvt.s32.f32 %v701_v56  ;;  %v603_v36 = vunpack.c.3.s8 %v5265_v18 }
 0x1ef   :  { %2703 = vmatmul.bf16.vlgmr.msra.gmra.mxu3 %v4625_v39  ;;  %2709 = vmatpush.bf16.msrb.mxu0 %v1939_v25  ;;  %v1215_v41 = vcvt.s32.f32 %v703_v46  ;;  %v1113_v30 = vcvt.s32.f32 %v601_v21  ;;  %v633_v24 = vunpack.c.2.s8 %v5274_v12  ;;  %v635_v48 = vunpack.c.3.s8 %v5274_v12 }
 0x1f0   :  { %2747 = vmatpush.bf16.msrb.mxu3 %v1989_v53  ;;  %2722 = vmatpush.bf16.msrb.mxu1 %v1955_v57  ;;  %v1971_v42 = vpack.c.bf16 %v1697_v29, %v1695_v32  ;;  %v1727_v34 = vmul.f32 %v4693_v59, %v1213_v5  ;;  %v1115_v60 = vcvt.s32.f32 %v603_v36  ;;  %v665_v51 = vunpack.c.2.s8 %v5279_v2  ;;  %v167_v32 = vld [vmem:[#allocation5 + $0x318] sm:$0xff] }
 0x1f1   :  { %v1729_v52 = vmul.f32 %v4693_v59, %v1215_v41  ;;  %v1627_v39 = vmul.f32 %v4693_v59, %v1113_v30  ;;  %v1145_v11 = vcvt.s32.f32 %v633_v24  ;;  %v1147_v40 = vcvt.s32.f32 %v635_v48  ;;  %v175_v29 = vld [vmem:[#allocation5 + $0x358] sm:$0xff] }
 0x1f2   :  { %2735 = vmatpush.bf16.msrb.mxu2 %v1971_v42  ;;  %v1629_v45 = vmul.f32 %v4693_v59, %v1115_v60  ;;  %v667_v15 = vunpack.c.3.s8 %v5279_v2  ;;  %v1177_v20 = vcvt.s32.f32 %v665_v51  ;;  %v697_v14 = vunpack.c.2.s8 %v5286_v26 }
 0x1f3   :  { %v1987_v17 = vpack.c.bf16 %v1729_v52, %v1727_v34  ;;  %v1659_v19 = vmul.f32 %v4693_v59, %v1145_v11  ;;  %v1661_v50 = vmul.f32 %v4693_v59, %v1147_v40  ;;  %v699_v7 = vunpack.c.3.s8 %v5286_v26  ;;  %v5319_v34 = vld [vmem:[#allocation5 + $0x398] sm:$0xff] }
 0x1f4   :  { %v1937_v1 = vpack.c.bf16 %v1629_v45, %v1627_v39  ;;  %v1179_v38 = vcvt.s32.f32 %v667_v15  ;;  %v1691_v3 = vmul.f32 %v4693_v59, %v1177_v20  ;;  %v1209_v35 = vcvt.s32.f32 %v697_v14  ;;  %v191_v14 = vld [vmem:[#allocation5 + $0x3d8] sm:$0xff] }
 0x1f5   :  { %2748 = vmatpush.bf16.msrb.mxu3 %v1987_v17  ;;  %v1953_v33 = vpack.c.bf16 %v1661_v50, %v1659_v19  ;;  %v1211_v6 = vcvt.s32.f32 %v699_v7  ;;  %v2458_v13 = vadd.f32 %v5218_v31, %v5199_v0  ;;  %v597_v49 = vunpack.c.0.s8 %v5265_v18 }
 0x1f6   :  { %2710 = vmatpush.bf16.msrb.mxu0 %v1937_v1  ;;  %v1693_v62 = vmul.f32 %v4693_v59, %v1179_v38  ;;  %v1723_v4 = vmul.f32 %v4693_v59, %v1209_v35  ;;  %v599_v16 = vunpack.c.1.s8 %v5265_v18  ;;  %v629_v54 = vunpack.c.0.s8 %v5274_v12 }
 0x1f7   :  { %2723 = vmatpush.bf16.msrb.mxu1 %v1953_v33  ;;  %v1725_v53 = vmul.f32 %v4693_v59, %v1211_v6  ;;  %v1109_v61 = vcvt.s32.f32 %v597_v49  ;;  %v631_v23 = vunpack.c.1.s8 %v5274_v12  ;;  %v661_v43 = vunpack.c.0.s8 %v5279_v2 }
 0x1f8   :  { %v1969_v0 = vpack.c.bf16 %v1693_v62, %v1691_v3  ;;  %v1111_v31 = vcvt.s32.f32 %v599_v16  ;;  %v1141_v37 = vcvt.s32.f32 %v629_v54  ;;  %v663_v55 = vunpack.c.1.s8 %v5279_v2 }
 0x1f9   :  { %v1985_v58 = vpack.c.bf16 %v1725_v53, %v1723_v4  ;;  %v1623_v56 = vmul.f32 %v4693_v59, %v1109_v61  ;;  %v1143_v25 = vcvt.s32.f32 %v631_v23  ;;  %v1173_v18 = vcvt.s32.f32 %v661_v43 }
 0x1fa   :  { %2736 = vmatpush.bf16.msrb.mxu2 %v1969_v0  ;;  %v1625_v46 = vmul.f32 %v4693_v59, %v1111_v31  ;;  %v1655_v21 = vmul.f32 %v4693_v59, %v1141_v37  ;;  %v1175_v57 = vcvt.s32.f32 %v663_v55  ;;  %v2471_v12 = vadd.f32 %v5234_v47, %v2458_v13 }
 0x1fb   :  { %2749 = vmatpush.bf16.msrb.mxu3 %v1985_v58  ;;  %v1657_v5 = vmul.f32 %v4693_v59, %v1143_v25  ;;  %v1687_v2 = vmul.f32 %v4693_v59, %v1173_v18  ;;  %v693_v36 = vunpack.c.0.s8 %v5286_v26  ;;  %v695_v41 = vunpack.c.1.s8 %v5286_v26 }
 0x1fc   :  { %v1935_v30 = vpack.c.bf16 %v1625_v46, %v1623_v56  ;;  %v1689_v24 = vmul.f32 %v4693_v59, %v1175_v57  ;;  %v593_v48 = vunpack.c.2.s8 %v167_v32  ;;  %v595_v42 = vunpack.c.3.s8 %v167_v32 }
 0x1fd   :  { %v1951_v60 = vpack.c.bf16 %v1657_v5, %v1655_v21  ;;  %v1205_v51 = vcvt.s32.f32 %v693_v36  ;;  %v1207_v47 = vcvt.s32.f32 %v695_v41  ;;  %v625_v28 = vunpack.c.2.s8 %v175_v29  ;;  %v5339_v21 = vpop.f32.mrf.mxu0  ;;  %v165_v5 = vld [vmem:[#allocation5 + $0x308] sm:$0xff] }
 0x1fe   :  { %2711 = vmatpush.bf16.msrb.mxu0 %v1935_v30  ;;  %v1967_v52 = vpack.c.bf16 %v1689_v24, %v1687_v2  ;;  %v1105_v39 = vcvt.s32.f32 %v593_v48  ;;  %v1107_v11 = vcvt.s32.f32 %v595_v42  ;;  %v627_v40 = vunpack.c.3.s8 %v175_v29  ;;  %v173_v24 = vld [vmem:[#allocation5 + $0x348] sm:$0xff]  ;;  %v5345_v48 = vpop.f32.mrf.mxu1 }
 0x1ff   :  { %2724 = vmatpush.bf16.msrb.mxu1 %v1951_v60  ;;  %v1719_v45 = vmul.f32 %v4693_v59, %v1205_v51  ;;  %v1721_v26 = vmul.f32 %v4693_v59, %v1207_v47  ;;  %v1137_v15 = vcvt.s32.f32 %v625_v28  ;;  %v657_v20 = vunpack.c.2.s8 %v5319_v34  ;;  %v5348_v28 = vld [vmem:[#allocation5 + $0x388] sm:$0xff] }
 0x200   :  { %2737 = vmatpush.bf16.msrb.mxu2 %v1967_v52  ;;  %v1619_v17 = vmul.f32 %v4693_v59, %v1105_v39  ;;  %v1621_v19 = vmul.f32 %v4693_v59, %v1107_v11  ;;  %v1139_v50 = vcvt.s32.f32 %v627_v40  ;;  %v659_v7 = vunpack.c.3.s8 %v5319_v34 }
 0x201   :  { %v1983_v10 = vpack.c.bf16 %v1721_v26, %v1719_v45  ;;  %v1651_v1 = vmul.f32 %v4693_v59, %v1137_v15  ;;  %v1169_v38 = vcvt.s32.f32 %v657_v20  ;;  %v2484_v3 = vadd.f32 %v5260_v63, %v2471_v12 }
 0x202   :  { %v1933_v35 = vpack.c.bf16 %v1621_v19, %v1619_v17  ;;  %v1653_v33 = vmul.f32 %v4693_v59, %v1139_v50  ;;  %v1171_v6 = vcvt.s32.f32 %v659_v7  ;;  %v689_v13 = vunpack.c.2.s8 %v191_v14  ;;  %v189_v50 = vld [vmem:[#allocation5 + $0x3c8] sm:$0xff]  ;;  %v5354_v7 = vpop.f32.mrf.mxu2 }
 0x203   :  { %2750 = vmatpush.bf16.msrb.mxu3 %v1983_v10  ;;  %v1683_v49 = vmul.f32 %v4693_v59, %v1169_v38  ;;  %v691_v62 = vunpack.c.3.s8 %v191_v14  ;;  %v5332_v4 = vadd.f32 %v5269_v9, %v2484_v3  ;;  %v589_v16 = vunpack.c.0.s8 %v167_v32 }
 0x204   :  { %2712 = vmatpush.bf16.msrb.mxu0 %v1933_v35  ;;  %v1949_v54 = vpack.c.bf16 %v1653_v33, %v1651_v1  ;;  %v1685_v53 = vmul.f32 %v4693_v59, %v1171_v6  ;;  %v1201_v61 = vcvt.s32.f32 %v689_v13  ;;  %v591_v23 = vunpack.c.1.s8 %v167_v32 }
 0x205   :  { %v1203_v63 = vcvt.s32.f32 %v691_v62  ;;  %v1101_v43 = vcvt.s32.f32 %v589_v16  ;;  %v621_v0 = vunpack.c.0.s8 %v175_v29  ;;  %v623_v31 = vunpack.c.1.s8 %v175_v29  ;;  %v2511_v62 = vpop.f32.mrf.mxu0 }
 0x206   :  { %2725 = vmatpush.bf16.msrb.mxu1 %v1949_v54  ;;  %v1965_v37 = vpack.c.bf16 %v1685_v53, %v1683_v49  ;;  %v1715_v55 = vmul.f32 %v4693_v59, %v1201_v61  ;;  %v1103_v58 = vcvt.s32.f32 %v591_v23  ;;  %v653_v56 = vunpack.c.0.s8 %v5319_v34  ;;  %v5359_v49 = vpop.f32.mrf.mxu3 }
 0x207   :  { %v1717_v9 = vmul.f32 %v4693_v59, %v1203_v63  ;;  %v1615_v25 = vmul.f32 %v4693_v59, %v1101_v43  ;;  %v1133_v18 = vcvt.s32.f32 %v621_v0  ;;  %v1135_v46 = vcvt.s32.f32 %v623_v31  ;;  %v2524_v31 = vpop.f32.mrf.mxu1 }
 0x208   :  { %2738 = vmatpush.bf16.msrb.mxu2 %v1965_v37  ;;  %v1617_v32 = vmul.f32 %v4693_v59, %v1103_v58  ;;  %v655_v57 = vunpack.c.1.s8 %v5319_v34  ;;  %v1165_v12 = vcvt.s32.f32 %v653_v56  ;;  %v685_v29 = vunpack.c.0.s8 %v191_v14 }
 0x209   :  { %v1981_v2 = vpack.c.bf16 %v1717_v9, %v1715_v55  ;;  %v1647_v36 = vmul.f32 %v4693_v59, %v1133_v18  ;;  %v1649_v41 = vmul.f32 %v4693_v59, %v1135_v46  ;;  %v687_v30 = vunpack.c.1.s8 %v191_v14 }
 0x20a   :  { %v1931_v42 = vpack.c.bf16 %v1617_v32, %v1615_v25  ;;  %v1167_v60 = vcvt.s32.f32 %v655_v57  ;;  %v1679_v51 = vmul.f32 %v4693_v59, %v1165_v12  ;;  %v1197_v47 = vcvt.s32.f32 %v685_v29 }
 0x20b   :  { %2751 = vmatpush.bf16.msrb.mxu3 %v1981_v2  ;;  %v1947_v34 = vpack.c.bf16 %v1649_v41, %v1647_v36  ;;  %v1199_v52 = vcvt.s32.f32 %v687_v30  ;;  %v585_v39 = vunpack.c.2.s8 %v165_v5  ;;  %v587_v11 = vunpack.c.3.s8 %v165_v5 }
 0x20c   :  { %2713 = vmatpush.bf16.msrb.mxu0 %v1931_v42  ;;  %v1681_v40 = vmul.f32 %v4693_v59, %v1167_v60  ;;  %v1711_v45 = vmul.f32 %v4693_v59, %v1197_v47  ;;  %v617_v26 = vunpack.c.2.s8 %v173_v24  ;;  %v619_v15 = vunpack.c.3.s8 %v173_v24  ;;  %v2537_v42 = vpop.f32.mrf.mxu2 }
 0x20d   :  { %2726 = vmatpush.bf16.msrb.mxu1 %v1947_v34  ;;  %v1713_v20 = vmul.f32 %v4693_v59, %v1199_v52  ;;  %v1097_v14 = vcvt.s32.f32 %v585_v39  ;;  %v1099_v17 = vcvt.s32.f32 %v587_v11  ;;  %v649_v19 = vunpack.c.2.s8 %v5348_v28  ;;  %v2769_v42 = vld [vmem:[#allocation7 + $0x40] sm:$0xff] }
 0x20e   :  { %v1963_v10 = vpack.c.bf16 %v1681_v40, %v1679_v51  ;;  %v1129_v1 = vcvt.s32.f32 %v617_v26  ;;  %v1131_v38 = vcvt.s32.f32 %v619_v15  ;;  %v651_v3 = vunpack.c.3.s8 %v5348_v28  ;;  %v2550_v11 = vpop.f32.mrf.mxu3  ;;  %v2791_v15 = vld [vmem:[#allocation7 + $0xf0] sm:$0xff] }
 0x20f   :  { %v1979_v35 = vpack.c.bf16 %v1713_v20, %v1711_v45  ;;  %v1611_v33 = vmul.f32 %v4693_v59, %v1097_v14  ;;  %v1613_v6 = vmul.f32 %v4693_v59, %v1099_v17  ;;  %v1161_v13 = vcvt.s32.f32 %v649_v19  ;;  %v2792_v17 = vld [vmem:[#allocation7 + $0xf8] sm:$0xff] }
 0x210   :  { %2739 = vmatpush.bf16.msrb.mxu2 %v1963_v10  ;;  %v1643_v16 = vmul.f32 %v4693_v59, %v1129_v1  ;;  %v1645_v54 = vmul.f32 %v4693_v59, %v1131_v38  ;;  %v1163_v53 = vcvt.s32.f32 %v651_v3  ;;  %v681_v61 = vunpack.c.2.s8 %v189_v50  ;;  %v2789_v38 = vld [vmem:[#allocation7 + $0xe0] sm:$0xff] }
 0x211   :  { %2752 = vmatpush.bf16.msrb.mxu3 %v1979_v35  ;;  %v1929_v23 = vpack.c.bf16 %v1613_v6, %v1611_v33  ;;  %v1675_v63 = vmul.f32 %v4693_v59, %v1161_v13  ;;  %v683_v43 = vunpack.c.3.s8 %v189_v50  ;;  %v581_v0 = vunpack.c.0.s8 %v165_v5  ;;  %v2790_v33 = vld [vmem:[#allocation7 + $0xe8] sm:$0xff]  ;;  %v2574_v13 = vpop.f32.mrf.mxu1 }
 0x212   :  { %v1945_v37 = vpack.c.bf16 %v1645_v54, %v1643_v16  ;;  %v1677_v55 = vmul.f32 %v4693_v59, %v1163_v53  ;;  %v1193_v58 = vcvt.s32.f32 %v681_v61  ;;  %v583_v56 = vunpack.c.1.s8 %v165_v5  ;;  %v5383_v6 = vld [vmem:[%s5518_s4 + $0x8] sm:$0xff]  ;;  %v2787_v16 = vld [vmem:[#allocation7 + $0xd0] sm:$0xff]  ;;  %v2785_v61 = vld [vmem:[#allocation7 + $0xc0] sm:$0xff] }
 0x213   :  { %2714 = vmatpush.bf16.msrb.mxu0 %v1929_v23  ;;  %v1195_v9 = vcvt.s32.f32 %v683_v43  ;;  %v1093_v25 = vcvt.s32.f32 %v581_v0  ;;  %v613_v18 = vunpack.c.0.s8 %v173_v24  ;;  %v615_v46 = vunpack.c.1.s8 %v173_v24  ;;  %v2786_v43 = vld [vmem:[#allocation7 + $0xc8] sm:$0xff]  ;;  %v2784_v0 = vld [vmem:[#allocation7 + $0xb8] sm:$0xff] }
 0x214   :  { %2727 = vmatpush.bf16.msrb.mxu1 %v1945_v37  ;;  %v1961_v32 = vpack.c.bf16 %v1677_v55, %v1675_v63  ;;  %v1707_v57 = vmul.f32 %v4693_v59, %v1193_v58  ;;  %v1095_v12 = vcvt.s32.f32 %v583_v56  ;;  %v645_v29 = vunpack.c.0.s8 %v5348_v28  ;;  %v2587_v54 = vpop.f32.mrf.mxu2  ;;  %v2781_v37 = vld [vmem:[#allocation7 + $0xa0] sm:$0xff] }
 0x215   :  { %v1709_v2 = vmul.f32 %v4693_v59, %v1195_v9  ;;  %v1607_v36 = vmul.f32 %v4693_v59, %v1093_v25  ;;  %v1125_v41 = vcvt.s32.f32 %v613_v18  ;;  %v1127_v30 = vcvt.s32.f32 %v615_v46  ;;  %v2780_v25 = vld [vmem:[#allocation7 + $0x98] sm:$0xff]  ;;  %v2775_v46 = vld [vmem:[#allocation7 + $0x70] sm:$0xff] }
 0x216   :  { %2740 = vmatpush.bf16.msrb.mxu2 %v1961_v32  ;;  %v1609_v5 = vmul.f32 %v4693_v59, %v1095_v12  ;;  %v647_v60 = vunpack.c.1.s8 %v5348_v28  ;;  %v1157_v24 = vcvt.s32.f32 %v645_v29  ;;  %v677_v51 = vunpack.c.0.s8 %v189_v50  ;;  %v2600_v63 = vpop.f32.mrf.mxu3  ;;  %v2776_v32 = vld [vmem:[#allocation7 + $0x78] sm:$0xff]  ;;  %v2774_v12 = vld [vmem:[#allocation7 + $0x68] sm:$0xff] }
 0x217   :  { %v1977_v47 = vpack.c.bf16 %v1709_v2, %v1707_v57  ;;  %v1639_v34 = vmul.f32 %v4693_v59, %v1125_v41  ;;  %v1641_v52 = vmul.f32 %v4693_v59, %v1127_v30  ;;  %v679_v39 = vunpack.c.1.s8 %v189_v50  ;;  %v2773_v57 = vld [vmem:[#allocation7 + $0x60] sm:$0xff]  ;;  %v2772_v30 = vld [vmem:[#allocation7 + $0x58] sm:$0xff] }
 0x218   :  { %v1927_v40 = vpack.c.bf16 %v1609_v5, %v1607_v36  ;;  %v1159_v45 = vcvt.s32.f32 %v647_v60  ;;  %v1671_v26 = vmul.f32 %v4693_v59, %v1157_v24  ;;  %v1189_v20 = vcvt.s32.f32 %v677_v51  ;;  %v2771_v36 = vld [vmem:[#allocation7 + $0x50] sm:$0xff]  ;;  %v2770_v60 = vld [vmem:[#allocation7 + $0x48] sm:$0xff] }
 0x219   :  { %2753 = vmatpush.bf16.msrb.mxu3 %v1977_v47  ;;  %v1943_v14 = vpack.c.bf16 %v1641_v52, %v1639_v34  ;;  %v1191_v19 = vcvt.s32.f32 %v679_v39  ;;  %v2510_v28 = vadd.f32 %v5339_v21, %v5332_v4  ;;  %v2343_v4 = vperm.slane %v5383_v6, 6  ;;  %v2561_v21 = vpop.f32.mrf.mxu0  ;;  %v2576_v56 = vpop.f32.mrf.mxu1  ;;  %v2767_v24 = vld [vmem:[#allocation7 + $0x30] sm:$0xff]  ;;  %v2768_v47 = vld [vmem:[#allocation7 + $0x38] sm:$0xff]  ;;  %v2765_v52 = vld [vmem:[#allocation7 + $0x20] sm:$0xff] }
 0x21a   :  { %2715 = vmatpush.bf16.msrb.mxu0 %v1927_v40  ;;  %v1673_v10 = vmul.f32 %v4693_v59, %v1159_v45  ;;  %v1703_v1 = vmul.f32 %v4693_v59, %v1189_v20  ;;  %v2766_v39 = vld [vmem:[#allocation7 + $0x28] sm:$0xff]  ;;  %v2763_v45 = vld [vmem:[#allocation7 + $0x10] sm:$0xff]  ;;  %v2954_v56 = vld [vmem:[#allocation7 + $0x1f8] sm:$0xff] }
 0x21b   :  { %2728 = vmatpush.bf16.msrb.mxu1 %v1943_v14  ;;  %v1705_v50 = vmul.f32 %v4693_v59, %v1191_v19  ;;  %v2523_v3 = vadd.f32 %v5345_v48, %v2510_v28  ;;  %v2788_v48 = vld [vmem:[#allocation7 + $0xd8] sm:$0xff]  ;;  %v2562_v53 = vadd.f32 %v2561_v21, %v2343_v4  ;;  %v2762_v20 = vld [vmem:[#allocation7 + $0x8] sm:$0xff] }
 0x21c   :  { %v1959_v35 = vpack.c.bf16 %v1673_v10, %v1671_v26  ;;  %v2589_v9 = vpop.f32.mrf.mxu2  ;;  %v2764_v26 = vld [vmem:[#allocation7 + $0x18] sm:$0xff]  ;;  %v2760_v14 = vld [vmem:[%s5514_s0 + $0x8] sm:$0xff] }
 0x21d   :  { %v1975_v62 = vpack.c.bf16 %v1705_v50, %v1703_v1  ;;  %2716 = vmatmul.bf16.vlgmr.msrb.gmra.mxu0 %v4849_v27  ;;  %v2536_v59 = vadd.f32 %v5354_v7, %v2523_v3  ;;  %v2575_v27 = vadd.f32 %v2574_v13, %v2562_v53  ;;  %v2783_v7 = vld [vmem:[#allocation7 + $0xb0] sm:$0xff]  ;;  %v2951_v9 = vld [vmem:[#allocation7 + $0x1e0] sm:$0xff] }
 0x21e   :  { %2795 = vmatpush.msra.mxu0 %v2791_v15  ;;  %2741 = vmatpush.bf16.msrb.mxu2 %v1959_v35  ;;  %v2602_v18 = vpop.f32.mrf.mxu3  ;;  %v2761_v15 = vld [vmem:[#allocation7] sm:$0xff] }
 0x21f   :  { %2815 = vmatpush.msra.mxu1 %v2792_v17  ;;  %2754 = vmatpush.bf16.msrb.mxu3 %v1975_v62  ;;  %v5389_v23 = vadd.f32 %v5359_v49, %v2536_v59  ;;  %v2588_v31 = vadd.f32 %v2587_v54, %v2575_v27  ;;  %v2782_v49 = vld [vmem:[#allocation7 + $0xa8] sm:$0xff] }
 0x220   :  { %2796 = vmatpush.msra.mxu0 %v2789_v38  ;;  %2729 = vmatmul.bf16.vlgmr.msrb.gmra.mxu1 %v4870_v8  ;;  %v2779_v8 = vld [vmem:[#allocation7 + $0x90] sm:$0xff]  ;;  %v2984_v18 = vld [vmem:[#allocation7 + $0x2e8] sm:$0xff] }
 0x221   :  { %2816 = vmatpush.msra.mxu1 %v2790_v33  ;;  %2742 = vmatmul.bf16.vlgmr.msrb.gmra.mxu2 %v4855_v22  ;;  %v2601_v55 = vadd.f32 %v2600_v63, %v2588_v31  ;;  %v2563_v58 = vpop.f32.mrf.mxu0  ;;  %v2777_v22 = vld [vmem:[#allocation7 + $0x80] sm:$0xff] }
 0x222   :  { %2797 = vmatpush.msra.mxu0 %v2787_v16  ;;  %2755 = vmatmul.bf16.vlgmr.msrb.gmra.mxu3 %v4875_v44  ;;  %v2778_v44 = vld [vmem:[#allocation7 + $0x88] sm:$0xff]  ;;  %v2985_v58 = vld [vmem:[#allocation7 + $0x2f0] sm:$0xff] }
 0x223   :  { %2817 = vmatpush.msra.mxu1 %v2788_v48  ;;  %3009 = vmatpush.msra.mxu3 %v2985_v58 }
 0x224   :  { %2798 = vmatpush.msra.mxu0 %v2785_v61 }
 0x225   :  { %2818 = vmatpush.msra.mxu1 %v2786_v43 }
 0x226   :  { %2799 = vmatpush.msra.mxu0 %v2783_v7 }
 0x227   :  { %2819 = vmatpush.msra.mxu1 %v2784_v0 }
 0x228   :  { %2800 = vmatpush.msra.mxu0 %v2781_v37  ;;  %v2626_v2 = vpop.f32.mrf.mxu1 }
 0x229   :  { %2820 = vmatpush.msra.mxu1 %v2782_v49  ;;  %v2613_v29 = vpop.f32.mrf.mxu0 }
 0x22a   :  { %2801 = vmatpush.msra.mxu0 %v2779_v8  ;;  %v2614_v41 = vadd.f32 %v2613_v29, %v2601_v55  ;;  %v2953_v55 = vld [vmem:[#allocation7 + $0x1f0] sm:$0xff]  ;;  %v2986_v8 = vld [vmem:[#allocation7 + $0x2f8] sm:$0xff]  ;;  %v2794_v29 = vperm.slane %v5383_v6, 0 }
 0x22b   :  { %2821 = vmatpush.msra.mxu1 %v2780_v25  ;;  %2989 = vmatpush.msra.mxu2 %v2953_v55  ;;  %v2983_v25 = vld [vmem:[#allocation7 + $0x2e0] sm:$0xff] }
 0x22c   :  { %2802 = vmatpush.msra.mxu0 %v2777_v22  ;;  %v2627_v5 = vadd.f32 %v2626_v2, %v2614_v41  ;;  %v2952_v22 = vld [vmem:[#allocation7 + $0x1e8] sm:$0xff]  ;;  %3010 = vmatpush.msra.mxu3 %v2983_v25  ;;  %v2982_v2 = vld [vmem:[#allocation7 + $0x2d8] sm:$0xff]  ;;  %v2979_v41 = vld [vmem:[#allocation7 + $0x2c0] sm:$0xff] }
 0x22d   :  { %2822 = vmatpush.msra.mxu1 %v2778_v44  ;;  %2990 = vmatpush.msra.mxu2 %v2951_v9  ;;  %v5402_v44 = vld [vmem:[%s5518_s4] sm:$0xff]  ;;  %v2934_v9 = vld [vmem:[#allocation7 + $0x158] sm:$0xff] }
 0x22e   :  { %2803 = vmatpush.msra.mxu0 %v2775_v46  ;;  %v2793_v46 = vperm.slane %v5402_v44, 0 }
 0x22f   :  { %2823 = vmatpush.msra.mxu1 %v2776_v32  ;;  %v2949_v32 = vld [vmem:[#allocation7 + $0x1d0] sm:$0xff] }
 0x230   :  { %2804 = vmatpush.msra.mxu0 %v2773_v57  ;;  %v2628_v40 = vpop.f32.mrf.mxu1  ;;  %v2981_v57 = vld [vmem:[#allocation7 + $0x2d0] sm:$0xff]  ;;  %2991 = vmatpush.msra.mxu2 %v2949_v32 }
 0x231   :  { %2824 = vmatpush.msra.mxu1 %v2774_v12  ;;  %v2639_v51 = vpop.f32.mrf.mxu2  ;;  %v2615_v11 = vpop.f32.mrf.mxu0  ;;  %v2950_v12 = vld [vmem:[#allocation7 + $0x1d8] sm:$0xff]  ;;  %3011 = vmatpush.msra.mxu3 %v2981_v57  ;;  %v2943_v40 = vld [vmem:[#allocation7 + $0x1a0] sm:$0xff] }
 0x232   :  { %2805 = vmatpush.msra.mxu0 %v2771_v36  ;;  %v2640_v34 = vadd.f32 %v2639_v51, %v2627_v5  ;;  %v2947_v36 = vld [vmem:[#allocation7 + $0x1c0] sm:$0xff]  ;;  %v2980_v5 = vld [vmem:[#allocation7 + $0x2c8] sm:$0xff]  ;;  %v2945_v51 = vld [vmem:[#allocation7 + $0x1b0] sm:$0xff] }
 0x233   :  { %2825 = vmatpush.msra.mxu1 %v2772_v30  ;;  %v2948_v30 = vld [vmem:[#allocation7 + $0x1c8] sm:$0xff]  ;;  %2992 = vmatpush.msra.mxu2 %v2947_v36  ;;  %v2931_v57 = vld [vmem:[#allocation7 + $0x140] sm:$0xff] }
 0x234   :  { %2806 = vmatpush.msra.mxu0 %v2769_v42  ;;  %3012 = vmatpush.msra.mxu3 %v2979_v41  ;;  %v2964_v36 = vld [vmem:[#allocation7 + $0x248] sm:$0xff] }
 0x235   :  { %2826 = vmatpush.msra.mxu1 %v2770_v60  ;;  %2993 = vmatpush.msra.mxu2 %v2945_v51 }
 0x236   :  { %2807 = vmatpush.msra.mxu0 %v2767_v24 }
 0x237   :  { %2827 = vmatpush.msra.mxu1 %v2768_v47  ;;  %v2977_v47 = vld [vmem:[#allocation7 + $0x2b0] sm:$0xff]  ;;  %2994 = vmatpush.msra.mxu2 %v2943_v40  ;;  %v2927_v40 = vld [vmem:[#allocation7 + $0x120] sm:$0xff] }
 0x238   :  { %2808 = vmatpush.msra.mxu0 %v2765_v52  ;;  %3013 = vmatpush.msra.mxu3 %v2977_v47  ;;  %v2962_v47 = vld [vmem:[#allocation7 + $0x238] sm:$0xff] }
 0x239   :  { %2828 = vmatpush.msra.mxu1 %v2766_v39  ;;  %v2652_v17 = vpop.f32.mrf.mxu3  ;;  %v2641_v19 = vpop.f32.mrf.mxu2  ;;  %v2978_v39 = vld [vmem:[#allocation7 + $0x2b8] sm:$0xff] }
 0x23a   :  { %2809 = vmatpush.msra.mxu0 %v2763_v45  ;;  %v2653_v28 = vadd.f32 %v2652_v17, %v2640_v34  ;;  %v2946_v34 = vld [vmem:[#allocation7 + $0x1b8] sm:$0xff]  ;;  %v2975_v45 = vld [vmem:[#allocation7 + $0x2a0] sm:$0xff]  ;;  %v2941_v17 = vld [vmem:[#allocation7 + $0x190] sm:$0xff] }
 0x23b   :  { %2829 = vmatpush.msra.mxu1 %v2764_v26  ;;  %v2944_v26 = vld [vmem:[#allocation7 + $0x1a8] sm:$0xff]  ;;  %3014 = vmatpush.msra.mxu3 %v2975_v45  ;;  %v2973_v19 = vld [vmem:[#allocation7 + $0x290] sm:$0xff]  ;;  %v2959_v45 = vld [vmem:[#allocation7 + $0x220] sm:$0xff] }
 0x23c   :  { %2810 = vmatpush.msra.mxu0 %v2761_v15  ;;  %2995 = vmatpush.msra.mxu2 %v2941_v17 }
 0x23d   :  { %2830 = vmatpush.msra.mxu1 %v2762_v20  ;;  %2811 = vmatmul.f32.vlgmr.msra.gmra.mxu0 %v2760_v14  ;;  %v2976_v20 = vld [vmem:[#allocation7 + $0x2a8] sm:$0xff] }
 0x23e   :  { %2831 = vmatmul.f32.vlgmr.msra.gmra.mxu1 %v2760_v14  ;;  %3029 = vmatpush.msrb.mxu0 %v2954_v56  ;;  %v2933_v56 = vld [vmem:[#allocation7 + $0x150] sm:$0xff] }
 0x23f   :  { %3049 = vmatpush.msrb.mxu1 %v2986_v8  ;;  %3015 = vmatpush.msra.mxu3 %v2973_v19  ;;  %v2965_v8 = vld [vmem:[#allocation7 + $0x250] sm:$0xff] }
 0x240   :  { %3030 = vmatpush.msrb.mxu0 %v2952_v22 }
 0x241   :  { %v2654_v10 = vpop.f32.mrf.mxu3  ;;  %3050 = vmatpush.msrb.mxu1 %v2984_v18  ;;  %v2966_v18 = vld [vmem:[#allocation7 + $0x258] sm:$0xff] }
 0x242   :  { %3031 = vmatpush.msrb.mxu0 %v2950_v12  ;;  %v2963_v12 = vld [vmem:[#allocation7 + $0x240] sm:$0xff] }
 0x243   :  { %3051 = vmatpush.msrb.mxu1 %v2982_v2  ;;  %v2932_v2 = vld [vmem:[#allocation7 + $0x148] sm:$0xff] }
 0x244   :  { %3032 = vmatpush.msrb.mxu0 %v2948_v30 }
 0x245   :  { %3052 = vmatpush.msrb.mxu1 %v2980_v5  ;;  %v2961_v5 = vld [vmem:[#allocation7 + $0x230] sm:$0xff] }
 0x246   :  { %3033 = vmatpush.msrb.mxu0 %v2946_v34 }
 0x247   :  { %3053 = vmatpush.msrb.mxu1 %v2978_v39 }
 0x248   :  { %3034 = vmatpush.msrb.mxu0 %v2944_v26 }
 0x249   :  { %3054 = vmatpush.msrb.mxu1 %v2976_v20  ;;  %v2928_v20 = vld [vmem:[#allocation7 + $0x128] sm:$0xff] }
 0x261   :  { %v2665_v1 = vpop.f32.mrf.mxu0 }
 0x262   :  { %v2666_v50 = vadd.f32 %v2665_v1, %v2653_v28  ;;  %v2678_v38 = vpop.f32.mrf.mxu1  ;;  %v2942_v28 = vld [vmem:[#allocation7 + $0x198] sm:$0xff] }
 0x263   :  { %v2974_v1 = vld [vmem:[#allocation7 + $0x298] sm:$0xff]  ;;  %3035 = vmatpush.msrb.mxu0 %v2942_v28  ;;  %v2925_v28 = vld [vmem:[#allocation7 + $0x110] sm:$0xff] }
 0x264   :  { %v2679_v3 = vadd.f32 %v2678_v38, %v2666_v50  ;;  %3055 = vmatpush.msrb.mxu1 %v2974_v1  ;;  %v2939_v38 = vld [vmem:[#allocation7 + $0x180] sm:$0xff]  ;;  %v2926_v1 = vld [vmem:[#allocation7 + $0x118] sm:$0xff] }
 0x265   :  { %2996 = vmatpush.msra.mxu2 %v2939_v38 }
 0x269   :  { %v2667_v35 = vpop.f32.mrf.mxu0 }
 0x26a   :  { %v2691_v33 = vpop.f32.mrf.mxu2  ;;  %v2680_v4 = vpop.f32.mrf.mxu1  ;;  %v2940_v35 = vld [vmem:[#allocation7 + $0x188] sm:$0xff] }
 0x26b   :  { %v2692_v21 = vadd.f32 %v2691_v33, %v2679_v3  ;;  %v2971_v3 = vld [vmem:[#allocation7 + $0x280] sm:$0xff]  ;;  %v2972_v4 = vld [vmem:[#allocation7 + $0x288] sm:$0xff]  ;;  %3036 = vmatpush.msrb.mxu0 %v2940_v35 }
 0x26c   :  { %3016 = vmatpush.msra.mxu3 %v2971_v3  ;;  %3056 = vmatpush.msrb.mxu1 %v2972_v4  ;;  %v2958_v3 = vld [vmem:[#allocation7 + $0x218] sm:$0xff]  ;;  %v2923_v35 = vld [vmem:[#allocation7 + $0x100] sm:$0xff] }
 0x26d   :  { %v2955_v4 = vld [vmem:[#allocation7 + $0x200] sm:$0xff] }
 0x272   :  { %v2704_v13 = vpop.f32.mrf.mxu3  ;;  %v2693_v62 = vpop.f32.mrf.mxu2 }
 0x273   :  { %v2705_v16 = vadd.f32 %v2704_v13, %v2692_v21  ;;  %v2937_v62 = vld [vmem:[#allocation7 + $0x170] sm:$0xff] }
 0x274   :  { %2997 = vmatpush.msra.mxu2 %v2937_v62  ;;  %v2924_v62 = vld [vmem:[#allocation7 + $0x108] sm:$0xff] }
 0x27a   :  { %v2706_v59 = vpop.f32.mrf.mxu3 }
 0x29a   :  { %v2717_v54 = vpop.f32.mrf.mxu0 }
 0x29b   :  { %v2718_v48 = vadd.f32 %v2717_v54, %v2705_v16  ;;  %v2969_v16 = vld [vmem:[#allocation7 + $0x270] sm:$0xff] }
 0x29c   :  { %3017 = vmatpush.msra.mxu3 %v2969_v16  ;;  %v2956_v16 = vld [vmem:[#allocation7 + $0x208] sm:$0xff] }
 0x29d   :  { %v2730_v53 = vpop.f32.mrf.mxu1 }
 0x29e   :  { %v2731_v61 = vadd.f32 %v2730_v53, %v2718_v48  ;;  %v2938_v48 = vld [vmem:[#allocation7 + $0x178] sm:$0xff] }
 0x29f   :  { %v2970_v53 = vld [vmem:[#allocation7 + $0x278] sm:$0xff]  ;;  %3037 = vmatpush.msrb.mxu0 %v2938_v48 }
 0x2a0   :  { %3057 = vmatpush.msrb.mxu1 %v2970_v53 }
 0x2a2   :  { %v2719_v63 = vpop.f32.mrf.mxu0 }
 0x2a4   :  { %v2743_v43 = vpop.f32.mrf.mxu2 }
 0x2a5   :  { %v2744_v27 = vadd.f32 %v2743_v43, %v2731_v61  ;;  %v2756_v7 = vpop.f32.mrf.mxu3  ;;  %v2732_v0 = vpop.f32.mrf.mxu1  ;;  %v2935_v43 = vld [vmem:[#allocation7 + $0x160] sm:$0xff] }
 0x2a6   :  { %2998 = vmatpush.msra.mxu2 %v2935_v43 }
 0x2a7   :  { %v5397_v31 = vadd.f32 %v2756_v7, %v2744_v27  ;;  %v2967_v27 = vld [vmem:[#allocation7 + $0x260] sm:$0xff] }
 0x2a8   :  { %3018 = vmatpush.msra.mxu3 %v2967_v27  ;;  %2999 = vmatpush.msra.mxu2 %v2933_v56 }
 0x2aa   :  { %3019 = vmatpush.msra.mxu3 %v2965_v8  ;;  %3000 = vmatpush.msra.mxu2 %v2931_v57  ;;  %v3129_v8 = vld [vmem:[#allocation7 + $0x3a0] sm:$0xff] }
 0x2ac   :  { %v2745_v37 = vpop.f32.mrf.mxu2  ;;  %3020 = vmatpush.msra.mxu3 %v2963_v12 }
 0x2ad   :  { %v2758_v49 = vpop.f32.mrf.mxu3  ;;  %v2936_v37 = vld [vmem:[#allocation7 + $0x168] sm:$0xff] }
 0x2ae   :  { %v2968_v49 = vld [vmem:[#allocation7 + $0x268] sm:$0xff]  ;;  %3038 = vmatpush.msrb.mxu0 %v2936_v37  ;;  %3021 = vmatpush.msra.mxu3 %v2961_v5 }
 0x2af   :  { %3058 = vmatpush.msrb.mxu1 %v2968_v49  ;;  %v3133_v49 = vld [vmem:[#allocation7 + $0x3c0] sm:$0xff] }
 0x2b0   :  { %3039 = vmatpush.msrb.mxu0 %v2934_v9  ;;  %3022 = vmatpush.msra.mxu3 %v2959_v45 }
 0x2b1   :  { %3059 = vmatpush.msrb.mxu1 %v2966_v18 }
 0x2b2   :  { %3040 = vmatpush.msrb.mxu0 %v2932_v2 }
 0x2b3   :  { %3060 = vmatpush.msrb.mxu1 %v2964_v36 }
 0x2b5   :  { %3061 = vmatpush.msrb.mxu1 %v2962_v47 }
 0x2ba   :  { %v2812_v42 = vpop.f32.mrf.mxu0 }
 0x2bb   :  { %v5406_v60 = vadd.f32 %v2812_v42, %v2793_v46  ;;  %v2832_v24 = vpop.f32.mrf.mxu1  ;;  %v2929_v42 = vld [vmem:[#allocation7 + $0x130] sm:$0xff] }
 0x2bc   :  { %v5408_v52 = vadd.f32 %v2832_v24, %v2794_v29  ;;  %v2930_v24 = vld [vmem:[#allocation7 + $0x138] sm:$0xff]  ;;  %3001 = vmatpush.msra.mxu2 %v2929_v42 }
 0x2bd   :  { %v5411_v11 = vmul.f32 0.70710677, %v5406_v60  ;;  %3041 = vmatpush.msrb.mxu0 %v2930_v24 }
 0x2be   :  { %v5414_v15 = vmul.f32 0.70710677, %v5408_v52  ;;  %3002 = vmatpush.msra.mxu2 %v2927_v40 }
 0x2bf   :  { %v2839_v14 = vmul.f32 %v5411_v11, %v5411_v11  ;;  %3042 = vmatpush.msrb.mxu0 %v2928_v20 }
 0x2c0   :  { %v2879_v10 = vmul.f32 %v5414_v15, %v5414_v15  ;;  %3003 = vmatpush.msra.mxu2 %v2925_v28 }
 0x2c1   :  { %v5420_v50 = vmin.f32 %v2839_v14, 16.0  ;;  %v2960_v14 = vld [vmem:[#allocation7 + $0x228] sm:$0xff]  ;;  %3043 = vmatpush.msrb.mxu0 %v2926_v1  ;;  %v2835_v1 = vmul.f32 0.5, %v5406_v60  ;;  %v3169_v60 = vld [vmem:[#allocation7 + $0x4e0] sm:$0xff] }
 0x2c2   :  { %v5422_v33 = vmin.f32 %v2879_v10, 16.0  ;;  %3062 = vmatpush.msrb.mxu1 %v2960_v14  ;;  %v2957_v10 = vld [vmem:[#allocation7 + $0x210] sm:$0xff]  ;;  %3004 = vmatpush.msra.mxu2 %v2923_v35 }
 0x2c3   :  { %v2841_v21 = vmul.f32 2.1237322e-06, %v5420_v50  ;;  %v2852_v13 = vmul.f32 3.8918573e-05, %v5420_v50  ;;  %3023 = vmatpush.msra.mxu3 %v2957_v10  ;;  %3044 = vmatpush.msrb.mxu0 %v2924_v62  ;;  %v3172_v62 = vld [vmem:[#allocation7 + $0x4f8] sm:$0xff] }
 0x2c4   :  { %v2881_v59 = vmul.f32 2.1237322e-06, %v5422_v33  ;;  %v2892_v54 = vmul.f32 3.8918573e-05, %v5422_v33  ;;  %3063 = vmatpush.msrb.mxu1 %v2958_v3  ;;  %v2836_v3 = vmul.f32 0.5, %v5408_v52  ;;  %v3119_v52 = vld [vmem:[#allocation7 + $0x350] sm:$0xff] }
 0x2c5   :  { %v2842_v61 = vadd.f32 0.00028619796, %v2841_v21  ;;  %v2853_v63 = vadd.f32 0.001143296, %v2852_v13  ;;  %3024 = vmatpush.msra.mxu3 %v2955_v4 }
 0x2c6   :  { %v2882_v7 = vadd.f32 0.00028619796, %v2881_v59  ;;  %v2893_v0 = vadd.f32 0.001143296, %v2892_v54  ;;  %v3139_v54 = vld [vmem:[#allocation7 + $0x3f0] sm:$0xff]  ;;  %3064 = vmatpush.msrb.mxu1 %v2956_v16  ;;  %v3121_v16 = vld [vmem:[#allocation7 + $0x360] sm:$0xff] }
 0x2c7   :  { %v2843_v55 = vmul.f32 %v2842_v61, %v5420_v50  ;;  %v2854_v58 = vmul.f32 %v2853_v63, %v5420_v50  ;;  %v3137_v61 = vld [vmem:[#allocation7 + $0x3e0] sm:$0xff]  ;;  %3175 = vmatpush.msrb.mxu2 %v3139_v54  ;;  %v3167_v54 = vld [vmem:[#allocation7 + $0x4d0] sm:$0xff] }
 0x2c8   :  { %v2883_v25 = vmul.f32 %v2882_v7, %v5422_v33  ;;  %v2894_v22 = vmul.f32 %v2893_v0, %v5422_v33  ;;  %v3135_v7 = vld [vmem:[#allocation7 + $0x3d0] sm:$0xff]  ;;  %3235 = vmatpush.msra.mxu1 %v3172_v62  ;;  %v3264_v62 = vld [vmem:[#allocation7 + $0x580] sm:$0xff] }
 0x2c9   :  { %v2844_v46 = vadd.f32 0.0036580483, %v2843_v55  ;;  %v2855_v32 = vadd.f32 0.014752088, %v2854_v58  ;;  %3176 = vmatpush.msrb.mxu2 %v3137_v61  ;;  %v3131_v58 = vld [vmem:[#allocation7 + $0x3b0] sm:$0xff]  ;;  %v3165_v61 = vld [vmem:[#allocation7 + $0x4c0] sm:$0xff] }
 0x2ca   :  { %v2895_v29 = vadd.f32 0.014752088, %v2894_v22  ;;  %v2884_v30 = vadd.f32 0.0036580483, %v2883_v25  ;;  %v3127_v22 = vld [vmem:[#allocation7 + $0x390] sm:$0xff] }
 0x2cb   :  { %v2856_v41 = vmul.f32 %v2855_v32, %v5420_v50  ;;  %v2845_v34 = vmul.f32 %v2844_v46, %v5420_v50  ;;  %3177 = vmatpush.msrb.mxu2 %v3135_v7  ;;  %v3163_v7 = vld [vmem:[#allocation7 + $0x4b0] sm:$0xff] }
 0x2cc   :  { %v2896_v51 = vmul.f32 %v2895_v29, %v5422_v33  ;;  %v2885_v19 = vmul.f32 %v2884_v30, %v5422_v33 }
 0x2cd   :  { %v2857_v39 = vadd.f32 0.112945676, %v2856_v41  ;;  %v2846_v21 = vadd.f32 0.05243302, %v2845_v34  ;;  %3178 = vmatpush.msrb.mxu2 %v3133_v49  ;;  %v3113_v49 = vld [vmem:[#allocation7 + $0x320] sm:$0xff] }
 0x2ce   :  { %v2897_v26 = vadd.f32 0.112945676, %v2896_v51  ;;  %v2886_v53 = vadd.f32 0.05243302, %v2885_v19 }
 0x2cf   :  { %v2858_v17 = vmul.f32 %v2857_v39, %v5420_v50  ;;  %v2847_v43 = vmul.f32 %v2846_v21, %v5420_v50  ;;  %3179 = vmatpush.msrb.mxu2 %v3131_v58  ;;  %v3123_v21 = vld [vmem:[#allocation7 + $0x370] sm:$0xff]  ;;  %v3136_v58 = vld [vmem:[#allocation7 + $0x3d8] sm:$0xff] }
 0x2d0   :  { %v2898_v38 = vmul.f32 %v2897_v26, %v5422_v33  ;;  %v2887_v37 = vmul.f32 %v2886_v53, %v5422_v33  ;;  %v3117_v53 = vld [vmem:[#allocation7 + $0x340] sm:$0xff] }
 0x2d1   :  { %v2859_v13 = vadd.f32 0.4994258, %v2858_v17  ;;  %v2848_v55 = vadd.f32 0.18741608, %v2847_v43  ;;  %3180 = vmatpush.msrb.mxu2 %v3129_v8  ;;  %v3166_v43 = vld [vmem:[#allocation7 + $0x4c8] sm:$0xff]  ;;  %v3111_v8 = vld [vmem:[#allocation7 + $0x310] sm:$0xff] }
 0x2d2   :  { %v2899_v59 = vadd.f32 0.4994258, %v2898_v38  ;;  %v2888_v56 = vadd.f32 0.18741608, %v2887_v37  ;;  %v3164_v37 = vld [vmem:[#allocation7 + $0x4b8] sm:$0xff] }
 0x2d3   :  { %v2860_v48 = vmul.f32 %v2859_v13, %v5420_v50  ;;  %v2849_v25 = vmul.f32 %v2848_v55, %v5420_v50  ;;  %3181 = vmatpush.msrb.mxu2 %v3127_v22  ;;  %v3171_v13 = vld [vmem:[#allocation7 + $0x4f0] sm:$0xff]  ;;  %v3161_v55 = vld [vmem:[#allocation7 + $0x4a0] sm:$0xff]  ;;  %v3160_v22 = vld [vmem:[#allocation7 + $0x498] sm:$0xff] }
 0x2d4   :  { %v2900_v63 = vmul.f32 %v2899_v59, %v5422_v33  ;;  %v2889_v32 = vmul.f32 %v2888_v56, %v5422_v33  ;;  %3195 = vmatpush.msrb.mxu3 %v3171_v13  ;;  %v3170_v59 = vld [vmem:[#allocation7 + $0x4e8] sm:$0xff]  ;;  %v2987_v13 = vperm.slane %v5402_v44, 1 }
 0x2d5   :  { %v2861_v27 = vadd.f32 1.0, %v2860_v48  ;;  %v2850_v29 = vadd.f32 1.1283791, %v2849_v25  ;;  %3236 = vmatpush.msra.mxu1 %v3170_v59  ;;  %v3168_v48 = vld [vmem:[#allocation7 + $0x4d8] sm:$0xff]  ;;  %v3162_v56 = vld [vmem:[#allocation7 + $0x4a8] sm:$0xff] }
 0x2d6   :  { %v2901_v0 = vadd.f32 1.0, %v2900_v63  ;;  %v2890_v5 = vadd.f32 1.1283791, %v2889_v32  ;;  %3196 = vmatpush.msrb.mxu3 %v3169_v60  ;;  %v3140_v63 = vld [vmem:[#allocation7 + $0x3f8] sm:$0xff]  ;;  %v3134_v25 = vld [vmem:[#allocation7 + $0x3c8] sm:$0xff] }
 0x2d7   :  { %3685 = vrcp.f32 %v2861_v27  ;;  %v2873_v2 = vand.u32 2147483648, %v2861_v27  ;;  %v2871_v30 = vand.u32 2147483647, %v2861_v27  ;;  %vm2867_vm2 = vweird.f32 %v2861_v27  ;;  %3237 = vmatpush.msra.mxu1 %v3168_v48  ;;  %3215 = vmatpush.msra.mxu0 %v3140_v63  ;;  %v3132_v32 = vld [vmem:[#allocation7 + $0x3b8] sm:$0xff]  ;;  %v3142_v59 = vld [vmem:[#allocation7 + $0x408] sm:$0xff] }
 0x2d8   :  { %3687 = vrcp.f32 %v2901_v0  ;;  %v2913_v42 = vand.u32 2147483648, %v2901_v0  ;;  %v2911_v50 = vand.u32 2147483647, %v2901_v0  ;;  %vm2907_vm4 = vweird.f32 %v2901_v0  ;;  %3197 = vmatpush.msrb.mxu3 %v3167_v54  ;;  %v3116_v60 = vld [vmem:[#allocation7 + $0x338] sm:$0xff]  ;;  %v3263_v54 = vld [vmem:[#allocation7 + $0x570] sm:$0xff] }
 0x2d9   :  { %v2874_v47 = vor.u32 1.1754944e-38, %v2873_v2  ;;  %v2851_v33 = vmul.f32 %v2850_v29, %v5411_v11  ;;  %vm2872_vm5 = vcmp.eq.f32.partialorder %v2871_v30, 8.507059e+37  ;;  %v2891_v26 = vmul.f32 %v2890_v5, %v5414_v15  ;;  %v3125_v15 = vld [vmem:[#allocation7 + $0x380] sm:$0xff]  ;;  %3238 = vmatpush.msra.mxu1 %v3166_v43  ;;  %v3155_v29 = vld [vmem:[#allocation7 + $0x470] sm:$0xff]  ;;  %v3130_v2 = vld [vmem:[#allocation7 + $0x3a8] sm:$0xff] }
 0x2da   :  { %v2914_v40 = vor.u32 1.1754944e-38, %v2913_v42  ;;  %vm2912_vm7 = vcmp.eq.f32.partialorder %v2911_v50, 8.507059e+37  ;;  %3182 = vmatpush.msrb.mxu2 %v3125_v15  ;;  %3198 = vmatpush.msrb.mxu3 %v3165_v61  ;;  %v3153_v30 = vld [vmem:[#allocation7 + $0x460] sm:$0xff]  ;;  %v3128_v42 = vld [vmem:[#allocation7 + $0x398] sm:$0xff]  ;;  %v3154_v5 = vld [vmem:[#allocation7 + $0x468] sm:$0xff] }
 0x2db   :  { %3239 = vmatpush.msra.mxu1 %v3164_v37  ;;  %v3151_v50 = vld [vmem:[#allocation7 + $0x450] sm:$0xff]  ;;  %v3144_v15 = vld [vmem:[#allocation7 + $0x418] sm:$0xff]  ;;  %v3262_v61 = vld [vmem:[#allocation7 + $0x560] sm:$0xff] }
 0x2dc   :  { %3183 = vmatpush.msrb.mxu2 %v3123_v21  ;;  %3199 = vmatpush.msrb.mxu3 %v3163_v7  ;;  %v3112_v43 = vld [vmem:[#allocation7 + $0x318] sm:$0xff] }
 0x2dd   :  { %v3686_v9 = vpop.eup %3685  ;;  %3240 = vmatpush.msra.mxu1 %v3162_v56 }
 0x2de   :  { %v3688_v18 = vpop.eup %3687  ;;  %v2863_v46 = vmul.f32 %v3686_v9, %v2861_v27  ;;  %vm2868_vm0 = vweird.f32 %v3686_v9  ;;  %3184 = vmatpush.msrb.mxu2 %v3121_v16  ;;  %v3115_v27 = vld [vmem:[#allocation7 + $0x330] sm:$0xff]  ;;  %3200 = vmatpush.msrb.mxu3 %v3161_v55  ;;  %v3141_v16 = vld [vmem:[#allocation7 + $0x400] sm:$0xff] }
 0x2df   :  { %v2903_v57 = vmul.f32 %v3688_v18, %v2901_v0  ;;  %vm2908_vm1 = vweird.f32 %v3688_v18  ;;  %vm2869_vm3 = vmor %vm2867_vm2, %vm2868_vm0  ;;  %v3138_v0 = vld [vmem:[#allocation7 + $0x3e8] sm:$0xff]  ;;  %3241 = vmatpush.msra.mxu1 %v3160_v22  ;;  %v3256_v22 = vld [vmem:[#allocation7 + $0x500] sm:$0xff] }
 0x2e0   :  { %v2864_v12 = vsub.f32 1.0, %v2863_v46  ;;  %vm2909_vm6 = vmor %vm2907_vm4, %vm2908_vm1  ;;  %3185 = vmatpush.msrb.mxu2 %v3119_v52  ;;  %3216 = vmatpush.msra.mxu0 %v3138_v0  ;;  %v3157_v46 = vld [vmem:[#allocation7 + $0x480] sm:$0xff]  ;;  %v3110_v0 = vld [vmem:[#allocation7 + $0x308] sm:$0xff] }
 0x2e1   :  { %v2904_v36 = vsub.f32 1.0, %v2903_v57  ;;  %v3158_v57 = vld [vmem:[#allocation7 + $0x488] sm:$0xff] }
 0x2e2   :  { %v2865_v41 = vmul.f32 %v3686_v9, %v2864_v12  ;;  %3186 = vmatpush.msrb.mxu2 %v3117_v53  ;;  %3217 = vmatpush.msra.mxu0 %v3136_v58  ;;  %v3271_v12 = vld [vmem:[#allocation7 + $0x5f0] sm:$0xff]  ;;  %v3114_v53 = vld [vmem:[#allocation7 + $0x328] sm:$0xff] }
 0x2e3   :  { %v2905_v24 = vmul.f32 %v3688_v18, %v2904_v36  ;;  %3242 = vmatpush.msra.mxu1 %v3158_v57  ;;  %v3156_v36 = vld [vmem:[#allocation7 + $0x478] sm:$0xff]  ;;  %v3259_v58 = vld [vmem:[#allocation7 + $0x530] sm:$0xff] }
 0x2e4   :  { %v2866_v51 = vadd.f32 %v3686_v9, %v2865_v41  ;;  %3187 = vmatpush.msrb.mxu2 %v3115_v27  ;;  %3218 = vmatpush.msra.mxu0 %v3134_v25  ;;  %v3270_v41 = vld [vmem:[#allocation7 + $0x5e0] sm:$0xff]  ;;  %v3261_v27 = vld [vmem:[#allocation7 + $0x550] sm:$0xff] }
 0x2e5   :  { %v2906_v34 = vadd.f32 %v3688_v18, %v2905_v24  ;;  %3243 = vmatpush.msra.mxu1 %v3156_v36  ;;  %v3269_v24 = vld [vmem:[#allocation7 + $0x5d0] sm:$0xff] }
 0x2e6   :  { %v2870_v39 = vsel %vm2869_vm3, %v3686_v9, %v2866_v51  ;;  %3188 = vmatpush.msrb.mxu2 %v3113_v49  ;;  %v3159_v9 = vld [vmem:[#allocation7 + $0x490] sm:$0xff]  ;;  %3219 = vmatpush.msra.mxu0 %v3132_v32  ;;  %v3126_v51 = vld [vmem:[#allocation7 + $0x388] sm:$0xff]  ;;  %v3260_v49 = vld [vmem:[#allocation7 + $0x540] sm:$0xff] }
 0x2e7   :  { %v2875_v45 = vsel %vm2872_vm5, %v2874_v47, %v2870_v39  ;;  %v2910_v20 = vsel %vm2909_vm6, %v3688_v18, %v2906_v34  ;;  %3201 = vmatpush.msrb.mxu3 %v3159_v9  ;;  %v3109_v18 = vld [vmem:[#allocation7 + $0x300] sm:$0xff]  ;;  %3244 = vmatpush.msra.mxu1 %v3154_v5  ;;  %v3152_v47 = vld [vmem:[#allocation7 + $0x458] sm:$0xff]  ;;  %v3257_v25 = vld [vmem:[#allocation7 + $0x510] sm:$0xff] }
 0x2e8   :  { %v2876_v14 = vmul.f32 %v2875_v45, %v2851_v33  ;;  %v2915_v17 = vsel %vm2912_vm7, %v2914_v40, %v2910_v20  ;;  %3189 = vmatpush.msrb.mxu2 %v3111_v8  ;;  %3220 = vmatpush.msra.mxu0 %v3130_v2  ;;  %v3268_v34 = vld [vmem:[#allocation7 + $0x5c0] sm:$0xff]  ;;  %v3124_v39 = vld [vmem:[#allocation7 + $0x378] sm:$0xff]  ;;  %v3150_v40 = vld [vmem:[#allocation7 + $0x448] sm:$0xff]  ;;  %v2988_v45 = vperm.slane %v5383_v6, 1 }
 0x2e9   :  { %v2916_v19 = vmul.f32 %v2915_v17, %v2891_v26  ;;  %3202 = vmatpush.msrb.mxu3 %v3157_v46  ;;  %3245 = vmatpush.msra.mxu1 %v3152_v47  ;;  %v3149_v33 = vld [vmem:[#allocation7 + $0x440] sm:$0xff]  ;;  %v3267_v26 = vld [vmem:[#allocation7 + $0x5b0] sm:$0xff]  ;;  %v3148_v17 = vld [vmem:[#allocation7 + $0x438] sm:$0xff] }
 0x2ea   :  { %v3609_v28 = vclamps-f32 %v2876_v14, 1.0  ;;  %3190 = vmatpush.msrb.mxu2 %v3109_v18  ;;  %3221 = vmatpush.msra.mxu0 %v3128_v42  ;;  %v3147_v20 = vld [vmem:[#allocation7 + $0x430] sm:$0xff]  ;;  %v3122_v14 = vld [vmem:[#allocation7 + $0x368] sm:$0xff]  ;;  %v3258_v8 = vld [vmem:[#allocation7 + $0x520] sm:$0xff] }
 0x2eb   :  { %v3610_v10 = vclamps-f32 %v2916_v19, 1.0  ;;  %3203 = vmatpush.msrb.mxu3 %v3155_v29  ;;  %3246 = vmatpush.msra.mxu1 %v3150_v40  ;;  %v3266_v19 = vld [vmem:[#allocation7 + $0x5a0] sm:$0xff]  ;;  %v3265_v6 = vld [vmem:[#allocation7 + $0x590] sm:$0xff] }
 0x2ec   :  { %v2919_v38 = vadd.f32 1.0, %v3609_v28  ;;  %3222 = vmatpush.msra.mxu0 %v3126_v51  ;;  %v3308_v18 = vld [vmem:[#allocation7 + $0x6f0] sm:$0xff]  ;;  %v3307_v46 = vld [vmem:[#allocation7 + $0x6e0] sm:$0xff] }
 0x2ed   :  { %v2920_v11 = vadd.f32 1.0, %v3610_v10  ;;  %3204 = vmatpush.msrb.mxu3 %v3153_v30  ;;  %3247 = vmatpush.msra.mxu1 %v3148_v17  ;;  %v3145_v10 = vld [vmem:[#allocation7 + $0x420] sm:$0xff]  ;;  %v3306_v57 = vld [vmem:[#allocation7 + $0x6d0] sm:$0xff] }
 0x2ee   :  { %v2921_v35 = vmul.f32 %v2919_v38, %v2835_v1  ;;  %3223 = vmatpush.msra.mxu0 %v3124_v39  ;;  %v3120_v1 = vld [vmem:[#allocation7 + $0x358] sm:$0xff]  ;;  %v3146_v38 = vld [vmem:[#allocation7 + $0x428] sm:$0xff]  ;;  %v3305_v29 = vld [vmem:[#allocation7 + $0x6c0] sm:$0xff] }
 0x2ef   :  { %v2922_v4 = vmul.f32 %v2920_v11, %v2836_v3  ;;  %3205 = vmatpush.msrb.mxu3 %v3151_v50  ;;  %3248 = vmatpush.msra.mxu1 %v3146_v38  ;;  %v3304_v38 = vld [vmem:[#allocation7 + $0x6b0] sm:$0xff] }
 0x2f0   :  { %3005 = vmatmul.f32.vlgmr.msra.gmra.mxu2 %v2921_v35  ;;  %3045 = vmatmul.f32.vlgmr.msrb.gmra.mxu0 %v2921_v35  ;;  %v3143_v35 = vld [vmem:[#allocation7 + $0x410] sm:$0xff] }
 0x2f1   :  { %3025 = vmatmul.f32.vlgmr.msra.gmra.mxu3 %v2922_v4  ;;  %3065 = vmatmul.f32.vlgmr.msrb.gmra.mxu1 %v2922_v4  ;;  %v3118_v4 = vld [vmem:[#allocation7 + $0x348] sm:$0xff] }
 0x2f2   :  { %3273 = vmatpush.msra.mxu2 %v3271_v12  ;;  %3206 = vmatpush.msrb.mxu3 %v3149_v33 }
 0x2f3   :  { %3224 = vmatpush.msra.mxu0 %v3122_v14  ;;  %3249 = vmatpush.msra.mxu1 %v3144_v15  ;;  %v3298_v15 = vld [vmem:[#allocation7 + $0x650] sm:$0xff] }
 0x2f4   :  { %3274 = vmatpush.msra.mxu2 %v3270_v41  ;;  %3207 = vmatpush.msrb.mxu3 %v3147_v20 }
 0x2f5   :  { %3225 = vmatpush.msra.mxu0 %v3120_v1  ;;  %3250 = vmatpush.msra.mxu1 %v3142_v59  ;;  %v3255_v1 = vld [vmem:[%s5514_s0] sm:$0xff] }
 0x2f6   :  { %3275 = vmatpush.msra.mxu2 %v3269_v24  ;;  %3208 = vmatpush.msrb.mxu3 %v3145_v10 }
 0x2f7   :  { %3226 = vmatpush.msra.mxu0 %v3118_v4  ;;  %v3299_v4 = vld [vmem:[#allocation7 + $0x660] sm:$0xff] }
 0x2f8   :  { %3276 = vmatpush.msra.mxu2 %v3268_v34  ;;  %3209 = vmatpush.msrb.mxu3 %v3143_v35  ;;  %v3300_v35 = vld [vmem:[#allocation7 + $0x670] sm:$0xff] }
 0x2f9   :  { %3227 = vmatpush.msra.mxu0 %v3116_v60  ;;  %v3293_v60 = vld [vmem:[#allocation7 + $0x600] sm:$0xff] }
 0x2fa   :  { %3277 = vmatpush.msra.mxu2 %v3267_v26  ;;  %3210 = vmatpush.msrb.mxu3 %v3141_v16  ;;  %v3294_v16 = vld [vmem:[#allocation7 + $0x610] sm:$0xff] }
 0x2fb   :  { %3228 = vmatpush.msra.mxu0 %v3114_v53 }
 0x2fc   :  { %3278 = vmatpush.msra.mxu2 %v3266_v19  ;;  %3310 = vmatpush.msra.mxu3 %v3308_v18 }
 0x2fd   :  { %3229 = vmatpush.msra.mxu0 %v3112_v43  ;;  %v3390_v43 = vld [vmem:[#allocation7 + $0x7e0] sm:$0xff] }
 0x2fe   :  { %3279 = vmatpush.msra.mxu2 %v3265_v6  ;;  %3311 = vmatpush.msra.mxu3 %v3307_v46  ;;  %v3302_v6 = vld [vmem:[#allocation7 + $0x690] sm:$0xff]  ;;  %v3384_v46 = vld [vmem:[#allocation7 + $0x780] sm:$0xff] }
 0x2ff   :  { %3230 = vmatpush.msra.mxu0 %v3110_v0  ;;  %v3389_v0 = vld [vmem:[#allocation7 + $0x7d0] sm:$0xff] }
 0x300   :  { %3280 = vmatpush.msra.mxu2 %v3264_v62  ;;  %3312 = vmatpush.msra.mxu3 %v3306_v57  ;;  %v3295_v62 = vld [vmem:[#allocation7 + $0x620] sm:$0xff] }
 0x302   :  { %3281 = vmatpush.msra.mxu2 %v3263_v54  ;;  %3313 = vmatpush.msra.mxu3 %v3305_v29 }
 0x304   :  { %3282 = vmatpush.msra.mxu2 %v3262_v61  ;;  %3314 = vmatpush.msra.mxu3 %v3304_v38  ;;  %v3309_v61 = vperm.slane %v5402_v44, 4  ;;  %v3425_v38 = vld [vmem:[#allocation7 + $0x6a8] sm:$0xff] }
 0x306   :  { %3283 = vmatpush.msra.mxu2 %v3261_v27 }
 0x308   :  { %3284 = vmatpush.msra.mxu2 %v3260_v49  ;;  %v3388_v49 = vld [vmem:[#allocation7 + $0x7c0] sm:$0xff] }
 0x30a   :  { %3285 = vmatpush.msra.mxu2 %v3259_v58  ;;  %v3387_v58 = vld [vmem:[#allocation7 + $0x7b0] sm:$0xff] }
 0x30c   :  { %3286 = vmatpush.msra.mxu2 %v3258_v8 }
 0x30e   :  { %3287 = vmatpush.msra.mxu2 %v3257_v25  ;;  %v3385_v25 = vld [vmem:[#allocation7 + $0x790] sm:$0xff] }
 0x310   :  { %3288 = vmatpush.msra.mxu2 %v3256_v22 }
 0x36d   :  { %v3046_v28 = vpop.f32.mrf.mxu0 }
 0x36e   :  { %v3047_v3 = vadd.f32 %v3046_v28, %v2988_v45  ;;  %v3066_v11 = vpop.f32.mrf.mxu1 }
 0x370   :  { %v5449_v21 = vadd.f32 %v3066_v11, %v3047_v3  ;;  %v3303_v3 = vld [vmem:[#allocation7 + $0x6a0] sm:$0xff] }
 0x371   :  { %3315 = vmatpush.msra.mxu3 %v3303_v3  ;;  %v3301_v11 = vld [vmem:[#allocation7 + $0x680] sm:$0xff] }
 0x372   :  { %v3612_v52 = vmul.f32 -1.442695, %v5449_v21 }
 0x373   :  { %v3006_v48 = vpop.f32.mrf.mxu2  ;;  %3316 = vmatpush.msra.mxu3 %v3302_v6 }
 0x374   :  { %3689 = vpow2.f32 %v3612_v52  ;;  %v3007_v63 = vadd.f32 %v3006_v48, %v2987_v13  ;;  %v3026_v7 = vpop.f32.mrf.mxu3  ;;  %v3296_v13 = vld [vmem:[#allocation7 + $0x630] sm:$0xff]  ;;  %v3272_v52 = vperm.slane %v5402_v44, 3 }
 0x375   :  { %3317 = vmatpush.msra.mxu3 %v3301_v11 }
 0x376   :  { %v3027_v37 = vadd.f32 %v3026_v7, %v3007_v63  ;;  %v3391_v63 = vld [vmem:[#allocation7 + $0x7f0] sm:$0xff] }
 0x377   :  { %3318 = vmatpush.msra.mxu3 %v3300_v35  ;;  %3392 = vmatpush.msrb.mxu0 %v3391_v63  ;;  %v3424_v35 = vld [vmem:[#allocation7 + $0x698] sm:$0xff]  ;;  %v3704_v63 = vld [vmem:[%s5518_s4] sm:$0xff] }
 0x378   :  { %v3611_v55 = vmul.f32 -1.442695, %v3027_v37 }
 0x379   :  { %3319 = vmatpush.msra.mxu3 %v3299_v4  ;;  %3393 = vmatpush.msrb.mxu0 %v3390_v43  ;;  %v3173_v43 = vperm.slane %v3704_v63, 2 }
 0x37a   :  { %v3690_v56 = vpop.eup %3689  ;;  %3691 = vpow2.f32 %v3611_v55 }
 0x37b   :  { %v3076_v9 = vadd.f32 1.0, %v3690_v56  ;;  %3320 = vmatpush.msra.mxu3 %v3298_v15  ;;  %3394 = vmatpush.msrb.mxu0 %v3389_v0  ;;  %v3386_v56 = vld [vmem:[#allocation7 + $0x7a0] sm:$0xff]  ;;  %v3423_v15 = vld [vmem:[#allocation7 + $0x688] sm:$0xff] }
 0x37d   :  { %3693 = vrcp.f32 %v3076_v9  ;;  %v3103_v30 = vand.u32 2147483648, %v3076_v9  ;;  %v3101_v5 = vand.u32 2147483647, %v3076_v9  ;;  %vm3097_vm9 = vweird.f32 %v3076_v9  ;;  %3395 = vmatpush.msrb.mxu0 %v3388_v49  ;;  %v3420_v49 = vld [vmem:[#allocation7 + $0x658] sm:$0xff] }
 0x37f   :  { %v3104_v47 = vor.u32 1.1754944e-38, %v3103_v30  ;;  %vm3102_vm11 = vcmp.eq.f32.partialorder %v3101_v5, 8.507059e+37  ;;  %3396 = vmatpush.msrb.mxu0 %v3387_v58  ;;  %v3381_v30 = vld [vmem:[#allocation7 + $0x750] sm:$0xff]  ;;  %v3380_v5 = vld [vmem:[#allocation7 + $0x740] sm:$0xff] }
 0x380   :  { %v3692_v32 = vpop.eup %3691 }
 0x381   :  { %v3075_v12 = vadd.f32 1.0, %v3692_v32  ;;  %3397 = vmatpush.msrb.mxu0 %v3386_v56 }
 0x383   :  { %v3694_v2 = vpop.eup %3693  ;;  %3695 = vrcp.f32 %v3075_v12  ;;  %v3088_v40 = vand.u32 2147483648, %v3075_v12  ;;  %v3086_v20 = vand.u32 2147483647, %v3075_v12  ;;  %vm3082_vm13 = vweird.f32 %v3075_v12  ;;  %3398 = vmatpush.msrb.mxu0 %v3385_v25 }
 0x384   :  { %v3093_v36 = vmul.f32 %v3694_v2, %v3076_v9  ;;  %vm3098_vm8 = vweird.f32 %v3694_v2 }
 0x385   :  { %vm3099_vm10 = vmor %vm3097_vm9, %vm3098_vm8  ;;  %v3089_v17 = vor.u32 1.1754944e-38, %v3088_v40  ;;  %vm3087_vm15 = vcmp.eq.f32.partialorder %v3086_v20, 8.507059e+37  ;;  %3399 = vmatpush.msrb.mxu0 %v3384_v46  ;;  %v3429_v20 = vld [vmem:[#allocation7 + $0x6e8] sm:$0xff] }
 0x386   :  { %v3094_v41 = vsub.f32 1.0, %v3093_v36 }
 0x388   :  { %v3095_v42 = vmul.f32 %v3694_v2, %v3094_v41 }
 0x389   :  { %v3696_v24 = vpop.eup %3695 }
 0x38a   :  { %v3096_v50 = vadd.f32 %v3694_v2, %v3095_v42  ;;  %v3078_v51 = vmul.f32 %v3696_v24, %v3075_v12  ;;  %vm3083_vm12 = vweird.f32 %v3696_v24  ;;  %v3383_v12 = vld [vmem:[#allocation7 + $0x770] sm:$0xff] }
 0x38b   :  { %vm3084_vm14 = vmor %vm3082_vm13, %vm3083_vm12  ;;  %3400 = vmatpush.msrb.mxu0 %v3383_v12  ;;  %v3416_v12 = vld [vmem:[#allocation7 + $0x618] sm:$0xff] }
 0x38c   :  { %v3100_v34 = vsel %vm3099_vm10, %v3694_v2, %v3096_v50  ;;  %v3079_v33 = vsub.f32 1.0, %v3078_v51  ;;  %v3382_v2 = vld [vmem:[#allocation7 + $0x760] sm:$0xff]  ;;  %v3379_v51 = vld [vmem:[#allocation7 + $0x730] sm:$0xff] }
 0x38d   :  { %v3105_v39 = vsel %vm3102_vm11, %v3104_v47, %v3100_v34  ;;  %3401 = vmatpush.msrb.mxu0 %v3382_v2  ;;  %v3378_v47 = vld [vmem:[#allocation7 + $0x720] sm:$0xff]  ;;  %v3413_v2 = vperm.slane %v3704_v63, 5  ;;  %v3498_v63 = vld [vmem:[#allocation7 + $0x708] sm:$0xff] }
 0x38e   :  { %v3108_v45 = vmul.f32 %v3105_v39, %v5449_v21  ;;  %v3080_v26 = vmul.f32 %v3696_v24, %v3079_v33  ;;  %v3297_v21 = vld [vmem:[#allocation7 + $0x640] sm:$0xff]  ;;  %v3377_v33 = vld [vmem:[#allocation7 + $0x710] sm:$0xff] }
 0x38f   :  { %3321 = vmatpush.msra.mxu3 %v3297_v21  ;;  %3402 = vmatpush.msrb.mxu0 %v3381_v30 }
 0x390   :  { %v3081_v14 = vadd.f32 %v3696_v24, %v3080_v26  ;;  %3211 = vmatmul.f32.vlgmr.msrb.gmra.mxu3 %v3108_v45  ;;  %3251 = vmatmul.f32.vlgmr.msra.gmra.mxu1 %v3108_v45  ;;  %v3376_v45 = vld [vmem:[#allocation7 + $0x700] sm:$0xff]  ;;  %v3430_v26 = vld [vmem:[#allocation7 + $0x6f8] sm:$0xff] }
 0x391   :  { %3322 = vmatpush.msra.mxu3 %v3296_v13  ;;  %3403 = vmatpush.msrb.mxu0 %v3380_v5  ;;  %v3512_v5 = vld [vmem:[#allocation7 + $0x7e8] sm:$0xff] }
 0x392   :  { %v3085_v19 = vsel %vm3084_vm14, %v3696_v24, %v3081_v14  ;;  %3432 = vmatpush.msrb.mxu1 %v3430_v26 }
 0x393   :  { %v3090_v28 = vsel %vm3087_vm15, %v3089_v17, %v3085_v19  ;;  %3323 = vmatpush.msra.mxu3 %v3295_v62  ;;  %3404 = vmatpush.msrb.mxu0 %v3379_v51  ;;  %v3428_v19 = vld [vmem:[#allocation7 + $0x6d8] sm:$0xff] }
 0x394   :  { %v3107_v10 = vmul.f32 %v3090_v28, %v3027_v37  ;;  %3433 = vmatpush.msrb.mxu1 %v3429_v20  ;;  %v3427_v28 = vld [vmem:[#allocation7 + $0x6c8] sm:$0xff]  ;;  %v3507_v20 = vld [vmem:[#allocation7 + $0x798] sm:$0xff] }
 0x395   :  { %3324 = vmatpush.msra.mxu3 %v3294_v16  ;;  %3405 = vmatpush.msrb.mxu0 %v3378_v47  ;;  %v3510_v47 = vld [vmem:[#allocation7 + $0x7c8] sm:$0xff] }
 0x396   :  { %3191 = vmatmul.f32.vlgmr.msrb.gmra.mxu2 %v3107_v10  ;;  %3231 = vmatmul.f32.vlgmr.msra.gmra.mxu0 %v3107_v10 }
 0x397   :  { %3325 = vmatpush.msra.mxu3 %v3293_v60  ;;  %3406 = vmatpush.msrb.mxu0 %v3377_v33  ;;  %v3422_v60 = vld [vmem:[#allocation7 + $0x678] sm:$0xff] }
 0x398   :  { %3434 = vmatpush.msrb.mxu1 %v3428_v19  ;;  %v3509_v33 = vld [vmem:[#allocation7 + $0x7b8] sm:$0xff]  ;;  %v3506_v19 = vld [vmem:[#allocation7 + $0x788] sm:$0xff] }
 0x399   :  { %3407 = vmatpush.msrb.mxu0 %v3376_v45 }
 0x39a   :  { %3435 = vmatpush.msrb.mxu1 %v3427_v28 }
 0x39e   :  { %3289 = vmatmul.f32.vlgmr.msra.gmra.mxu2 %v3255_v1  ;;  %v3426_v1 = vld [vmem:[#allocation7 + $0x6b8] sm:$0xff] }
 0x39f   :  { %3436 = vmatpush.msrb.mxu1 %v3426_v1  ;;  %v3505_v1 = vld [vmem:[#allocation7 + $0x778] sm:$0xff] }
 0x3a1   :  { %3437 = vmatpush.msrb.mxu1 %v3425_v38 }
 0x3a3   :  { %3438 = vmatpush.msrb.mxu1 %v3424_v35  ;;  %v3503_v35 = vld [vmem:[#allocation7 + $0x758] sm:$0xff] }
 0x3a5   :  { %3439 = vmatpush.msrb.mxu1 %v3423_v15  ;;  %v3502_v15 = vld [vmem:[#allocation7 + $0x748] sm:$0xff] }
 0x3a7   :  { %3440 = vmatpush.msrb.mxu1 %v3422_v60 }
 0x413   :  { %v5463_v53 = vpop.f32.mrf.mxu3 }
 0x419   :  { %v5457_v59 = vpop.f32.mrf.mxu2 }
 0x41a   :  { %v3193_v56 = vadd.f32 %v5457_v59, %v3173_v43  ;;  %v5481_v59 = vpop.f32.mrf.mxu0  ;;  %v3552_v43 = vld [vmem:[#allocation7 + $0x5f8] sm:$0xff] }
 0x41b   :  { %3554 = vmatpush.msrb.mxu3 %v3552_v43 }
 0x421   :  { %v3290_v54 = vpop.f32.mrf.mxu2 }
 0x422   :  { %v5460_v48 = vadd.f32 %v3290_v54, %v3272_v52  ;;  %v3421_v54 = vld [vmem:[#allocation7 + $0x668] sm:$0xff] }
 0x423   :  { %3441 = vmatpush.msrb.mxu1 %v3421_v54 }
 0x424   :  { %3326 = vmatmul.f32.vlgmr.msra.gmra.mxu3 %v5460_v48 }
 0x425   :  { %3442 = vmatpush.msrb.mxu1 %v3420_v49 }
 0x4a7   :  { %v3327_v27 = vpop.f32.mrf.mxu3 }
 0x4a8   :  { %v5466_v7 = vadd.f32 %v3327_v27, %v3309_v61 }
 0x4aa   :  { %v5469_v37 = vmul.f32 0.70710677, %v5466_v7  ;;  %v3330_v25 = vmul.f32 0.5, %v5466_v7 }
 0x4ac   :  { %v3332_v55 = vmul.f32 %v5469_v37, %v5469_v37 }
 0x4ae   :  { %v3333_v44 = vmin.f32 %v3332_v55, 16.0 }
 0x4b0   :  { %v3334_v8 = vmul.f32 2.1237322e-06, %v3333_v44  ;;  %v3345_v9 = vmul.f32 3.8918573e-05, %v3333_v44 }
 0x4b2   :  { %v3335_v22 = vadd.f32 0.00028619796, %v3334_v8  ;;  %v3346_v18 = vadd.f32 0.001143296, %v3345_v9  ;;  %v3418_v9 = vld [vmem:[#allocation7 + $0x638] sm:$0xff] }
 0x4b4   :  { %v3336_v32 = vmul.f32 %v3335_v22, %v3333_v44  ;;  %v3347_v57 = vmul.f32 %v3346_v18, %v3333_v44  ;;  %v3213_v18 = vadd.f32 %v5463_v53, %v3193_v56  ;;  %v5487_v53 = vpop.f32.mrf.mxu1  ;;  %v3548_v56 = vld [vmem:[#allocation7 + $0x5b8] sm:$0xff] }
 0x4b6   :  { %v3348_v29 = vadd.f32 0.014752088, %v3347_v57  ;;  %v3337_v36 = vadd.f32 0.0036580483, %v3336_v32  ;;  %v3417_v57 = vld [vmem:[#allocation7 + $0x628] sm:$0xff] }
 0x4b8   :  { %v3349_v41 = vmul.f32 %v3348_v29, %v3333_v44  ;;  %v3338_v24 = vmul.f32 %v3337_v36, %v3333_v44  ;;  %v3415_v29 = vld [vmem:[#allocation7 + $0x608] sm:$0xff] }
 0x4ba   :  { %v3350_v42 = vadd.f32 0.112945676, %v3349_v41  ;;  %v3339_v39 = vadd.f32 0.05243302, %v3338_v24 }
 0x4bc   :  { %v3351_v50 = vmul.f32 %v3350_v42, %v3333_v44  ;;  %v3340_v17 = vmul.f32 %v3339_v39, %v3333_v44  ;;  %v3513_v42 = vld [vmem:[#allocation7 + $0x7f8] sm:$0xff] }
 0x4bd   :  { %3514 = vmatpush.msrb.mxu2 %v3513_v42 }
 0x4be   :  { %v3352_v34 = vadd.f32 0.4994258, %v3351_v50  ;;  %v3341_v10 = vadd.f32 0.18741608, %v3340_v17 }
 0x4bf   :  { %3515 = vmatpush.msrb.mxu2 %v3512_v5 }
 0x4c0   :  { %v3353_v40 = vmul.f32 %v3352_v34, %v3333_v44  ;;  %v3342_v6 = vmul.f32 %v3341_v10, %v3333_v44  ;;  %v3419_v44 = vld [vmem:[#allocation7 + $0x648] sm:$0xff] }
 0x4c1   :  { %3443 = vmatpush.msrb.mxu1 %v3419_v44 }
 0x4c2   :  { %v3354_v14 = vadd.f32 1.0, %v3353_v40  ;;  %v3343_v13 = vadd.f32 1.1283791, %v3342_v6  ;;  %v3508_v40 = vld [vmem:[#allocation7 + $0x7a8] sm:$0xff] }
 0x4c3   :  { %3444 = vmatpush.msrb.mxu1 %v3418_v9 }
 0x4c4   :  { %3697 = vrcp.f32 %v3354_v14  ;;  %v3366_v21 = vand.u32 2147483648, %v3354_v14  ;;  %v3364_v16 = vand.u32 2147483647, %v3354_v14  ;;  %vm3360_vm1 = vweird.f32 %v3354_v14 }
 0x4c5   :  { %v3344_v27 = vmul.f32 %v3343_v13, %v5469_v37  ;;  %3445 = vmatpush.msrb.mxu1 %v3417_v57 }
 0x4c6   :  { %v3367_v61 = vor.u32 1.1754944e-38, %v3366_v21  ;;  %vm3365_vm3 = vcmp.eq.f32.partialorder %v3364_v16, 8.507059e+37  ;;  %v3500_v16 = vld [vmem:[#allocation7 + $0x728] sm:$0xff] }
 0x4c7   :  { %3446 = vmatpush.msrb.mxu1 %v3416_v12 }
 0x4c9   :  { %3447 = vmatpush.msrb.mxu1 %v3415_v29 }
 0x4ca   :  { %v3698_v3 = vpop.eup %3697 }
 0x4cb   :  { %v3356_v11 = vmul.f32 %v3698_v3, %v3354_v14  ;;  %vm3361_vm0 = vweird.f32 %v3698_v3 }
 0x4cc   :  { %vm3362_vm2 = vmor %vm3360_vm1, %vm3361_vm0 }
 0x4cd   :  { %v3357_v4 = vsub.f32 1.0, %v3356_v11 }
 0x4cf   :  { %v3358_v62 = vmul.f32 %v3698_v3, %v3357_v4 }
 0x4d1   :  { %v3359_v52 = vadd.f32 %v3698_v3, %v3358_v62  ;;  %v3501_v62 = vld [vmem:[#allocation7 + $0x738] sm:$0xff] }
 0x4d3   :  { %v3363_v0 = vsel %vm3362_vm2, %v3698_v3, %v3359_v52  ;;  %v3504_v3 = vld [vmem:[#allocation7 + $0x768] sm:$0xff]  ;;  %v3499_v52 = vld [vmem:[#allocation7 + $0x718] sm:$0xff] }
 0x4d4   :  { %v3368_v55 = vsel %vm3365_vm3, %v3367_v61, %v3363_v0 }
 0x4d5   :  { %v3369_v58 = vmul.f32 %v3368_v55, %v3344_v27  ;;  %v3551_v27 = vld [vmem:[#allocation7 + $0x5e8] sm:$0xff]  ;;  %v3550_v55 = vld [vmem:[#allocation7 + $0x5d8] sm:$0xff] }
 0x4d6   :  { %3555 = vmatpush.msrb.mxu3 %v3551_v27 }
 0x4d7   :  { %v3613_v8 = vclamps-f32 %v3369_v58, 1.0  ;;  %v3549_v58 = vld [vmem:[#allocation7 + $0x5c8] sm:$0xff] }
 0x4d8   :  { %3556 = vmatpush.msrb.mxu3 %v3550_v55 }
 0x4d9   :  { %v3372_v22 = vadd.f32 1.0, %v3613_v8  ;;  %v3547_v8 = vld [vmem:[#allocation7 + $0x5a8] sm:$0xff] }
 0x4da   :  { %3557 = vmatpush.msrb.mxu3 %v3549_v58 }
 0x4db   :  { %v3373_v37 = vmul.f32 %v3372_v22, %v3330_v25 }
 0x4dc   :  { %3558 = vmatpush.msrb.mxu3 %v3548_v56 }
 0x4dd   :  { %v3374_v46 = vadd.f32 %v3373_v37, %v3213_v18  ;;  %v3546_v18 = vld [vmem:[#allocation7 + $0x598] sm:$0xff] }
 0x4de   :  { %3559 = vmatpush.msrb.mxu3 %v3547_v8 }
 0x4df   :  { %v3375_v32 = vadd.f32 %v3374_v46, %v5389_v23  ;;  %v5492_v23 = vld [vmem:[%s5518_s4 + $0x8] sm:$0xff]  ;;  %s3813_s4 = smov [#allocation8]  }
 0x4e0   :  { %v3431_v30 = vperm.slane %v5492_v23, 4  ;;  %v3545_v46 = vld [vmem:[#allocation7 + $0x588] sm:$0xff]  ;;  %3560 = vmatpush.msrb.mxu3 %v3546_v18  ;;  %v3174_v42 = vperm.slane %v5492_v23, 2  ;;  %s3580_s24 = sshll.u32 %s3813_s4, 4  ;;  %s3581_s24 = int_to_ptr.vmem [resolvable:$true] %s3580_s24 }
 0x4e1   :  { %3408 = vmatmul.f32.vlgmr.msrb.gmra.mxu0 %v3375_v32 }
 0x4e2   :  { %3561 = vmatpush.msrb.mxu3 %v3545_v46 }
 0x55e   :  { %v3409_v36 = vpop.f32.mrf.mxu0 }
 0x55f   :  { %v3412_v7 = vadd.f32 %v3409_v36, %v5460_v48  ;;  %v3511_v48 = vld [vmem:[#allocation7 + $0x7d8] sm:$0xff] }
 0x560   :  { %3516 = vmatpush.msrb.mxu2 %v3511_v48  ;;  %v3542_v48 = vld [vmem:[#allocation7 + $0x558] sm:$0xff] }
 0x561   :  { %v5484_v41 = vadd.f32 %v3413_v2, %v3412_v7  ;;  %v3544_v2 = vld [vmem:[#allocation7 + $0x578] sm:$0xff]  ;;  %v3543_v7 = vld [vmem:[#allocation7 + $0x568] sm:$0xff] }
 0x562   :  { %3517 = vmatpush.msrb.mxu2 %v3510_v47  ;;  %3562 = vmatpush.msrb.mxu3 %v3544_v2 }
 0x563   :  { %3448 = vmatmul.f32.vlgmr.msrb.gmra.mxu1 %v5484_v41 }
 0x564   :  { %3518 = vmatpush.msrb.mxu2 %v3509_v33  ;;  %3563 = vmatpush.msrb.mxu3 %v3543_v7  ;;  %v3541_v33 = vld [vmem:[#allocation7 + $0x548] sm:$0xff] }
 0x566   :  { %3519 = vmatpush.msrb.mxu2 %v3508_v40  ;;  %3564 = vmatpush.msrb.mxu3 %v3542_v48 }
 0x568   :  { %3520 = vmatpush.msrb.mxu2 %v3507_v20  ;;  %3565 = vmatpush.msrb.mxu3 %v3541_v33 }
 0x56a   :  { %3521 = vmatpush.msrb.mxu2 %v3506_v19 }
 0x56c   :  { %3522 = vmatpush.msrb.mxu2 %v3505_v1  ;;  %v3537_v1 = vld [vmem:[#allocation7 + $0x508] sm:$0xff] }
 0x56e   :  { %3523 = vmatpush.msrb.mxu2 %v3504_v3 }
 0x570   :  { %3524 = vmatpush.msrb.mxu2 %v3503_v35 }
 0x572   :  { %3525 = vmatpush.msrb.mxu2 %v3502_v15 }
 0x574   :  { %3526 = vmatpush.msrb.mxu2 %v3501_v62 }
 0x576   :  { %3527 = vmatpush.msrb.mxu2 %v3500_v16 }
 0x578   :  { %3528 = vmatpush.msrb.mxu2 %v3499_v52 }
 0x57a   :  { %3529 = vmatpush.msrb.mxu2 %v3498_v63 }
 0x5e0   :  { %v3449_v24 = vpop.f32.mrf.mxu1 }
 0x5e1   :  { %v5495_v50 = vadd.f32 %v3449_v24, %v3431_v30 }
 0x5e3   :  { %v5498_v51 = vmul.f32 0.70710677, %v5495_v50 }
 0x5e5   :  { %v3454_v34 = vmul.f32 %v5498_v51, %v5498_v51 }
 0x5e7   :  { %v3455_v39 = vmin.f32 %v3454_v34, 16.0 }
 0x5e9   :  { %v3456_v45 = vmul.f32 2.1237322e-06, %v3455_v39  ;;  %v3467_v26 = vmul.f32 3.8918573e-05, %v3455_v39 }
 0x5eb   :  { %v3457_v14 = vadd.f32 0.00028619796, %v3456_v45  ;;  %v3468_v17 = vadd.f32 0.001143296, %v3467_v26  ;;  %v3540_v45 = vld [vmem:[#allocation7 + $0x538] sm:$0xff]  ;;  %v3452_v26 = vmul.f32 0.5, %v5495_v50 }
 0x5ec   :  { %3566 = vmatpush.msrb.mxu3 %v3540_v45 }
 0x5ed   :  { %v3458_v28 = vmul.f32 %v3457_v14, %v3455_v39  ;;  %v3469_v10 = vmul.f32 %v3468_v17, %v3455_v39 }
 0x5ef   :  { %v3470_v38 = vadd.f32 0.014752088, %v3469_v10  ;;  %v3459_v6 = vadd.f32 0.0036580483, %v3458_v28  ;;  %v3539_v28 = vld [vmem:[#allocation7 + $0x528] sm:$0xff]  ;;  %v3538_v10 = vld [vmem:[#allocation7 + $0x518] sm:$0xff] }
 0x5f0   :  { %3567 = vmatpush.msrb.mxu3 %v3539_v28 }
 0x5f1   :  { %v3471_v11 = vmul.f32 %v3470_v38, %v3455_v39  ;;  %v3460_v21 = vmul.f32 %v3459_v6, %v3455_v39 }
 0x5f2   :  { %3568 = vmatpush.msrb.mxu3 %v3538_v10 }
 0x5f3   :  { %v3472_v4 = vadd.f32 0.112945676, %v3471_v11  ;;  %v3461_v54 = vadd.f32 0.05243302, %v3460_v21 }
 0x5f4   :  { %3569 = vmatpush.msrb.mxu3 %v3537_v1 }
 0x5f5   :  { %v3473_v13 = vmul.f32 %v3472_v4, %v3455_v39  ;;  %v3462_v49 = vmul.f32 %v3461_v54, %v3455_v39 }
 0x5f7   :  { %v3474_v60 = vadd.f32 0.4994258, %v3473_v13  ;;  %v3463_v44 = vadd.f32 0.18741608, %v3462_v49 }
 0x5f9   :  { %v3475_v61 = vmul.f32 %v3474_v60, %v3455_v39  ;;  %v3464_v25 = vmul.f32 %v3463_v44, %v3455_v39  ;;  %v3233_v39 = vadd.f32 %v5481_v59, %v3174_v42  ;;  %v3535_v59 = vperm.slane %v5492_v23, 5 }
 0x5fb   :  { %v3476_v0 = vadd.f32 1.0, %v3475_v61  ;;  %v3465_v57 = vadd.f32 1.1283791, %v3464_v25  ;;  %v3253_v14 = vadd.f32 %v5487_v53, %v3233_v39  ;;  %v3553_v53 = vperm.slane %v5492_v23, 3 }
 0x5fd   :  { %3699 = vrcp.f32 %v3476_v0  ;;  %v3488_v32 = vand.u32 2147483648, %v3476_v0  ;;  %v3486_v29 = vand.u32 2147483647, %v3476_v0  ;;  %vm3482_vm5 = vweird.f32 %v3476_v0 }
 0x5fe   :  { %v3466_v5 = vmul.f32 %v3465_v57, %v5498_v51 }
 0x5ff   :  { %v3489_v30 = vor.u32 1.1754944e-38, %v3488_v32  ;;  %vm3487_vm7 = vcmp.eq.f32.partialorder %v3486_v29, 8.507059e+37 }
 0x603   :  { %v3700_v9 = vpop.eup %3699 }
 0x604   :  { %v3478_v22 = vmul.f32 %v3700_v9, %v3476_v0  ;;  %vm3483_vm4 = vweird.f32 %v3700_v9 }
 0x605   :  { %vm3484_vm6 = vmor %vm3482_vm5, %vm3483_vm4 }
 0x606   :  { %v3479_v37 = vsub.f32 1.0, %v3478_v22 }
 0x608   :  { %v3480_v12 = vmul.f32 %v3700_v9, %v3479_v37 }
 0x60a   :  { %v3481_v36 = vadd.f32 %v3700_v9, %v3480_v12 }
 0x60c   :  { %v3485_v24 = vsel %vm3484_vm6, %v3700_v9, %v3481_v36 }
 0x60d   :  { %v3490_v47 = vsel %vm3487_vm7, %v3489_v30, %v3485_v24 }
 0x60e   :  { %v3491_v34 = vmul.f32 %v3490_v47, %v3466_v5 }
 0x610   :  { %v3614_v40 = vclamps-f32 %v3491_v34, 1.0 }
 0x612   :  { %v3494_v20 = vadd.f32 1.0, %v3614_v40 }
 0x614   :  { %v3495_v51 = vmul.f32 %v3494_v20, %v3452_v26 }
 0x616   :  { %v3496_v17 = vadd.f32 %v3495_v51, %v3253_v14 }
 0x618   :  { %v3497_v19 = vadd.f32 %v3496_v17, %v5397_v31 }
 0x61a   :  { %3530 = vmatmul.f32.vlgmr.msrb.gmra.mxu2 %v3497_v19 }
 0x69d   :  { %v3531_v38 = vpop.f32.mrf.mxu2 }
 0x69e   :  { %v3534_v50 = vadd.f32 %v3531_v38, %v5484_v41 }
 0x6a0   :  { %v3536_v3 = vadd.f32 %v3535_v59, %v3534_v50 }
 0x6a2   :  { %3570 = vmatmul.f32.vlgmr.msrb.gmra.mxu3 %v3536_v3 }
 0x725   :  { %v3571_v31 = vpop.f32.mrf.mxu3 }
 0x726   :  { %v3572_v6 = vadd.f32 %v3571_v31, %v3553_v53 }
 0x728   :  { %3574 = vst [vmem:[#allocation8] sm:$0xff] %v3572_v6 }
 0x729   :  { %3585 = dma.vmem_to_hbm [thread:$0]  %s3581_s24, 128, %s3583_s27, [#allocation4]  }
 0x72a   :  { %3806 = dma.done.wait [#allocation4], 128  }
 0x72b   :  { %3807 = vsyncadd [#allocation4], 4294967168 }
 0x72c   :  { %3590 = vsyncpa [#allocation3], 1 }
 0x72d   :  { %3591 = vsyncpa [#allocation6], 1 }
 0x72e   :  { %3592 = vsyncpa [#allocation4], 1 }

</bundles_post_ra>
